<compile_context>
chip_gen: v7x
topology: tpu7x:2x2x1
jax: 0.10.0
libtpu: 0.0.40
codegen_flags: <defaults>
</compile_context>

<pallas_src>
import math
import functools

import jax
import jax.numpy as jnp
from jax.experimental import pallas as pl
from jax.experimental.pallas import tpu as pltpu


# -----------------------------------------------------------------------------
# Small synthetic configuration of ImageTextCorrection
# -----------------------------------------------------------------------------
EMBED_DIM = 32            # module arg `embed_dim` (text side)
VIT_DIM = 64              # self.vit.embed_dim (768 for real vit_base; shrunk)
IMG_HEADS = 8             # image_attention num_heads
FUSE_HEADS = 4            # self_attention_layers num_heads
N_SA_LAYERS = 2
NUM_CLASSES = 1
PATCH = 4                 # synthetic ViT patch size
IMG_SIZE = 16
N_TOKENS = (IMG_SIZE // PATCH) ** 2 + 1   # 17 = patches + cls token
PAD_TOKENS = 24                           # token dim padded to a sublane multiple of 8
CLS_PAD = 128                             # lane-dense classifier output slab width
NEG_INF = -1e30

VMEM = pltpu.MemorySpace.VMEM


# -----------------------------------------------------------------------------
# In-kernel helpers
# -----------------------------------------------------------------------------
def _softmax_lastdim(s):
    m = jnp.max(s, axis=-1, keepdims=True)
    e = jnp.exp(s - m)
    return e * pl.reciprocal(jnp.sum(e, axis=-1, keepdims=True), approx=True)


def _l2_normalize(x, eps=1e-12):
    # F.normalize(p=2, dim=-1): x / max(||x||, eps)  ==  x * rsqrt(max(||x||^2, eps^2))
    n2 = jnp.sum(x * x, axis=-1, keepdims=True)
    return x * jax.lax.rsqrt(jnp.maximum(n2, eps * eps))


def _block_attention(x, w_qkv, b_qkv, bias, num_heads, e):
    """Self-attention over the rows of x restricted by an additive score bias.

    x: (R, e).  w_qkv: (e, 3e), 1/sqrt(head_dim) scale already folded into the Q
    columns; b_qkv: (1, 3e).  bias: (R, R) additive mask (0 for allowed keys,
    -1e30 for cross-block / padded keys).  Returns the per-head contexts
    concatenated along lanes, i.e. the pre-output-projection context (R, e).
    """
    f32 = jnp.float32
    qkv = jnp.dot(x, w_qkv, preferred_element_type=f32) + b_qkv          # (R, 3e)
    hd = e // num_heads
    ctx = []
    for h in range(num_heads):
        q = qkv[:, h * hd:(h + 1) * hd]
        k = qkv[:, e + h * hd: e + (h + 1) * hd]
        v = qkv[:, 2 * e + h * hd: 2 * e + (h + 1) * hd]
        s = jax.lax.dot_general(q, k, (((1,), (1,)), ((), ())),
                                preferred_element_type=f32) + bias       # (R, R)
        p = _softmax_lastdim(s)
        ctx.append(jnp.dot(p, v, preferred_element_type=f32))            # (R, hd)
    return jnp.concatenate(ctx, axis=-1)                                 # (R, e)


# -----------------------------------------------------------------------------
# Single fused kernel: image pipeline + text MLP + fusion attention + classifier
# -----------------------------------------------------------------------------
def _itc_kernel(patches_ref, add_ref, w_patch_ref,
                wqkv_i_ref, bqkv_i_ref, wo_i_ref, bo_sum_i_ref,
                bias_img_ref, seg_img_ref,
                w_l1_ref, b_l1_ref, w_l2_ref, b_l2_ref,
                text_ref, w_b1_ref, b_b1_ref, w_b2_ref, b_b2_ref,
                rep_ref, bias_fuse_ref,
                wqkv_f_ref, bqkv_f_ref, wo_f_ref, bo_f_ref,
                w_cls_ref, b_cls_ref,
                o_ref,
                *, img_heads, fuse_heads, n_layers, vit_dim, fuse_dim):
    f32 = jnp.float32

    # ---- image pipeline: patch embed -> 8-head MHA -> token sum -> MLP -> L2 norm
    tokens = jnp.dot(patches_ref[...], w_patch_ref[...],
                     preferred_element_type=f32) + add_ref[...]           # (B*Lp, V)
    ctx = _block_attention(tokens, wqkv_i_ref[...], bqkv_i_ref[...],
                           bias_img_ref[...], img_heads, vit_dim)         # (B*Lp, V)
    # Segment-sum over the 17 valid tokens of each image (also drops pad query
    # rows); the linear output projection commutes with the sum, its bias is
    # pre-multiplied by the token count in the wrapper.
    ctx_sum = jnp.dot(seg_img_ref[...], ctx, preferred_element_type=f32)  # (B, V)
    h_img = jnp.dot(ctx_sum, wo_i_ref[...],
                    preferred_element_type=f32) + bo_sum_i_ref[...]       # (B, V)
    x1 = jnp.maximum(jnp.dot(h_img, w_l1_ref[...],
                             preferred_element_type=f32) + b_l1_ref[...], 0.0)
    zis = _l2_normalize(jnp.dot(x1, w_l2_ref[...],
                                preferred_element_type=f32) + b_l2_ref[...])  # (B, 2E) right half

    # ---- text MLP over all T*B rows at once -> L2 norm -> concat-as-add with zis
    xt = text_ref[...]                                                    # (T*B, E)
    h1 = jnp.maximum(jnp.dot(xt, w_b1_ref[...],
                             preferred_element_type=f32) + b_b1_ref[...], 0.0)
    zjs = _l2_normalize(jnp.dot(h1, w_b2_ref[...],
                                preferred_element_type=f32) + b_b2_ref[...])  # (T*B, 2E) left half
    # torch.cat([zjs, zis_exp], -1) == add of half-padded slabs; zis broadcast over T
    # via a tiny (T*B, B) replication matmul (no in-kernel reshape needed).
    fused = zjs + jnp.dot(rep_ref[...], zis, preferred_element_type=f32)  # (T*B, 2E)

    # ---- fusion self-attention layers.  NOTE: nn.MultiheadAttention defaults to
    # batch_first=False and the PyTorch forward does NOT permute the fused
    # embeddings, so attention mixes over the batch dim B with T acting as the
    # batch; reproduced exactly by a block-diagonal mask over the T*B rows.
    bias_f = bias_fuse_ref[...]
    for layer in range(n_layers):
        ctx_f = _block_attention(fused, wqkv_f_ref[layer], bqkv_f_ref[layer],
                                 bias_f, fuse_heads, fuse_dim)            # (T*B, 2E)
        fused = jnp.dot(ctx_f, wo_f_ref[layer],
                        preferred_element_type=f32) + bo_f_ref[layer]

    # ---- classifier as a lane-dense 128-wide slab (real logit in column 0)
    o_ref[...] = jnp.dot(fused, w_cls_ref[...],
                         preferred_element_type=f32) + b_cls_ref[...]


# -----------------------------------------------------------------------------
# One-time wrapper-side packing (cache the result; reuse across forward calls)
# -----------------------------------------------------------------------------
def _pack_mha_qkv(p, e, num_heads):
    """Fused QKV projection with the 1/sqrt(head_dim) scale folded into Q."""
    scale = 1.0 / math.sqrt(e // num_heads)
    col_scale = jnp.concatenate([jnp.full((e,), scale, jnp.float32),
                                 jnp.ones((2 * e,), jnp.float32)])
    return p["w_qkv"] * col_scale[None, :], (p["b_qkv"] * col_scale)[None, :]


def build_packed(params, batch, t_len):
    E, V = EMBED_DIM, VIT_DIM
    twoE = 2 * E
    L, Lp = N_TOKENS, PAD_TOKENS
    f32 = jnp.float32

    # image attention: fused QKV (scale folded); out-proj bias pre-summed over L tokens
    wqkv_i, bqkv_i = _pack_mha_qkv(params["image_attention"], V, IMG_HEADS)
    wo_i = params["image_attention"]["w_o"]
    bo_sum_i = (float(L) * params["image_attention"]["b_o"])[None, :]

    # cls token + pos embed + patch-embed bias folded into one additive term,
    # zero-padded to Lp rows and tiled over the batch.
    pos = params["pos_embed"][0]
    add_one = jnp.concatenate([pos[:1] + params["cls_token"][0],
                               pos[1:] + params["b_patch"][None, :]], axis=0)   # (L, V)
    add_full = jnp.tile(jnp.pad(add_one, ((0, Lp - L), (0, 0))), (batch, 1))    # (B*Lp, V)

    # block-diagonal score bias (per image, with pad-key masking) and the
    # segment-sum matrix (sums the 17 valid token rows of each image).
    ridx = jnp.arange(batch * Lp)
    blk = ridx // Lp
    valid = (ridx % Lp) < L
    bias_img = jnp.where((blk[:, None] == blk[None, :]) & valid[None, :],
                         0.0, NEG_INF).astype(f32)                              # (B*Lp, B*Lp)
    seg_img = ((blk[None, :] == jnp.arange(batch)[:, None])
               & valid[None, :]).astype(f32)                                    # (B, B*Lp)

    # vit_l2 padded into the RIGHT half / bert_l2 into the LEFT half of the 2E slab.
    w_l2 = jnp.concatenate([jnp.zeros((V, E), f32), params["w_vit_l2"]], axis=1)
    b_l2 = jnp.concatenate([jnp.zeros((E,), f32), params["b_vit_l2"]])[None, :]
    w_b2 = jnp.concatenate([params["w_bert_l2"], jnp.zeros((E, E), f32)], axis=1)
    b_b2 = jnp.concatenate([params["b_bert_l2"], jnp.zeros((E,), f32)])[None, :]

    # fusion attention layers, stacked over layers (fused QKV, scale folded).
    q_list, b_list = zip(*[_pack_mha_qkv(lp, twoE, FUSE_HEADS)
                           for lp in params["self_attention_layers"]])
    wqkv_f = jnp.stack(q_list)                                                  # (Ln, 2E, 6E)
    bqkv_f = jnp.stack(b_list)                                                  # (Ln, 1, 6E)
    wo_f = jnp.stack([lp["w_o"] for lp in params["self_attention_layers"]])     # (Ln, 2E, 2E)
    bo_f = jnp.stack([lp["b_o"][None, :] for lp in params["self_attention_layers"]])

    # zis broadcast-over-T matrix and the per-t block-diagonal fusion score bias.
    tb = jnp.arange(t_len * batch)
    rep = (tb[:, None] % batch == jnp.arange(batch)[None, :]).astype(f32)       # (T*B, B)
    tblk = tb // batch
    bias_fuse = jnp.where(tblk[:, None] == tblk[None, :], 0.0, NEG_INF).astype(f32)

    # lane-dense classifier slab.
    w_cls = jnp.zeros((twoE, CLS_PAD), f32).at[:, :NUM_CLASSES].set(params["w_cls"])
    b_cls = jnp.zeros((1, CLS_PAD), f32).at[:, :NUM_CLASSES].set(params["b_cls"][None, :])

    return dict(
        w_patch=params["w_patch"], add_full=add_full,
        wqkv_i=wqkv_i, bqkv_i=bqkv_i, wo_i=wo_i, bo_sum_i=bo_sum_i,
        bias_img=bias_img, seg_img=seg_img,
        w_l1=params["w_vit_l1"], b_l1=params["b_vit_l1"][None, :],
        w_l2=w_l2, b_l2=b_l2,
        w_b1=params["w_bert_l1"], b_b1=params["b_bert_l1"][None, :],
        w_b2=w_b2, b_b2=b_b2,
        rep=rep, bias_fuse=bias_fuse,
        wqkv_f=wqkv_f, bqkv_f=bqkv_f, wo_f=wo_f, bo_f=bo_f,
        w_cls=w_cls, b_cls=b_cls,
    )


# -----------------------------------------------------------------------------
# Module forward (single pallas_call, no grid)
# -----------------------------------------------------------------------------
def forward(packed, image, text_hidden):
    B, C, H, W = image.shape
    _, T, E = text_hidden.shape
    nh, nw = H // PATCH, W // PATCH
    n_patch = nh * nw

    # ---- synthetic stand-in for the frozen self.vit.forward_features(image):
    # non-overlapping Conv2d patch embed == im2col here + matmul inside the kernel.
    # TODO(synk): the 12 frozen pretrained ViT-B/16 blocks + final LayerNorm of
    # timm's forward_features are not replicated.
    x = image.reshape(B, C, nh, PATCH, nw, PATCH)
    x = jnp.transpose(x, (0, 2, 4, 1, 3, 5)).reshape(B, n_patch, C * PATCH * PATCH)
    # row 0 = cls-token slot; rows N_TOKENS..PAD_TOKENS-1 = masked pad rows.
    patches = jnp.pad(x, ((0, 0), (1, PAD_TOKENS - 1 - n_patch), (0, 0)))
    patches = patches.reshape(B * PAD_TOKENS, C * PATCH * PATCH)

    # TODO(synk): the frozen HuggingFace text LLM backbone is not replicated; its
    # last_hidden_state is taken directly as `text_hidden` (visualization=True path).
    text2d = jnp.transpose(text_hidden, (1, 0, 2)).reshape(T * B, E)   # rows ordered (t, b)

    p = packed
    operands = (
        patches, p["add_full"], p["w_patch"],
        p["wqkv_i"], p["bqkv_i"], p["wo_i"], p["bo_sum_i"],
        p["bias_img"], p["seg_img"],
        p["w_l1"], p["b_l1"], p["w_l2"], p["b_l2"],
        text2d, p["w_b1"], p["b_b1"], p["w_b2"], p["b_b2"],
        p["rep"], p["bias_fuse"],
        p["wqkv_f"], p["bqkv_f"], p["wo_f"], p["bo_f"],
        p["w_cls"], p["b_cls"],
    )
    vspec = pl.BlockSpec(memory_space=VMEM)
    out = pl.pallas_call(
        functools.partial(_itc_kernel,
                          img_heads=IMG_HEADS, fuse_heads=FUSE_HEADS,
                          n_layers=N_SA_LAYERS, vit_dim=VIT_DIM,
                          fuse_dim=2 * EMBED_DIM),
        in_specs=[vspec] * len(operands),
        out_specs=vspec,
        out_shape=jax.ShapeDtypeStruct((T * B, CLS_PAD), jnp.float32),
    )(*operands)

    # (T*B, CLS_PAD) -> (B, T, NUM_CLASSES)
    return jnp.transpose(out.reshape(T, B, CLS_PAD)[:, :, :NUM_CLASSES], (1, 0, 2))


# -----------------------------------------------------------------------------
# Deterministic synthetic parameter init (same structure as before)
# -----------------------------------------------------------------------------
def _xavier(key, shape):
    fan_in, fan_out = shape
    lim = math.sqrt(6.0 / (fan_in + fan_out))
    return jax.random.uniform(key, shape, jnp.float32, -lim, lim)


def _mha_params(key, e):
    k1, k2 = jax.random.split(key)
    return {
        "w_qkv": _xavier(k1, (e, 3 * e)),
        "b_qkv": jnp.zeros((3 * e,), jnp.float32),
        "w_o": _xavier(k2, (e, e)),
        "b_o": jnp.zeros((e,), jnp.float32),
    }


def init_params(key):
    ks = jax.random.split(key, 12)
    return {
        "w_patch": _xavier(ks[0], (3 * PATCH * PATCH, VIT_DIM)),
        "b_patch": jnp.zeros((VIT_DIM,), jnp.float32),
        "cls_token": 0.02 * jax.random.normal(ks[1], (1, 1, VIT_DIM), jnp.float32),
        "pos_embed": 0.02 * jax.random.normal(ks[2], (1, N_TOKENS, VIT_DIM), jnp.float32),
        "image_attention": _mha_params(ks[3], VIT_DIM),
        "w_vit_l1": _xavier(ks[4], (VIT_DIM, VIT_DIM)),
        "b_vit_l1": jnp.full((VIT_DIM,), 0.01, jnp.float32),
        "w_vit_l2": _xavier(ks[5], (VIT_DIM, EMBED_DIM)),
        "b_vit_l2": jnp.full((EMBED_DIM,), 0.01, jnp.float32),
        "w_bert_l1": _xavier(ks[6], (EMBED_DIM, EMBED_DIM)),
        "b_bert_l1": jnp.full((EMBED_DIM,), 0.01, jnp.float32),
        "w_bert_l2": _xavier(ks[7], (EMBED_DIM, EMBED_DIM)),
        "b_bert_l2": jnp.full((EMBED_DIM,), 0.01, jnp.float32),
        "self_attention_layers": [
            _mha_params(ks[8], 2 * EMBED_DIM),
            _mha_params(ks[9], 2 * EMBED_DIM),
        ],
        "w_cls": _xavier(ks[10], (2 * EMBED_DIM, NUM_CLASSES)),
        "b_cls": jnp.full((NUM_CLASSES,), 0.01, jnp.float32),
    }


if __name__ == "__main__":
    B, T = 2, 8
    key = jax.random.PRNGKey(0)
    kp, ki, kt = jax.random.split(key, 3)
    params = init_params(kp)
    image = jax.random.normal(ki, (B, 3, IMG_SIZE, IMG_SIZE), jnp.float32)
    text_hidden = jax.random.normal(kt, (B, T, EMBED_DIM), jnp.float32)

    # Weight packing happens once, outside the per-call jit (weight-stationary).
    packed = jax.tree_util.tree_map(jax.block_until_ready, build_packed(params, B, T))

    fwd = jax.jit(forward)
    out = jax.block_until_ready(fwd(packed, image, text_hidden))
    assert out.shape == (B, T, NUM_CLASSES), out.shape
    assert bool(jnp.all(jnp.isfinite(out)))
    print("KERNEL_OK")
</pallas_src>

<mosaic_0001>
module attributes {stable_mosaic.version = 11 : i64} {
  func.func @_itc_kernel(%arg0: memref<48x48xf32, #tpu.memory_space<vmem>>, %arg1: memref<48x64xf32, #tpu.memory_space<vmem>>, %arg2: memref<48x64xf32, #tpu.memory_space<vmem>>, %arg3: memref<64x192xf32, #tpu.memory_space<vmem>>, %arg4: memref<1x192xf32, #tpu.memory_space<vmem>>, %arg5: memref<64x64xf32, #tpu.memory_space<vmem>>, %arg6: memref<1x64xf32, #tpu.memory_space<vmem>>, %arg7: memref<48x48xf32, #tpu.memory_space<vmem>>, %arg8: memref<2x48xf32, #tpu.memory_space<vmem>>, %arg9: memref<64x64xf32, #tpu.memory_space<vmem>>, %arg10: memref<1x64xf32, #tpu.memory_space<vmem>>, %arg11: memref<64x64xf32, #tpu.memory_space<vmem>>, %arg12: memref<1x64xf32, #tpu.memory_space<vmem>>, %arg13: memref<16x32xf32, #tpu.memory_space<vmem>>, %arg14: memref<32x32xf32, #tpu.memory_space<vmem>>, %arg15: memref<1x32xf32, #tpu.memory_space<vmem>>, %arg16: memref<32x64xf32, #tpu.memory_space<vmem>>, %arg17: memref<1x64xf32, #tpu.memory_space<vmem>>, %arg18: memref<16x2xf32, #tpu.memory_space<vmem>>, %arg19: memref<16x16xf32, #tpu.memory_space<vmem>>, %arg20: memref<2x64x192xf32, #tpu.memory_space<vmem>>, %arg21: memref<2x1x192xf32, #tpu.memory_space<vmem>>, %arg22: memref<2x64x64xf32, #tpu.memory_space<vmem>>, %arg23: memref<2x1x64xf32, #tpu.memory_space<vmem>>, %arg24: memref<64x128xf32, #tpu.memory_space<vmem>>, %arg25: memref<1x128xf32, #tpu.memory_space<vmem>>, %arg26: memref<16x128xf32, #tpu.memory_space<vmem>>) attributes {dimension_semantics = [], scalar_prefetch = 0 : i64, scratch_operands = 0 : i64, tpu.core_type = #tpu.core_type<tc>} {
    %c0 = arith.constant 0 : index
    %c0_0 = arith.constant 0 : index
    %0 = vector.load %arg0[%c0, %c0_0] : memref<48x48xf32, #tpu.memory_space<vmem>>, vector<48x48xf32>
    %c0_1 = arith.constant 0 : index
    %c0_2 = arith.constant 0 : index
    %1 = vector.load %arg2[%c0_1, %c0_2] : memref<48x64xf32, #tpu.memory_space<vmem>>, vector<48x64xf32>
    %cst = arith.constant dense<0.000000e+00> : vector<48x64xf32>
    %2 = tpu.matmul %0, %1, %cst {dimension_numbers = #tpu.dot_dimension_numbers<[1], [0], [0], [1], [0, 0, 1, 1], [], []>} : vector<48x48xf32>, vector<48x64xf32>, vector<48x64xf32> -> vector<48x64xf32>
    %c0_3 = arith.constant 0 : index
    %c0_4 = arith.constant 0 : index
    %3 = vector.load %arg1[%c0_3, %c0_4] : memref<48x64xf32, #tpu.memory_space<vmem>>, vector<48x64xf32>
    %4 = arith.addf %2, %3 : vector<48x64xf32>
    %c0_5 = arith.constant 0 : index
    %c0_6 = arith.constant 0 : index
    %5 = vector.load %arg3[%c0_5, %c0_6] : memref<64x192xf32, #tpu.memory_space<vmem>>, vector<64x192xf32>
    %c0_7 = arith.constant 0 : index
    %c0_8 = arith.constant 0 : index
    %6 = vector.load %arg4[%c0_7, %c0_8] : memref<1x192xf32, #tpu.memory_space<vmem>>, vector<1x192xf32>
    %c0_9 = arith.constant 0 : index
    %c0_10 = arith.constant 0 : index
    %7 = vector.load %arg7[%c0_9, %c0_10] : memref<48x48xf32, #tpu.memory_space<vmem>>, vector<48x48xf32>
    %cst_11 = arith.constant dense<0.000000e+00> : vector<48x192xf32>
    %8 = tpu.matmul %4, %5, %cst_11 {dimension_numbers = #tpu.dot_dimension_numbers<[1], [0], [0], [1], [0, 0, 1, 1], [], []>} : vector<48x64xf32>, vector<64x192xf32>, vector<48x192xf32> -> vector<48x192xf32>
    %9 = vector.broadcast %6 : vector<1x192xf32> to vector<48x192xf32>
    %10 = arith.addf %8, %9 : vector<48x192xf32>
    %11 = vector.extract_strided_slice %10 {offsets = [0, 0], sizes = [48, 8], strides = [1, 1]} : vector<48x192xf32> to vector<48x8xf32>
    %12 = vector.extract_strided_slice %10 {offsets = [0, 64], sizes = [48, 8], strides = [1, 1]} : vector<48x192xf32> to vector<48x8xf32>
    %13 = vector.extract_strided_slice %10 {offsets = [0, 128], sizes = [48, 8], strides = [1, 1]} : vector<48x192xf32> to vector<48x8xf32>
    %cst_12 = arith.constant dense<0.000000e+00> : vector<48x48xf32>
    %14 = tpu.matmul %11, %12, %cst_12 {dimension_numbers = #tpu.dot_dimension_numbers<[1], [1], [0], [0], [0, 0, 1, 0], [], []>} : vector<48x8xf32>, vector<48x8xf32>, vector<48x48xf32> -> vector<48x48xf32>
    %15 = arith.addf %14, %7 : vector<48x48xf32>
    %cst_13 = arith.constant dense<0xFF800000> : vector<48xf32>
    %16 = vector.multi_reduction <maximumf>, %15, %cst_13 [1] : vector<48x48xf32> to vector<48xf32>
    %17 = vector.shape_cast %16 : vector<48xf32> to vector<48x1xf32>
    %18 = vector.broadcast %17 : vector<48x1xf32> to vector<48x48xf32>
    %19 = arith.subf %15, %18 : vector<48x48xf32>
    %20 = math.exp %19 : vector<48x48xf32>
    %cst_14 = arith.constant dense<0.000000e+00> : vector<48xf32>
    %21 = vector.multi_reduction <add>, %20, %cst_14 [1] : vector<48x48xf32> to vector<48xf32>
    %22 = vector.shape_cast %21 : vector<48xf32> to vector<48x1xf32>
    %23 = tpu.reciprocal %22 {approx = true} : vector<48x1xf32> -> vector<48x1xf32>
    %24 = vector.broadcast %23 : vector<48x1xf32> to vector<48x48xf32>
    %25 = arith.mulf %20, %24 : vector<48x48xf32>
    %cst_15 = arith.constant dense<0.000000e+00> : vector<48x8xf32>
    %26 = tpu.matmul %25, %13, %cst_15 {dimension_numbers = #tpu.dot_dimension_numbers<[1], [0], [0], [1], [0, 0, 1, 1], [], []>} : vector<48x48xf32>, vector<48x8xf32>, vector<48x8xf32> -> vector<48x8xf32>
    %27 = vector.extract_strided_slice %10 {offsets = [0, 8], sizes = [48, 8], strides = [1, 1]} : vector<48x192xf32> to vector<48x8xf32>
    %28 = vector.extract_strided_slice %10 {offsets = [0, 72], sizes = [48, 8], strides = [1, 1]} : vector<48x192xf32> to vector<48x8xf32>
    %29 = vector.extract_strided_slice %10 {offsets = [0, 136], sizes = [48, 8], strides = [1, 1]} : vector<48x192xf32> to vector<48x8xf32>
    %cst_16 = arith.constant dense<0.000000e+00> : vector<48x48xf32>
    %30 = tpu.matmul %27, %28, %cst_16 {dimension_numbers = #tpu.dot_dimension_numbers<[1], [1], [0], [0], [0, 0, 1, 0], [], []>} : vector<48x8xf32>, vector<48x8xf32>, vector<48x48xf32> -> vector<48x48xf32>
    %31 = arith.addf %30, %7 : vector<48x48xf32>
    %cst_17 = arith.constant dense<0xFF800000> : vector<48xf32>
    %32 = vector.multi_reduction <maximumf>, %31, %cst_17 [1] : vector<48x48xf32> to vector<48xf32>
    %33 = vector.shape_cast %32 : vector<48xf32> to vector<48x1xf32>
    %34 = vector.broadcast %33 : vector<48x1xf32> to vector<48x48xf32>
    %35 = arith.subf %31, %34 : vector<48x48xf32>
    %36 = math.exp %35 : vector<48x48xf32>
    %cst_18 = arith.constant dense<0.000000e+00> : vector<48xf32>
    %37 = vector.multi_reduction <add>, %36, %cst_18 [1] : vector<48x48xf32> to vector<48xf32>
    %38 = vector.shape_cast %37 : vector<48xf32> to vector<48x1xf32>
    %39 = tpu.reciprocal %38 {approx = true} : vector<48x1xf32> -> vector<48x1xf32>
    %40 = vector.broadcast %39 : vector<48x1xf32> to vector<48x48xf32>
    %41 = arith.mulf %36, %40 : vector<48x48xf32>
    %cst_19 = arith.constant dense<0.000000e+00> : vector<48x8xf32>
    %42 = tpu.matmul %41, %29, %cst_19 {dimension_numbers = #tpu.dot_dimension_numbers<[1], [0], [0], [1], [0, 0, 1, 1], [], []>} : vector<48x48xf32>, vector<48x8xf32>, vector<48x8xf32> -> vector<48x8xf32>
    %43 = vector.extract_strided_slice %10 {offsets = [0, 16], sizes = [48, 8], strides = [1, 1]} : vector<48x192xf32> to vector<48x8xf32>
    %44 = vector.extract_strided_slice %10 {offsets = [0, 80], sizes = [48, 8], strides = [1, 1]} : vector<48x192xf32> to vector<48x8xf32>
    %45 = vector.extract_strided_slice %10 {offsets = [0, 144], sizes = [48, 8], strides = [1, 1]} : vector<48x192xf32> to vector<48x8xf32>
    %cst_20 = arith.constant dense<0.000000e+00> : vector<48x48xf32>
    %46 = tpu.matmul %43, %44, %cst_20 {dimension_numbers = #tpu.dot_dimension_numbers<[1], [1], [0], [0], [0, 0, 1, 0], [], []>} : vector<48x8xf32>, vector<48x8xf32>, vector<48x48xf32> -> vector<48x48xf32>
    %47 = arith.addf %46, %7 : vector<48x48xf32>
    %cst_21 = arith.constant dense<0xFF800000> : vector<48xf32>
    %48 = vector.multi_reduction <maximumf>, %47, %cst_21 [1] : vector<48x48xf32> to vector<48xf32>
    %49 = vector.shape_cast %48 : vector<48xf32> to vector<48x1xf32>
    %50 = vector.broadcast %49 : vector<48x1xf32> to vector<48x48xf32>
    %51 = arith.subf %47, %50 : vector<48x48xf32>
    %52 = math.exp %51 : vector<48x48xf32>
    %cst_22 = arith.constant dense<0.000000e+00> : vector<48xf32>
    %53 = vector.multi_reduction <add>, %52, %cst_22 [1] : vector<48x48xf32> to vector<48xf32>
    %54 = vector.shape_cast %53 : vector<48xf32> to vector<48x1xf32>
    %55 = tpu.reciprocal %54 {approx = true} : vector<48x1xf32> -> vector<48x1xf32>
    %56 = vector.broadcast %55 : vector<48x1xf32> to vector<48x48xf32>
    %57 = arith.mulf %52, %56 : vector<48x48xf32>
    %cst_23 = arith.constant dense<0.000000e+00> : vector<48x8xf32>
    %58 = tpu.matmul %57, %45, %cst_23 {dimension_numbers = #tpu.dot_dimension_numbers<[1], [0], [0], [1], [0, 0, 1, 1], [], []>} : vector<48x48xf32>, vector<48x8xf32>, vector<48x8xf32> -> vector<48x8xf32>
    %59 = vector.extract_strided_slice %10 {offsets = [0, 24], sizes = [48, 8], strides = [1, 1]} : vector<48x192xf32> to vector<48x8xf32>
    %60 = vector.extract_strided_slice %10 {offsets = [0, 88], sizes = [48, 8], strides = [1, 1]} : vector<48x192xf32> to vector<48x8xf32>
    %61 = vector.extract_strided_slice %10 {offsets = [0, 152], sizes = [48, 8], strides = [1, 1]} : vector<48x192xf32> to vector<48x8xf32>
    %cst_24 = arith.constant dense<0.000000e+00> : vector<48x48xf32>
    %62 = tpu.matmul %59, %60, %cst_24 {dimension_numbers = #tpu.dot_dimension_numbers<[1], [1], [0], [0], [0, 0, 1, 0], [], []>} : vector<48x8xf32>, vector<48x8xf32>, vector<48x48xf32> -> vector<48x48xf32>
    %63 = arith.addf %62, %7 : vector<48x48xf32>
    %cst_25 = arith.constant dense<0xFF800000> : vector<48xf32>
    %64 = vector.multi_reduction <maximumf>, %63, %cst_25 [1] : vector<48x48xf32> to vector<48xf32>
    %65 = vector.shape_cast %64 : vector<48xf32> to vector<48x1xf32>
    %66 = vector.broadcast %65 : vector<48x1xf32> to vector<48x48xf32>
    %67 = arith.subf %63, %66 : vector<48x48xf32>
    %68 = math.exp %67 : vector<48x48xf32>
    %cst_26 = arith.constant dense<0.000000e+00> : vector<48xf32>
    %69 = vector.multi_reduction <add>, %68, %cst_26 [1] : vector<48x48xf32> to vector<48xf32>
    %70 = vector.shape_cast %69 : vector<48xf32> to vector<48x1xf32>
    %71 = tpu.reciprocal %70 {approx = true} : vector<48x1xf32> -> vector<48x1xf32>
    %72 = vector.broadcast %71 : vector<48x1xf32> to vector<48x48xf32>
    %73 = arith.mulf %68, %72 : vector<48x48xf32>
    %cst_27 = arith.constant dense<0.000000e+00> : vector<48x8xf32>
    %74 = tpu.matmul %73, %61, %cst_27 {dimension_numbers = #tpu.dot_dimension_numbers<[1], [0], [0], [1], [0, 0, 1, 1], [], []>} : vector<48x48xf32>, vector<48x8xf32>, vector<48x8xf32> -> vector<48x8xf32>
    %75 = vector.extract_strided_slice %10 {offsets = [0, 32], sizes = [48, 8], strides = [1, 1]} : vector<48x192xf32> to vector<48x8xf32>
    %76 = vector.extract_strided_slice %10 {offsets = [0, 96], sizes = [48, 8], strides = [1, 1]} : vector<48x192xf32> to vector<48x8xf32>
    %77 = vector.extract_strided_slice %10 {offsets = [0, 160], sizes = [48, 8], strides = [1, 1]} : vector<48x192xf32> to vector<48x8xf32>
    %cst_28 = arith.constant dense<0.000000e+00> : vector<48x48xf32>
    %78 = tpu.matmul %75, %76, %cst_28 {dimension_numbers = #tpu.dot_dimension_numbers<[1], [1], [0], [0], [0, 0, 1, 0], [], []>} : vector<48x8xf32>, vector<48x8xf32>, vector<48x48xf32> -> vector<48x48xf32>
    %79 = arith.addf %78, %7 : vector<48x48xf32>
    %cst_29 = arith.constant dense<0xFF800000> : vector<48xf32>
    %80 = vector.multi_reduction <maximumf>, %79, %cst_29 [1] : vector<48x48xf32> to vector<48xf32>
    %81 = vector.shape_cast %80 : vector<48xf32> to vector<48x1xf32>
    %82 = vector.broadcast %81 : vector<48x1xf32> to vector<48x48xf32>
    %83 = arith.subf %79, %82 : vector<48x48xf32>
    %84 = math.exp %83 : vector<48x48xf32>
    %cst_30 = arith.constant dense<0.000000e+00> : vector<48xf32>
    %85 = vector.multi_reduction <add>, %84, %cst_30 [1] : vector<48x48xf32> to vector<48xf32>
    %86 = vector.shape_cast %85 : vector<48xf32> to vector<48x1xf32>
    %87 = tpu.reciprocal %86 {approx = true} : vector<48x1xf32> -> vector<48x1xf32>
    %88 = vector.broadcast %87 : vector<48x1xf32> to vector<48x48xf32>
    %89 = arith.mulf %84, %88 : vector<48x48xf32>
    %cst_31 = arith.constant dense<0.000000e+00> : vector<48x8xf32>
    %90 = tpu.matmul %89, %77, %cst_31 {dimension_numbers = #tpu.dot_dimension_numbers<[1], [0], [0], [1], [0, 0, 1, 1], [], []>} : vector<48x48xf32>, vector<48x8xf32>, vector<48x8xf32> -> vector<48x8xf32>
    %91 = vector.extract_strided_slice %10 {offsets = [0, 40], sizes = [48, 8], strides = [1, 1]} : vector<48x192xf32> to vector<48x8xf32>
    %92 = vector.extract_strided_slice %10 {offsets = [0, 104], sizes = [48, 8], strides = [1, 1]} : vector<48x192xf32> to vector<48x8xf32>
    %93 = vector.extract_strided_slice %10 {offsets = [0, 168], sizes = [48, 8], strides = [1, 1]} : vector<48x192xf32> to vector<48x8xf32>
    %cst_32 = arith.constant dense<0.000000e+00> : vector<48x48xf32>
    %94 = tpu.matmul %91, %92, %cst_32 {dimension_numbers = #tpu.dot_dimension_numbers<[1], [1], [0], [0], [0, 0, 1, 0], [], []>} : vector<48x8xf32>, vector<48x8xf32>, vector<48x48xf32> -> vector<48x48xf32>
    %95 = arith.addf %94, %7 : vector<48x48xf32>
    %cst_33 = arith.constant dense<0xFF800000> : vector<48xf32>
    %96 = vector.multi_reduction <maximumf>, %95, %cst_33 [1] : vector<48x48xf32> to vector<48xf32>
    %97 = vector.shape_cast %96 : vector<48xf32> to vector<48x1xf32>
    %98 = vector.broadcast %97 : vector<48x1xf32> to vector<48x48xf32>
    %99 = arith.subf %95, %98 : vector<48x48xf32>
    %100 = math.exp %99 : vector<48x48xf32>
    %cst_34 = arith.constant dense<0.000000e+00> : vector<48xf32>
    %101 = vector.multi_reduction <add>, %100, %cst_34 [1] : vector<48x48xf32> to vector<48xf32>
    %102 = vector.shape_cast %101 : vector<48xf32> to vector<48x1xf32>
    %103 = tpu.reciprocal %102 {approx = true} : vector<48x1xf32> -> vector<48x1xf32>
    %104 = vector.broadcast %103 : vector<48x1xf32> to vector<48x48xf32>
    %105 = arith.mulf %100, %104 : vector<48x48xf32>
    %cst_35 = arith.constant dense<0.000000e+00> : vector<48x8xf32>
    %106 = tpu.matmul %105, %93, %cst_35 {dimension_numbers = #tpu.dot_dimension_numbers<[1], [0], [0], [1], [0, 0, 1, 1], [], []>} : vector<48x48xf32>, vector<48x8xf32>, vector<48x8xf32> -> vector<48x8xf32>
    %107 = vector.extract_strided_slice %10 {offsets = [0, 48], sizes = [48, 8], strides = [1, 1]} : vector<48x192xf32> to vector<48x8xf32>
    %108 = vector.extract_strided_slice %10 {offsets = [0, 112], sizes = [48, 8], strides = [1, 1]} : vector<48x192xf32> to vector<48x8xf32>
    %109 = vector.extract_strided_slice %10 {offsets = [0, 176], sizes = [48, 8], strides = [1, 1]} : vector<48x192xf32> to vector<48x8xf32>
    %cst_36 = arith.constant dense<0.000000e+00> : vector<48x48xf32>
    %110 = tpu.matmul %107, %108, %cst_36 {dimension_numbers = #tpu.dot_dimension_numbers<[1], [1], [0], [0], [0, 0, 1, 0], [], []>} : vector<48x8xf32>, vector<48x8xf32>, vector<48x48xf32> -> vector<48x48xf32>
    %111 = arith.addf %110, %7 : vector<48x48xf32>
    %cst_37 = arith.constant dense<0xFF800000> : vector<48xf32>
    %112 = vector.multi_reduction <maximumf>, %111, %cst_37 [1] : vector<48x48xf32> to vector<48xf32>
    %113 = vector.shape_cast %112 : vector<48xf32> to vector<48x1xf32>
    %114 = vector.broadcast %113 : vector<48x1xf32> to vector<48x48xf32>
    %115 = arith.subf %111, %114 : vector<48x48xf32>
    %116 = math.exp %115 : vector<48x48xf32>
    %cst_38 = arith.constant dense<0.000000e+00> : vector<48xf32>
    %117 = vector.multi_reduction <add>, %116, %cst_38 [1] : vector<48x48xf32> to vector<48xf32>
    %118 = vector.shape_cast %117 : vector<48xf32> to vector<48x1xf32>
    %119 = tpu.reciprocal %118 {approx = true} : vector<48x1xf32> -> vector<48x1xf32>
    %120 = vector.broadcast %119 : vector<48x1xf32> to vector<48x48xf32>
    %121 = arith.mulf %116, %120 : vector<48x48xf32>
    %cst_39 = arith.constant dense<0.000000e+00> : vector<48x8xf32>
    %122 = tpu.matmul %121, %109, %cst_39 {dimension_numbers = #tpu.dot_dimension_numbers<[1], [0], [0], [1], [0, 0, 1, 1], [], []>} : vector<48x48xf32>, vector<48x8xf32>, vector<48x8xf32> -> vector<48x8xf32>
    %123 = vector.extract_strided_slice %10 {offsets = [0, 56], sizes = [48, 8], strides = [1, 1]} : vector<48x192xf32> to vector<48x8xf32>
    %124 = vector.extract_strided_slice %10 {offsets = [0, 120], sizes = [48, 8], strides = [1, 1]} : vector<48x192xf32> to vector<48x8xf32>
    %125 = vector.extract_strided_slice %10 {offsets = [0, 184], sizes = [48, 8], strides = [1, 1]} : vector<48x192xf32> to vector<48x8xf32>
    %cst_40 = arith.constant dense<0.000000e+00> : vector<48x48xf32>
    %126 = tpu.matmul %123, %124, %cst_40 {dimension_numbers = #tpu.dot_dimension_numbers<[1], [1], [0], [0], [0, 0, 1, 0], [], []>} : vector<48x8xf32>, vector<48x8xf32>, vector<48x48xf32> -> vector<48x48xf32>
    %127 = arith.addf %126, %7 : vector<48x48xf32>
    %cst_41 = arith.constant dense<0xFF800000> : vector<48xf32>
    %128 = vector.multi_reduction <maximumf>, %127, %cst_41 [1] : vector<48x48xf32> to vector<48xf32>
    %129 = vector.shape_cast %128 : vector<48xf32> to vector<48x1xf32>
    %130 = vector.broadcast %129 : vector<48x1xf32> to vector<48x48xf32>
    %131 = arith.subf %127, %130 : vector<48x48xf32>
    %132 = math.exp %131 : vector<48x48xf32>
    %cst_42 = arith.constant dense<0.000000e+00> : vector<48xf32>
    %133 = vector.multi_reduction <add>, %132, %cst_42 [1] : vector<48x48xf32> to vector<48xf32>
    %134 = vector.shape_cast %133 : vector<48xf32> to vector<48x1xf32>
    %135 = tpu.reciprocal %134 {approx = true} : vector<48x1xf32> -> vector<48x1xf32>
    %136 = vector.broadcast %135 : vector<48x1xf32> to vector<48x48xf32>
    %137 = arith.mulf %132, %136 : vector<48x48xf32>
    %cst_43 = arith.constant dense<0.000000e+00> : vector<48x8xf32>
    %138 = tpu.matmul %137, %125, %cst_43 {dimension_numbers = #tpu.dot_dimension_numbers<[1], [0], [0], [1], [0, 0, 1, 1], [], []>} : vector<48x48xf32>, vector<48x8xf32>, vector<48x8xf32> -> vector<48x8xf32>
    %139 = tpu.concatenate %26, %42, %58, %74, %90, %106, %122, %138 in 1 : vector<48x8xf32>, vector<48x8xf32>, vector<48x8xf32>, vector<48x8xf32>, vector<48x8xf32>, vector<48x8xf32>, vector<48x8xf32>, vector<48x8xf32> -> vector<48x64xf32>
    %c0_44 = arith.constant 0 : index
    %c0_45 = arith.constant 0 : index
    %140 = vector.load %arg8[%c0_44, %c0_45] : memref<2x48xf32, #tpu.memory_space<vmem>>, vector<2x48xf32>
    %cst_46 = arith.constant dense<0.000000e+00> : vector<2x64xf32>
    %141 = tpu.matmul %140, %139, %cst_46 {dimension_numbers = #tpu.dot_dimension_numbers<[1], [0], [0], [1], [0, 0, 1, 1], [], []>} : vector<2x48xf32>, vector<48x64xf32>, vector<2x64xf32> -> vector<2x64xf32>
    %c0_47 = arith.constant 0 : index
    %c0_48 = arith.constant 0 : index
    %142 = vector.load %arg5[%c0_47, %c0_48] : memref<64x64xf32, #tpu.memory_space<vmem>>, vector<64x64xf32>
    %cst_49 = arith.constant dense<0.000000e+00> : vector<2x64xf32>
    %143 = tpu.matmul %141, %142, %cst_49 {dimension_numbers = #tpu.dot_dimension_numbers<[1], [0], [0], [1], [0, 0, 1, 1], [], []>} : vector<2x64xf32>, vector<64x64xf32>, vector<2x64xf32> -> vector<2x64xf32>
    %c0_50 = arith.constant 0 : index
    %c0_51 = arith.constant 0 : index
    %144 = vector.load %arg6[%c0_50, %c0_51] : memref<1x64xf32, #tpu.memory_space<vmem>>, vector<1x64xf32>
    %145 = vector.broadcast %144 : vector<1x64xf32> to vector<2x64xf32>
    %146 = arith.addf %143, %145 : vector<2x64xf32>
    %c0_52 = arith.constant 0 : index
    %c0_53 = arith.constant 0 : index
    %147 = vector.load %arg9[%c0_52, %c0_53] : memref<64x64xf32, #tpu.memory_space<vmem>>, vector<64x64xf32>
    %cst_54 = arith.constant dense<0.000000e+00> : vector<2x64xf32>
    %148 = tpu.matmul %146, %147, %cst_54 {dimension_numbers = #tpu.dot_dimension_numbers<[1], [0], [0], [1], [0, 0, 1, 1], [], []>} : vector<2x64xf32>, vector<64x64xf32>, vector<2x64xf32> -> vector<2x64xf32>
    %c0_55 = arith.constant 0 : index
    %c0_56 = arith.constant 0 : index
    %149 = vector.load %arg10[%c0_55, %c0_56] : memref<1x64xf32, #tpu.memory_space<vmem>>, vector<1x64xf32>
    %150 = vector.broadcast %149 : vector<1x64xf32> to vector<2x64xf32>
    %151 = arith.addf %148, %150 : vector<2x64xf32>
    %cst_57 = arith.constant 0.000000e+00 : f32
    %152 = vector.broadcast %cst_57 : f32 to vector<2x64xf32>
    %153 = arith.maximumf %151, %152 : vector<2x64xf32>
    %c0_58 = arith.constant 0 : index
    %c0_59 = arith.constant 0 : index
    %154 = vector.load %arg11[%c0_58, %c0_59] : memref<64x64xf32, #tpu.memory_space<vmem>>, vector<64x64xf32>
    %cst_60 = arith.constant dense<0.000000e+00> : vector<2x64xf32>
    %155 = tpu.matmul %153, %154, %cst_60 {dimension_numbers = #tpu.dot_dimension_numbers<[1], [0], [0], [1], [0, 0, 1, 1], [], []>} : vector<2x64xf32>, vector<64x64xf32>, vector<2x64xf32> -> vector<2x64xf32>
    %c0_61 = arith.constant 0 : index
    %c0_62 = arith.constant 0 : index
    %156 = vector.load %arg12[%c0_61, %c0_62] : memref<1x64xf32, #tpu.memory_space<vmem>>, vector<1x64xf32>
    %157 = vector.broadcast %156 : vector<1x64xf32> to vector<2x64xf32>
    %158 = arith.addf %155, %157 : vector<2x64xf32>
    %159 = arith.mulf %158, %158 : vector<2x64xf32>
    %cst_63 = arith.constant dense<0.000000e+00> : vector<2xf32>
    %160 = vector.multi_reduction <add>, %159, %cst_63 [1] : vector<2x64xf32> to vector<2xf32>
    %161 = vector.shape_cast %160 : vector<2xf32> to vector<2x1xf32>
    %cst_64 = arith.constant 1.000000e-24 : f32
    %162 = vector.broadcast %cst_64 : f32 to vector<2x1xf32>
    %163 = arith.maximumf %161, %162 : vector<2x1xf32>
    %164 = math.rsqrt %163 : vector<2x1xf32>
    %165 = vector.broadcast %164 : vector<2x1xf32> to vector<2x64xf32>
    %166 = arith.mulf %158, %165 : vector<2x64xf32>
    %c0_65 = arith.constant 0 : index
    %c0_66 = arith.constant 0 : index
    %167 = vector.load %arg13[%c0_65, %c0_66] : memref<16x32xf32, #tpu.memory_space<vmem>>, vector<16x32xf32>
    %c0_67 = arith.constant 0 : index
    %c0_68 = arith.constant 0 : index
    %168 = vector.load %arg14[%c0_67, %c0_68] : memref<32x32xf32, #tpu.memory_space<vmem>>, vector<32x32xf32>
    %cst_69 = arith.constant dense<0.000000e+00> : vector<16x32xf32>
    %169 = tpu.matmul %167, %168, %cst_69 {dimension_numbers = #tpu.dot_dimension_numbers<[1], [0], [0], [1], [0, 0, 1, 1], [], []>} : vector<16x32xf32>, vector<32x32xf32>, vector<16x32xf32> -> vector<16x32xf32>
    %c0_70 = arith.constant 0 : index
    %c0_71 = arith.constant 0 : index
    %170 = vector.load %arg15[%c0_70, %c0_71] : memref<1x32xf32, #tpu.memory_space<vmem>>, vector<1x32xf32>
    %171 = vector.broadcast %170 : vector<1x32xf32> to vector<16x32xf32>
    %172 = arith.addf %169, %171 : vector<16x32xf32>
    %cst_72 = arith.constant 0.000000e+00 : f32
    %173 = vector.broadcast %cst_72 : f32 to vector<16x32xf32>
    %174 = arith.maximumf %172, %173 : vector<16x32xf32>
    %c0_73 = arith.constant 0 : index
    %c0_74 = arith.constant 0 : index
    %175 = vector.load %arg16[%c0_73, %c0_74] : memref<32x64xf32, #tpu.memory_space<vmem>>, vector<32x64xf32>
    %cst_75 = arith.constant dense<0.000000e+00> : vector<16x64xf32>
    %176 = tpu.matmul %174, %175, %cst_75 {dimension_numbers = #tpu.dot_dimension_numbers<[1], [0], [0], [1], [0, 0, 1, 1], [], []>} : vector<16x32xf32>, vector<32x64xf32>, vector<16x64xf32> -> vector<16x64xf32>
    %c0_76 = arith.constant 0 : index
    %c0_77 = arith.constant 0 : index
    %177 = vector.load %arg17[%c0_76, %c0_77] : memref<1x64xf32, #tpu.memory_space<vmem>>, vector<1x64xf32>
    %178 = vector.broadcast %177 : vector<1x64xf32> to vector<16x64xf32>
    %179 = arith.addf %176, %178 : vector<16x64xf32>
    %180 = arith.mulf %179, %179 : vector<16x64xf32>
    %cst_78 = arith.constant dense<0.000000e+00> : vector<16xf32>
    %181 = vector.multi_reduction <add>, %180, %cst_78 [1] : vector<16x64xf32> to vector<16xf32>
    %182 = vector.shape_cast %181 : vector<16xf32> to vector<16x1xf32>
    %cst_79 = arith.constant 1.000000e-24 : f32
    %183 = vector.broadcast %cst_79 : f32 to vector<16x1xf32>
    %184 = arith.maximumf %182, %183 : vector<16x1xf32>
    %185 = math.rsqrt %184 : vector<16x1xf32>
    %186 = vector.broadcast %185 : vector<16x1xf32> to vector<16x64xf32>
    %187 = arith.mulf %179, %186 : vector<16x64xf32>
    %c0_80 = arith.constant 0 : index
    %c0_81 = arith.constant 0 : index
    %188 = vector.load %arg18[%c0_80, %c0_81] : memref<16x2xf32, #tpu.memory_space<vmem>>, vector<16x2xf32>
    %cst_82 = arith.constant dense<0.000000e+00> : vector<16x64xf32>
    %189 = tpu.matmul %188, %166, %cst_82 {dimension_numbers = #tpu.dot_dimension_numbers<[1], [0], [0], [1], [0, 0, 1, 1], [], []>} : vector<16x2xf32>, vector<2x64xf32>, vector<16x64xf32> -> vector<16x64xf32>
    %190 = arith.addf %187, %189 : vector<16x64xf32>
    %c0_83 = arith.constant 0 : index
    %c0_84 = arith.constant 0 : index
    %191 = vector.load %arg19[%c0_83, %c0_84] : memref<16x16xf32, #tpu.memory_space<vmem>>, vector<16x16xf32>
    %c0_85 = arith.constant 0 : index
    %c0_86 = arith.constant 0 : index
    %c0_87 = arith.constant 0 : index
    %192 = vector.load %arg20[%c0_85, %c0_86, %c0_87] : memref<2x64x192xf32, #tpu.memory_space<vmem>>, vector<1x64x192xf32>
    %193 = vector.shape_cast %192 : vector<1x64x192xf32> to vector<64x192xf32>
    %c0_88 = arith.constant 0 : index
    %c0_89 = arith.constant 0 : index
    %c0_90 = arith.constant 0 : index
    %194 = vector.load %arg21[%c0_88, %c0_89, %c0_90] : memref<2x1x192xf32, #tpu.memory_space<vmem>>, vector<1x1x192xf32>
    %195 = vector.shape_cast %194 : vector<1x1x192xf32> to vector<1x192xf32>
    %cst_91 = arith.constant dense<0.000000e+00> : vector<16x192xf32>
    %196 = tpu.matmul %190, %193, %cst_91 {dimension_numbers = #tpu.dot_dimension_numbers<[1], [0], [0], [1], [0, 0, 1, 1], [], []>} : vector<16x64xf32>, vector<64x192xf32>, vector<16x192xf32> -> vector<16x192xf32>
    %197 = vector.broadcast %195 : vector<1x192xf32> to vector<16x192xf32>
    %198 = arith.addf %196, %197 : vector<16x192xf32>
    %199 = vector.extract_strided_slice %198 {offsets = [0, 0], sizes = [16, 16], strides = [1, 1]} : vector<16x192xf32> to vector<16x16xf32>
    %200 = vector.extract_strided_slice %198 {offsets = [0, 64], sizes = [16, 16], strides = [1, 1]} : vector<16x192xf32> to vector<16x16xf32>
    %201 = vector.extract_strided_slice %198 {offsets = [0, 128], sizes = [16, 16], strides = [1, 1]} : vector<16x192xf32> to vector<16x16xf32>
    %cst_92 = arith.constant dense<0.000000e+00> : vector<16x16xf32>
    %202 = tpu.matmul %199, %200, %cst_92 {dimension_numbers = #tpu.dot_dimension_numbers<[1], [1], [0], [0], [0, 0, 1, 0], [], []>} : vector<16x16xf32>, vector<16x16xf32>, vector<16x16xf32> -> vector<16x16xf32>
    %203 = arith.addf %202, %191 : vector<16x16xf32>
    %cst_93 = arith.constant dense<0xFF800000> : vector<16xf32>
    %204 = vector.multi_reduction <maximumf>, %203, %cst_93 [1] : vector<16x16xf32> to vector<16xf32>
    %205 = vector.shape_cast %204 : vector<16xf32> to vector<16x1xf32>
    %206 = vector.broadcast %205 : vector<16x1xf32> to vector<16x16xf32>
    %207 = arith.subf %203, %206 : vector<16x16xf32>
    %208 = math.exp %207 : vector<16x16xf32>
    %cst_94 = arith.constant dense<0.000000e+00> : vector<16xf32>
    %209 = vector.multi_reduction <add>, %208, %cst_94 [1] : vector<16x16xf32> to vector<16xf32>
    %210 = vector.shape_cast %209 : vector<16xf32> to vector<16x1xf32>
    %211 = tpu.reciprocal %210 {approx = true} : vector<16x1xf32> -> vector<16x1xf32>
    %212 = vector.broadcast %211 : vector<16x1xf32> to vector<16x16xf32>
    %213 = arith.mulf %208, %212 : vector<16x16xf32>
    %cst_95 = arith.constant dense<0.000000e+00> : vector<16x16xf32>
    %214 = tpu.matmul %213, %201, %cst_95 {dimension_numbers = #tpu.dot_dimension_numbers<[1], [0], [0], [1], [0, 0, 1, 1], [], []>} : vector<16x16xf32>, vector<16x16xf32>, vector<16x16xf32> -> vector<16x16xf32>
    %215 = vector.extract_strided_slice %198 {offsets = [0, 16], sizes = [16, 16], strides = [1, 1]} : vector<16x192xf32> to vector<16x16xf32>
    %216 = vector.extract_strided_slice %198 {offsets = [0, 80], sizes = [16, 16], strides = [1, 1]} : vector<16x192xf32> to vector<16x16xf32>
    %217 = vector.extract_strided_slice %198 {offsets = [0, 144], sizes = [16, 16], strides = [1, 1]} : vector<16x192xf32> to vector<16x16xf32>
    %cst_96 = arith.constant dense<0.000000e+00> : vector<16x16xf32>
    %218 = tpu.matmul %215, %216, %cst_96 {dimension_numbers = #tpu.dot_dimension_numbers<[1], [1], [0], [0], [0, 0, 1, 0], [], []>} : vector<16x16xf32>, vector<16x16xf32>, vector<16x16xf32> -> vector<16x16xf32>
    %219 = arith.addf %218, %191 : vector<16x16xf32>
    %cst_97 = arith.constant dense<0xFF800000> : vector<16xf32>
    %220 = vector.multi_reduction <maximumf>, %219, %cst_97 [1] : vector<16x16xf32> to vector<16xf32>
    %221 = vector.shape_cast %220 : vector<16xf32> to vector<16x1xf32>
    %222 = vector.broadcast %221 : vector<16x1xf32> to vector<16x16xf32>
    %223 = arith.subf %219, %222 : vector<16x16xf32>
    %224 = math.exp %223 : vector<16x16xf32>
    %cst_98 = arith.constant dense<0.000000e+00> : vector<16xf32>
    %225 = vector.multi_reduction <add>, %224, %cst_98 [1] : vector<16x16xf32> to vector<16xf32>
    %226 = vector.shape_cast %225 : vector<16xf32> to vector<16x1xf32>
    %227 = tpu.reciprocal %226 {approx = true} : vector<16x1xf32> -> vector<16x1xf32>
    %228 = vector.broadcast %227 : vector<16x1xf32> to vector<16x16xf32>
    %229 = arith.mulf %224, %228 : vector<16x16xf32>
    %cst_99 = arith.constant dense<0.000000e+00> : vector<16x16xf32>
    %230 = tpu.matmul %229, %217, %cst_99 {dimension_numbers = #tpu.dot_dimension_numbers<[1], [0], [0], [1], [0, 0, 1, 1], [], []>} : vector<16x16xf32>, vector<16x16xf32>, vector<16x16xf32> -> vector<16x16xf32>
    %231 = vector.extract_strided_slice %198 {offsets = [0, 32], sizes = [16, 16], strides = [1, 1]} : vector<16x192xf32> to vector<16x16xf32>
    %232 = vector.extract_strided_slice %198 {offsets = [0, 96], sizes = [16, 16], strides = [1, 1]} : vector<16x192xf32> to vector<16x16xf32>
    %233 = vector.extract_strided_slice %198 {offsets = [0, 160], sizes = [16, 16], strides = [1, 1]} : vector<16x192xf32> to vector<16x16xf32>
    %cst_100 = arith.constant dense<0.000000e+00> : vector<16x16xf32>
    %234 = tpu.matmul %231, %232, %cst_100 {dimension_numbers = #tpu.dot_dimension_numbers<[1], [1], [0], [0], [0, 0, 1, 0], [], []>} : vector<16x16xf32>, vector<16x16xf32>, vector<16x16xf32> -> vector<16x16xf32>
    %235 = arith.addf %234, %191 : vector<16x16xf32>
    %cst_101 = arith.constant dense<0xFF800000> : vector<16xf32>
    %236 = vector.multi_reduction <maximumf>, %235, %cst_101 [1] : vector<16x16xf32> to vector<16xf32>
    %237 = vector.shape_cast %236 : vector<16xf32> to vector<16x1xf32>
    %238 = vector.broadcast %237 : vector<16x1xf32> to vector<16x16xf32>
    %239 = arith.subf %235, %238 : vector<16x16xf32>
    %240 = math.exp %239 : vector<16x16xf32>
    %cst_102 = arith.constant dense<0.000000e+00> : vector<16xf32>
    %241 = vector.multi_reduction <add>, %240, %cst_102 [1] : vector<16x16xf32> to vector<16xf32>
    %242 = vector.shape_cast %241 : vector<16xf32> to vector<16x1xf32>
    %243 = tpu.reciprocal %242 {approx = true} : vector<16x1xf32> -> vector<16x1xf32>
    %244 = vector.broadcast %243 : vector<16x1xf32> to vector<16x16xf32>
    %245 = arith.mulf %240, %244 : vector<16x16xf32>
    %cst_103 = arith.constant dense<0.000000e+00> : vector<16x16xf32>
    %246 = tpu.matmul %245, %233, %cst_103 {dimension_numbers = #tpu.dot_dimension_numbers<[1], [0], [0], [1], [0, 0, 1, 1], [], []>} : vector<16x16xf32>, vector<16x16xf32>, vector<16x16xf32> -> vector<16x16xf32>
    %247 = vector.extract_strided_slice %198 {offsets = [0, 48], sizes = [16, 16], strides = [1, 1]} : vector<16x192xf32> to vector<16x16xf32>
    %248 = vector.extract_strided_slice %198 {offsets = [0, 112], sizes = [16, 16], strides = [1, 1]} : vector<16x192xf32> to vector<16x16xf32>
    %249 = vector.extract_strided_slice %198 {offsets = [0, 176], sizes = [16, 16], strides = [1, 1]} : vector<16x192xf32> to vector<16x16xf32>
    %cst_104 = arith.constant dense<0.000000e+00> : vector<16x16xf32>
    %250 = tpu.matmul %247, %248, %cst_104 {dimension_numbers = #tpu.dot_dimension_numbers<[1], [1], [0], [0], [0, 0, 1, 0], [], []>} : vector<16x16xf32>, vector<16x16xf32>, vector<16x16xf32> -> vector<16x16xf32>
    %251 = arith.addf %250, %191 : vector<16x16xf32>
    %cst_105 = arith.constant dense<0xFF800000> : vector<16xf32>
    %252 = vector.multi_reduction <maximumf>, %251, %cst_105 [1] : vector<16x16xf32> to vector<16xf32>
    %253 = vector.shape_cast %252 : vector<16xf32> to vector<16x1xf32>
    %254 = vector.broadcast %253 : vector<16x1xf32> to vector<16x16xf32>
    %255 = arith.subf %251, %254 : vector<16x16xf32>
    %256 = math.exp %255 : vector<16x16xf32>
    %cst_106 = arith.constant dense<0.000000e+00> : vector<16xf32>
    %257 = vector.multi_reduction <add>, %256, %cst_106 [1] : vector<16x16xf32> to vector<16xf32>
    %258 = vector.shape_cast %257 : vector<16xf32> to vector<16x1xf32>
    %259 = tpu.reciprocal %258 {approx = true} : vector<16x1xf32> -> vector<16x1xf32>
    %260 = vector.broadcast %259 : vector<16x1xf32> to vector<16x16xf32>
    %261 = arith.mulf %256, %260 : vector<16x16xf32>
    %cst_107 = arith.constant dense<0.000000e+00> : vector<16x16xf32>
    %262 = tpu.matmul %261, %249, %cst_107 {dimension_numbers = #tpu.dot_dimension_numbers<[1], [0], [0], [1], [0, 0, 1, 1], [], []>} : vector<16x16xf32>, vector<16x16xf32>, vector<16x16xf32> -> vector<16x16xf32>
    %263 = tpu.concatenate %214, %230, %246, %262 in 1 : vector<16x16xf32>, vector<16x16xf32>, vector<16x16xf32>, vector<16x16xf32> -> vector<16x64xf32>
    %c0_108 = arith.constant 0 : index
    %c0_109 = arith.constant 0 : index
    %c0_110 = arith.constant 0 : index
    %264 = vector.load %arg22[%c0_108, %c0_109, %c0_110] : memref<2x64x64xf32, #tpu.memory_space<vmem>>, vector<1x64x64xf32>
    %265 = vector.shape_cast %264 : vector<1x64x64xf32> to vector<64x64xf32>
    %cst_111 = arith.constant dense<0.000000e+00> : vector<16x64xf32>
    %266 = tpu.matmul %263, %265, %cst_111 {dimension_numbers = #tpu.dot_dimension_numbers<[1], [0], [0], [1], [0, 0, 1, 1], [], []>} : vector<16x64xf32>, vector<64x64xf32>, vector<16x64xf32> -> vector<16x64xf32>
    %c0_112 = arith.constant 0 : index
    %c0_113 = arith.constant 0 : index
    %c0_114 = arith.constant 0 : index
    %267 = vector.load %arg23[%c0_112, %c0_113, %c0_114] : memref<2x1x64xf32, #tpu.memory_space<vmem>>, vector<1x1x64xf32>
    %268 = vector.shape_cast %267 : vector<1x1x64xf32> to vector<1x64xf32>
    %269 = vector.broadcast %268 : vector<1x64xf32> to vector<16x64xf32>
    %270 = arith.addf %266, %269 : vector<16x64xf32>
    %c1 = arith.constant 1 : index
    %c0_115 = arith.constant 0 : index
    %c0_116 = arith.constant 0 : index
    %271 = vector.load %arg20[%c1, %c0_115, %c0_116] : memref<2x64x192xf32, #tpu.memory_space<vmem>>, vector<1x64x192xf32>
    %272 = vector.shape_cast %271 : vector<1x64x192xf32> to vector<64x192xf32>
    %c1_117 = arith.constant 1 : index
    %c0_118 = arith.constant 0 : index
    %c0_119 = arith.constant 0 : index
    %273 = vector.load %arg21[%c1_117, %c0_118, %c0_119] : memref<2x1x192xf32, #tpu.memory_space<vmem>>, vector<1x1x192xf32>
    %274 = vector.shape_cast %273 : vector<1x1x192xf32> to vector<1x192xf32>
    %cst_120 = arith.constant dense<0.000000e+00> : vector<16x192xf32>
    %275 = tpu.matmul %270, %272, %cst_120 {dimension_numbers = #tpu.dot_dimension_numbers<[1], [0], [0], [1], [0, 0, 1, 1], [], []>} : vector<16x64xf32>, vector<64x192xf32>, vector<16x192xf32> -> vector<16x192xf32>
    %276 = vector.broadcast %274 : vector<1x192xf32> to vector<16x192xf32>
    %277 = arith.addf %275, %276 : vector<16x192xf32>
    %278 = vector.extract_strided_slice %277 {offsets = [0, 0], sizes = [16, 16], strides = [1, 1]} : vector<16x192xf32> to vector<16x16xf32>
    %279 = vector.extract_strided_slice %277 {offsets = [0, 64], sizes = [16, 16], strides = [1, 1]} : vector<16x192xf32> to vector<16x16xf32>
    %280 = vector.extract_strided_slice %277 {offsets = [0, 128], sizes = [16, 16], strides = [1, 1]} : vector<16x192xf32> to vector<16x16xf32>
    %cst_121 = arith.constant dense<0.000000e+00> : vector<16x16xf32>
    %281 = tpu.matmul %278, %279, %cst_121 {dimension_numbers = #tpu.dot_dimension_numbers<[1], [1], [0], [0], [0, 0, 1, 0], [], []>} : vector<16x16xf32>, vector<16x16xf32>, vector<16x16xf32> -> vector<16x16xf32>
    %282 = arith.addf %281, %191 : vector<16x16xf32>
    %cst_122 = arith.constant dense<0xFF800000> : vector<16xf32>
    %283 = vector.multi_reduction <maximumf>, %282, %cst_122 [1] : vector<16x16xf32> to vector<16xf32>
    %284 = vector.shape_cast %283 : vector<16xf32> to vector<16x1xf32>
    %285 = vector.broadcast %284 : vector<16x1xf32> to vector<16x16xf32>
    %286 = arith.subf %282, %285 : vector<16x16xf32>
    %287 = math.exp %286 : vector<16x16xf32>
    %cst_123 = arith.constant dense<0.000000e+00> : vector<16xf32>
    %288 = vector.multi_reduction <add>, %287, %cst_123 [1] : vector<16x16xf32> to vector<16xf32>
    %289 = vector.shape_cast %288 : vector<16xf32> to vector<16x1xf32>
    %290 = tpu.reciprocal %289 {approx = true} : vector<16x1xf32> -> vector<16x1xf32>
    %291 = vector.broadcast %290 : vector<16x1xf32> to vector<16x16xf32>
    %292 = arith.mulf %287, %291 : vector<16x16xf32>
    %cst_124 = arith.constant dense<0.000000e+00> : vector<16x16xf32>
    %293 = tpu.matmul %292, %280, %cst_124 {dimension_numbers = #tpu.dot_dimension_numbers<[1], [0], [0], [1], [0, 0, 1, 1], [], []>} : vector<16x16xf32>, vector<16x16xf32>, vector<16x16xf32> -> vector<16x16xf32>
    %294 = vector.extract_strided_slice %277 {offsets = [0, 16], sizes = [16, 16], strides = [1, 1]} : vector<16x192xf32> to vector<16x16xf32>
    %295 = vector.extract_strided_slice %277 {offsets = [0, 80], sizes = [16, 16], strides = [1, 1]} : vector<16x192xf32> to vector<16x16xf32>
    %296 = vector.extract_strided_slice %277 {offsets = [0, 144], sizes = [16, 16], strides = [1, 1]} : vector<16x192xf32> to vector<16x16xf32>
    %cst_125 = arith.constant dense<0.000000e+00> : vector<16x16xf32>
    %297 = tpu.matmul %294, %295, %cst_125 {dimension_numbers = #tpu.dot_dimension_numbers<[1], [1], [0], [0], [0, 0, 1, 0], [], []>} : vector<16x16xf32>, vector<16x16xf32>, vector<16x16xf32> -> vector<16x16xf32>
    %298 = arith.addf %297, %191 : vector<16x16xf32>
    %cst_126 = arith.constant dense<0xFF800000> : vector<16xf32>
    %299 = vector.multi_reduction <maximumf>, %298, %cst_126 [1] : vector<16x16xf32> to vector<16xf32>
    %300 = vector.shape_cast %299 : vector<16xf32> to vector<16x1xf32>
    %301 = vector.broadcast %300 : vector<16x1xf32> to vector<16x16xf32>
    %302 = arith.subf %298, %301 : vector<16x16xf32>
    %303 = math.exp %302 : vector<16x16xf32>
    %cst_127 = arith.constant dense<0.000000e+00> : vector<16xf32>
    %304 = vector.multi_reduction <add>, %303, %cst_127 [1] : vector<16x16xf32> to vector<16xf32>
    %305 = vector.shape_cast %304 : vector<16xf32> to vector<16x1xf32>
    %306 = tpu.reciprocal %305 {approx = true} : vector<16x1xf32> -> vector<16x1xf32>
    %307 = vector.broadcast %306 : vector<16x1xf32> to vector<16x16xf32>
    %308 = arith.mulf %303, %307 : vector<16x16xf32>
    %cst_128 = arith.constant dense<0.000000e+00> : vector<16x16xf32>
    %309 = tpu.matmul %308, %296, %cst_128 {dimension_numbers = #tpu.dot_dimension_numbers<[1], [0], [0], [1], [0, 0, 1, 1], [], []>} : vector<16x16xf32>, vector<16x16xf32>, vector<16x16xf32> -> vector<16x16xf32>
    %310 = vector.extract_strided_slice %277 {offsets = [0, 32], sizes = [16, 16], strides = [1, 1]} : vector<16x192xf32> to vector<16x16xf32>
    %311 = vector.extract_strided_slice %277 {offsets = [0, 96], sizes = [16, 16], strides = [1, 1]} : vector<16x192xf32> to vector<16x16xf32>
    %312 = vector.extract_strided_slice %277 {offsets = [0, 160], sizes = [16, 16], strides = [1, 1]} : vector<16x192xf32> to vector<16x16xf32>
    %cst_129 = arith.constant dense<0.000000e+00> : vector<16x16xf32>
    %313 = tpu.matmul %310, %311, %cst_129 {dimension_numbers = #tpu.dot_dimension_numbers<[1], [1], [0], [0], [0, 0, 1, 0], [], []>} : vector<16x16xf32>, vector<16x16xf32>, vector<16x16xf32> -> vector<16x16xf32>
    %314 = arith.addf %313, %191 : vector<16x16xf32>
    %cst_130 = arith.constant dense<0xFF800000> : vector<16xf32>
    %315 = vector.multi_reduction <maximumf>, %314, %cst_130 [1] : vector<16x16xf32> to vector<16xf32>
    %316 = vector.shape_cast %315 : vector<16xf32> to vector<16x1xf32>
    %317 = vector.broadcast %316 : vector<16x1xf32> to vector<16x16xf32>
    %318 = arith.subf %314, %317 : vector<16x16xf32>
    %319 = math.exp %318 : vector<16x16xf32>
    %cst_131 = arith.constant dense<0.000000e+00> : vector<16xf32>
    %320 = vector.multi_reduction <add>, %319, %cst_131 [1] : vector<16x16xf32> to vector<16xf32>
    %321 = vector.shape_cast %320 : vector<16xf32> to vector<16x1xf32>
    %322 = tpu.reciprocal %321 {approx = true} : vector<16x1xf32> -> vector<16x1xf32>
    %323 = vector.broadcast %322 : vector<16x1xf32> to vector<16x16xf32>
    %324 = arith.mulf %319, %323 : vector<16x16xf32>
    %cst_132 = arith.constant dense<0.000000e+00> : vector<16x16xf32>
    %325 = tpu.matmul %324, %312, %cst_132 {dimension_numbers = #tpu.dot_dimension_numbers<[1], [0], [0], [1], [0, 0, 1, 1], [], []>} : vector<16x16xf32>, vector<16x16xf32>, vector<16x16xf32> -> vector<16x16xf32>
    %326 = vector.extract_strided_slice %277 {offsets = [0, 48], sizes = [16, 16], strides = [1, 1]} : vector<16x192xf32> to vector<16x16xf32>
    %327 = vector.extract_strided_slice %277 {offsets = [0, 112], sizes = [16, 16], strides = [1, 1]} : vector<16x192xf32> to vector<16x16xf32>
    %328 = vector.extract_strided_slice %277 {offsets = [0, 176], sizes = [16, 16], strides = [1, 1]} : vector<16x192xf32> to vector<16x16xf32>
    %cst_133 = arith.constant dense<0.000000e+00> : vector<16x16xf32>
    %329 = tpu.matmul %326, %327, %cst_133 {dimension_numbers = #tpu.dot_dimension_numbers<[1], [1], [0], [0], [0, 0, 1, 0], [], []>} : vector<16x16xf32>, vector<16x16xf32>, vector<16x16xf32> -> vector<16x16xf32>
    %330 = arith.addf %329, %191 : vector<16x16xf32>
    %cst_134 = arith.constant dense<0xFF800000> : vector<16xf32>
    %331 = vector.multi_reduction <maximumf>, %330, %cst_134 [1] : vector<16x16xf32> to vector<16xf32>
    %332 = vector.shape_cast %331 : vector<16xf32> to vector<16x1xf32>
    %333 = vector.broadcast %332 : vector<16x1xf32> to vector<16x16xf32>
    %334 = arith.subf %330, %333 : vector<16x16xf32>
    %335 = math.exp %334 : vector<16x16xf32>
    %cst_135 = arith.constant dense<0.000000e+00> : vector<16xf32>
    %336 = vector.multi_reduction <add>, %335, %cst_135 [1] : vector<16x16xf32> to vector<16xf32>
    %337 = vector.shape_cast %336 : vector<16xf32> to vector<16x1xf32>
    %338 = tpu.reciprocal %337 {approx = true} : vector<16x1xf32> -> vector<16x1xf32>
    %339 = vector.broadcast %338 : vector<16x1xf32> to vector<16x16xf32>
    %340 = arith.mulf %335, %339 : vector<16x16xf32>
    %cst_136 = arith.constant dense<0.000000e+00> : vector<16x16xf32>
    %341 = tpu.matmul %340, %328, %cst_136 {dimension_numbers = #tpu.dot_dimension_numbers<[1], [0], [0], [1], [0, 0, 1, 1], [], []>} : vector<16x16xf32>, vector<16x16xf32>, vector<16x16xf32> -> vector<16x16xf32>
    %342 = tpu.concatenate %293, %309, %325, %341 in 1 : vector<16x16xf32>, vector<16x16xf32>, vector<16x16xf32>, vector<16x16xf32> -> vector<16x64xf32>
    %c1_137 = arith.constant 1 : index
    %c0_138 = arith.constant 0 : index
    %c0_139 = arith.constant 0 : index
    %343 = vector.load %arg22[%c1_137, %c0_138, %c0_139] : memref<2x64x64xf32, #tpu.memory_space<vmem>>, vector<1x64x64xf32>
    %344 = vector.shape_cast %343 : vector<1x64x64xf32> to vector<64x64xf32>
    %cst_140 = arith.constant dense<0.000000e+00> : vector<16x64xf32>
    %345 = tpu.matmul %342, %344, %cst_140 {dimension_numbers = #tpu.dot_dimension_numbers<[1], [0], [0], [1], [0, 0, 1, 1], [], []>} : vector<16x64xf32>, vector<64x64xf32>, vector<16x64xf32> -> vector<16x64xf32>
    %c1_141 = arith.constant 1 : index
    %c0_142 = arith.constant 0 : index
    %c0_143 = arith.constant 0 : index
    %346 = vector.load %arg23[%c1_141, %c0_142, %c0_143] : memref<2x1x64xf32, #tpu.memory_space<vmem>>, vector<1x1x64xf32>
    %347 = vector.shape_cast %346 : vector<1x1x64xf32> to vector<1x64xf32>
    %348 = vector.broadcast %347 : vector<1x64xf32> to vector<16x64xf32>
    %349 = arith.addf %345, %348 : vector<16x64xf32>
    %c0_144 = arith.constant 0 : index
    %c0_145 = arith.constant 0 : index
    %350 = vector.load %arg24[%c0_144, %c0_145] : memref<64x128xf32, #tpu.memory_space<vmem>>, vector<64x128xf32>
    %cst_146 = arith.constant dense<0.000000e+00> : vector<16x128xf32>
    %351 = tpu.matmul %349, %350, %cst_146 {dimension_numbers = #tpu.dot_dimension_numbers<[1], [0], [0], [1], [0, 0, 1, 1], [], []>} : vector<16x64xf32>, vector<64x128xf32>, vector<16x128xf32> -> vector<16x128xf32>
    %c0_147 = arith.constant 0 : index
    %c0_148 = arith.constant 0 : index
    %352 = vector.load %arg25[%c0_147, %c0_148] : memref<1x128xf32, #tpu.memory_space<vmem>>, vector<1x128xf32>
    %353 = vector.broadcast %352 : vector<1x128xf32> to vector<16x128xf32>
    %354 = arith.addf %351, %353 : vector<16x128xf32>
    %c0_149 = arith.constant 0 : index
    %c0_150 = arith.constant 0 : index
    %355 = vector.load %arg26[%c0_149, %c0_150] : memref<16x128xf32, #tpu.memory_space<vmem>>, vector<16x128xf32>
    tpu.vector_store %arg26[%c0_149, %c0_150], %354 {strides = array<i32>} : memref<16x128xf32, #tpu.memory_space<vmem>>, vector<16x128xf32>,
    return
  }
}

</mosaic_0001>

<bundles_post_ra>
// kernel: forward.1
= control target key start
LH: loop header
LB: loop body
LE: loop exit
PB: predicated region body
PF: predicated region fallthrough
CT: control target
= control target key end

     0   :  { %vm101_vm0 = vcmask 392192   ;;  %v10394_v39 = vmov 0.0   ;;  %vm249_vm1 = vcmask 523264   ;;  %v239_v58 = vlaneseq  ;;  %s8504_s29 = smov 64   ;;  %s8517_s28 = smov 8   ;;  %s10358_s2 = inlined_call_operand.vmem [shape: f32[48,64], index: 2, kind: input, shape index: {}]   ;;  %s10359_s0 = inlined_call_operand.vmem [shape: f32[48,48], index: 0, kind: input, shape index: {}]   ;;  %s10360_s3 = inlined_call_operand.vmem [shape: f32[64,192], index: 3, kind: input, shape index: {}]   ;;  %s10361_s1 = inlined_call_operand.vmem [shape: f32[48,64], index: 1, kind: input, shape index: {}]   ;;  %s10362_s4 = inlined_call_operand.vmem [shape: f32[1,192], index: 4, kind: input, shape index: {}]   ;;  %s10363_s7 = inlined_call_operand.vmem [shape: f32[48,48], index: 7, kind: input, shape index: {}]   ;;  %s10364_s5 = inlined_call_operand.vmem [shape: f32[64,64], index: 5, kind: input, shape index: {}]   ;;  %s10365_s8 = inlined_call_operand.vmem [shape: f32[2,48], index: 8, kind: input, shape index: {}]   ;;  %s10366_s9 = inlined_call_operand.vmem [shape: f32[64,64], index: 9, kind: input, shape index: {}]   ;;  %s10367_s14 = inlined_call_operand.vmem [shape: f32[32,32], index: 14, kind: input, shape index: {}]   ;;  %s10368_s11 = inlined_call_operand.vmem [shape: f32[64,64], index: 11, kind: input, shape index: {}]   ;;  %s10369_s6 = inlined_call_operand.vmem [shape: f32[1,64], index: 6, kind: input, shape index: {}]   ;;  %s10370_s13 = inlined_call_operand.vmem [shape: f32[16,32], index: 13, kind: input, shape index: {}]   ;;  %s10371_s16 = inlined_call_operand.vmem [shape: f32[32,64], index: 16, kind: input, shape index: {}]   ;;  %s10372_s10 = inlined_call_operand.vmem [shape: f32[1,64], index: 10, kind: input, shape index: {}]   ;;  %s10373_s15 = inlined_call_operand.vmem [shape: f32[1,32], index: 15, kind: input, shape index: {}]   ;;  %s10374_s12 = inlined_call_operand.vmem [shape: f32[1,64], index: 12, kind: input, shape index: {}]   ;;  %s10375_s17 = inlined_call_operand.vmem [shape: f32[1,64], index: 17, kind: input, shape index: {}]   ;;  %s10376_s18 = inlined_call_operand.vmem [shape: f32[16,2], index: 18, kind: input, shape index: {}]   ;;  %s10377_s20 = inlined_call_operand.vmem [shape: f32[2,64,192], index: 20, kind: input, shape index: {}]   ;;  %s10378_s21 = inlined_call_operand.vmem [shape: f32[2,1,192], index: 21, kind: input, shape index: {}]   ;;  %s10379_s19 = inlined_call_operand.vmem [shape: f32[16,16], index: 19, kind: input, shape index: {}]   ;;  %s10380_s22 = inlined_call_operand.vmem [shape: f32[2,64,64], index: 22, kind: input, shape index: {}]   ;;  %s10381_s23 = inlined_call_operand.vmem [shape: f32[2,1,64], index: 23, kind: input, shape index: {}]   ;;  %s10382_s24 = inlined_call_operand.vmem [shape: f32[64,128], index: 24, kind: input, shape index: {}]   ;;  %s10383_s25 = inlined_call_operand.vmem [shape: f32[1,128], index: 25, kind: input, shape index: {}]   ;;  %s10384_s26 = inlined_call_operand.vmem [shape: f32[16,128], index: 26, kind: output, shape index: {}]  }
   0x1   :  { %10418 = sst [smem:[#allocation18_spill]] %s10358_s2  ;;  %332 = vmatprep.mubr.f32.mxu1 %v10394_v39  ;;  %vm387_vm2 = vcmask 64512   ;;  %vm8520_vm4 = vmmov 0   ;;  %vm3246_vm5 = vcmask 130048   ;;  %vm3253_vm6 = vcmask 195584  }
   0x2   :  { %10419 = sst [smem:[#allocation19_spill]] %s10359_s0  ;;  %v240_v59 = vshrl.u32 %v239_v58, 7  ;;  %vm8843_vm3 = vmpackc.low %vm387_vm2, %vm387_vm2  ;;  %s10410_s0 = smov 16   ;;  %vm3260_vm7 = vcmask 261120   ;;  %vm3267_vm8 = vcmask 326656   ;;  %vm3280_vm9 = vcmask 457728  }
   0x3   :  { %10420 = sst [smem:[#allocation20_spill]] %s10360_s3  ;;  %s10430_s27 = sld [smem:[#allocation19_spill]]  ;;  %vm3627_vm10 = vcmask 517120   ;;  %vm3838_vm11 = vcmask 15360   ;;  %vm3845_vm12 = vcmask 1041408   ;;  %vm9986_vm13 = vmpackc.low %vm3246_vm5, %vm3246_vm5 }
   0x4   :  { %10421 = sst [smem:[#allocation21_spill]] %s10361_s1  ;;  %v8776_v60 = vsub.s32 0, %v240_v59  ;;  %v8782_v63 = vsub.s32 1, %v240_v59  ;;  %s8509_s3 = smov 40  }
   0x5   :  { %10422 = sst [smem:[#allocation22_spill]] %s10362_s4  ;;  %s10432_s2 = sld [smem:[#allocation21_spill]] }
   0x6   :  { %10423 = sst [smem:[#allocation23_spill]] %s10363_s7  ;;  %10433 = vst [vmem:[#allocation2_spill] sm:$0xff] %v8776_v60  ;;  %10435 = vst [vmem:[#allocation3_spill] sm:$0xff] %v8782_v63  ;;  %s8510_s7 = smov 104  }
   0x7   :  { %10424 = sst [smem:[#allocation24_spill]] %s10364_s5  ;;  %s10438_s30 = sld [smem:[#allocation23_spill]] }
   0x8   :  { %10425 = sst [smem:[#allocation25_spill]] %s10365_s8  ;;  %s10429_s8 = sld [smem:[#allocation18_spill]] }
   0x9   :  { %10426 = sst [smem:[#allocation26_spill]] %s10366_s9  ;;  %v83_v8 = vld [vmem:[%s10430_s27] sm:$0xff]  ;;  %s10431_s9 = sld [smem:[#allocation20_spill]]  ;;  %v84_v27 = vld [vmem:[%s10430_s27 + $0x8] sm:$0xff]  ;;  %v85_v29 = vld [vmem:[%s10430_s27 + $0x10] sm:$0xff] }
   0xa   :  { %10427 = sst [smem:[#allocation27_spill]] %s10367_s14  ;;  %6714 = vmatprep.mubr.msk.f32.mxu0 %vm101_vm0, %v83_v8  ;;  %v86_v30 = vld [vmem:[%s10430_s27 + $0x18] sm:$0xff]  ;;  %v87_v31 = vld [vmem:[%s10430_s27 + $0x20] sm:$0xff]  ;;  %v88_v32 = vld [vmem:[%s10430_s27 + $0x28] sm:$0xff]  ;;  %s10434_s27 = sld [smem:[#allocation22_spill]] }
   0xb   :  { %10428 = sst [smem:[#allocation28_spill]] %s10368_s11  ;;  %v95_v40 = vld [vmem:[%s10432_s2] sm:$0xff]  ;;  %v96_v44 = vld [vmem:[%s10432_s2 + $0x8] sm:$0xff]  ;;  %v97_v47 = vld [vmem:[%s10432_s2 + $0x10] sm:$0xff]  ;;  %s8506_s14 = smov 120  }
   0xc   :  { %v98_v52 = vld [vmem:[%s10432_s2 + $0x18] sm:$0xff]  ;;  %v99_v53 = vld [vmem:[%s10432_s2 + $0x20] sm:$0xff]  ;;  %v100_v56 = vld [vmem:[%s10432_s2 + $0x28] sm:$0xff]  ;;  %s8505_s2 = smov 56   ;;  %s10416_s11 = smov 32  }
   0xd   :  { %s10414_s5 = smov 96   ;;  %s10408_s1 = smov 80  }
   0xe   :  { %v89_v0 = vld [vmem:[%s10429_s8] sm:$0xff]  ;;  %v90_v1 = vld [vmem:[%s10429_s8 + $0x8] sm:$0xff]  ;;  %v91_v2 = vld [vmem:[%s10429_s8 + $0x10] sm:$0xff]  ;;  %s8518_s4 = smov 72  }
   0xf   :  { %v7327_v3 = vpack.c.bf16 %v90_v1, %v89_v0  ;;  %v92_v4 = vld [vmem:[%s10429_s8 + $0x18] sm:$0xff]  ;;  %v93_v6 = vld [vmem:[%s10429_s8 + $0x20] sm:$0xff]  ;;  %v94_v7 = vld [vmem:[%s10429_s8 + $0x28] sm:$0xff]  ;;  %s8513_s8 = smov 24  }
  0x10   :  { %v7331_v5 = vpack.c.bf16 %v92_v4, %v91_v2  ;;  %v216_v9 = vld [vmem:[%s10431_s9 + $0x8] sm:$0xff]  ;;  %v218_v10 = vld [vmem:[%s10431_s9 + $0x18] sm:$0xff]  ;;  %v215_v11 = vld [vmem:[%s10431_s9] sm:$0xff]  ;;  %v7335_v12 = vpack.c.bf16 %v94_v7, %v93_v6 }
  0x11   :  { %7328 = vmatprep.subr.bf16.mxu0 %v7327_v3  ;;  %v7339_v13 = vpack.c.bf16 %v218_v10, %v216_v9  ;;  %v217_v14 = vld [vmem:[%s10431_s9 + $0x10] sm:$0xff]  ;;  %v220_v15 = vld [vmem:[%s10431_s9 + $0x28] sm:$0xff]  ;;  %v222_v16 = vld [vmem:[%s10431_s9 + $0x38] sm:$0xff] }
  0x12   :  { %7330 = vmatpush3.bf16.msra.mxu0 %v7327_v3  ;;  %v7341_v17 = vpack.c.bf16 %v217_v14, %v215_v11  ;;  %v7343_v18 = vpack.c.bf16 %v222_v16, %v220_v15  ;;  %v219_v19 = vld [vmem:[%s10431_s9 + $0x20] sm:$0xff]  ;;  %v221_v20 = vld [vmem:[%s10431_s9 + $0x30] sm:$0xff]  ;;  %v224_v21 = vld [vmem:[%s10431_s9 + $0x48] sm:$0xff] }
  0x13   :  { %7332 = vmatprep.subr.bf16.mxu0 %v7331_v5  ;;  %7340 = vmatprep.subr.bf16.mxu1 %v7339_v13  ;;  %v226_v22 = vld [vmem:[%s10431_s9 + $0x58] sm:$0xff]  ;;  %v7345_v23 = vpack.c.bf16 %v221_v20, %v219_v19  ;;  %v223_v25 = vld [vmem:[%s10431_s9 + $0x40] sm:$0xff]  ;;  %v225_v26 = vld [vmem:[%s10431_s9 + $0x50] sm:$0xff] }
  0x14   :  { %7342 = vmatpush1.bf16.msra.mxu1 %v7341_v17  ;;  %v7347_v24 = vpack.c.bf16 %v226_v22, %v224_v21  ;;  %v7349_v28 = vpack.c.bf16 %v225_v26, %v223_v25  ;;  %v228_v33 = vld [vmem:[%s10431_s9 + $0x68] sm:$0xff]  ;;  %v230_v34 = vld [vmem:[%s10431_s9 + $0x78] sm:$0xff]  ;;  %v227_v36 = vld [vmem:[%s10431_s9 + $0x60] sm:$0xff] }
  0x15   :  { %7344 = vmatprep.subr.bf16.mxu1 %v7343_v18  ;;  %v7351_v35 = vpack.c.bf16 %v230_v34, %v228_v33  ;;  %v229_v37 = vld [vmem:[%s10431_s9 + $0x70] sm:$0xff]  ;;  %v231_v61 = vld [vmem:[%s10434_s27] sm:$0x3]  ;;  %s8508_s9 = smov 112  }
  0x16   :  { %7334 = vmatpush3.bf16.msra.mxu0 %v7331_v5  ;;  %v7353_v38 = vpack.c.bf16 %v229_v37, %v227_v36  ;;  %v242_v62 = vrot.slane %v231_v61, %v8776_v60  ;;  %v246_v3 = vrot.slane %v231_v61, %v8782_v63 }
  0x17   :  { %7336 = vmatprep.subr.bf16.mxu0 %v7335_v12 }
  0x18   :  { %7346 = vmatpush1.bf16.msra.mxu1 %v7345_v23 }
  0x19   :  { %7348 = vmatprep.subr.bf16.mxu1 %v7347_v24 }
  0x1a   :  { %7338 = vmatpush3.bf16.msra.mxu0 %v7335_v12 }
  0x1c   :  { %7350 = vmatpush1.bf16.msra.mxu1 %v7349_v28 }
  0x1d   :  { %6715 = vmatmul.mubr.msk.f32.vlgmr.msra.gmra.mrb[0].mxu0 %vm101_vm0, %v84_v27  ;;  %7352 = vmatprep.subr.bf16.mxu1 %v7351_v35 }
  0x1e   :  { %6717 = vmatprep.mubr.msk.f32.mxu0 %vm101_vm0, %v85_v29 }
  0x20   :  { %7354 = vmatpush1.bf16.msra.mxu1 %v7353_v38 }
  0x21   :  { %6718 = vmatmul.mubr.msk.f32.gmra.mrb[2].mxu0 %vm101_vm0, %v86_v30 }
  0x22   :  { %6720 = vmatprep.mubr.msk.f32.mxu0 %vm101_vm0, %v87_v31 }
  0x25   :  { %6721 = vmatmul.mubr.msk.f32.gmra.mrb[4].mxu0 %vm101_vm0, %v88_v32 }
  0xf0   :  { %v6716_v41 = vpop.f32.mrb[0].mxu0 }
  0xf1   :  { %v186_v42 = vpop.f32.mrb[1].mxu0  ;;  %v192_v48 = vadd.f32 %v6716_v41, %v96_v44 }
  0xf2   :  { %v187_v43 = vadd.f32 %v186_v42, %v95_v40 }
  0xf4   :  { %6102 = vmatmul.mubr.msk.f32.vlgmr.msra.gmra.mrb[0].mxu1 %vm249_vm1, %v187_v43  ;;  %v6719_v45 = vpop.f32.mrb[2].mxu0 }
  0xf5   :  { %338 = vmatprep.mubr.f32.mxu1 %v10394_v39  ;;  %v196_v46 = vpop.f32.mrb[3].mxu0  ;;  %v202_v54 = vadd.f32 %v6719_v45, %v98_v52 }
  0xf6   :  { %v197_v49 = vadd.f32 %v196_v46, %v97_v47 }
  0xf8   :  { %6103 = vmatmul.mubr.msk.f32.gmra.mrb[2].mxu1 %vm249_vm1, %v192_v48  ;;  %v6722_v50 = vpop.f32.mrb[4].mxu0 }
  0xf9   :  { %344 = vmatprep.mubr.f32.mxu1 %v10394_v39  ;;  %v206_v51 = vpop.f32.mrb[5].mxu0  ;;  %v212_v57 = vadd.f32 %v6722_v50, %v100_v56 }
  0xfa   :  { %v207_v55 = vadd.f32 %v206_v51, %v99_v53 }
  0xfc   :  { %6104 = vmatmul.mubr.msk.f32.gmra.mrb[4].mxu1 %vm249_vm1, %v197_v49 }
  0xfd   :  { %350 = vmatprep.mubr.f32.mxu1 %v10394_v39 }
 0x100   :  { %6105 = vmatmul.mubr.msk.f32.gmra.mrb[6].mxu1 %vm249_vm1, %v202_v54 }
 0x101   :  { %356 = vmatprep.mubr.f32.mxu1 %v10394_v39 }
 0x104   :  { %6106 = vmatmul.mubr.msk.f32.gmra.mrb[8].mxu1 %vm249_vm1, %v207_v55 }
 0x105   :  { %362 = vmatprep.mubr.f32.mxu1 %v10394_v39 }
 0x108   :  { %6107 = vmatmul.mubr.msk.f32.gmra.mrb[10].mxu1 %vm249_vm1, %v212_v57 }
 0x1c7   :  { %v334_v0 = vpop.f32.mrb[0].mxu1 }
 0x1c8   :  { %v8784_v1 = vadd.f32 %v334_v0, %v242_v62  ;;  %v336_v2 = vpop.f32.mrb[1].mxu1 }
 0x1c9   :  { %v337_v7 = vadd.f32 %v336_v2, %v246_v3 }
 0x1ca   :  { %6735 = vmatprep.mubr.msk.f32.mxu0 %vm387_vm2, %v8784_v1 }
 0x1cb   :  { %v340_v4 = vpop.f32.mrb[2].mxu1 }
 0x1cc   :  { %v8789_v5 = vadd.f32 %v340_v4, %v242_v62  ;;  %v342_v6 = vpop.f32.mrb[3].mxu1 }
 0x1cd   :  { %v343_v8 = vadd.f32 %v342_v6, %v246_v3  ;;  %v8890_v6 = vld [vmem:[%s10438_s30 + $0x8] sm:$0xff] }
 0x1ce   :  { %v8793_v9 = vpack.i.bf16 %v8789_v5, %v8784_v1 }
 0x1cf   :  { %v346_v10 = vpop.f32.mrb[4].mxu1  ;;  %v7373_v11 = vpack.c.bf16 %v343_v8, %v337_v7  ;;  %v8795_v12 = vpack.i.bf16 %v343_v8, %v337_v7  ;;  %v8895_v7 = vld [vmem:[%s10438_s30] sm:$0xff] }
 0x1d0   :  { %v348_v13 = vpop.f32.mrb[5].mxu1  ;;  %7835 = vrot.lane.b32.xlu0 %v8793_v9, %s8504_s29  ;;  %v8799_v15 = vadd.f32 %v346_v10, %v242_v62 }
 0x1d1   :  { %7374 = vmatprep.subr.bf16.mxu1 %v7373_v11  ;;  %v349_v18 = vadd.f32 %v348_v13, %v246_v3 }
 0x1d2   :  { %7376 = vmatpush3.bf16.msra.mxu1 %v7373_v11 }
 0x1d3   :  { %v352_v14 = vpop.f32.mrb[6].mxu1 }
 0x1d4   :  { %v8801_v16 = vadd.f32 %v352_v14, %v242_v62  ;;  %v354_v17 = vpop.f32.mrb[7].mxu1  ;;  %v8902_v14 = vld [vmem:[%s10438_s30 + $0x18] sm:$0xff] }
 0x1d5   :  { %v355_v19 = vadd.f32 %v354_v17, %v246_v3 }
 0x1d6   :  { %v8805_v20 = vpack.i.bf16 %v8801_v16, %v8799_v15 }
 0x1d7   :  { %v358_v21 = vpop.f32.mrb[8].mxu1  ;;  %v7377_v22 = vpack.c.bf16 %v355_v19, %v349_v18  ;;  %v8807_v23 = vpack.i.bf16 %v355_v19, %v349_v18 }
 0x1d8   :  { %v360_v24 = vpop.f32.mrb[9].mxu1  ;;  %7840 = vrot.lane.b32.xlu0 %v8805_v20, %s8504_s29  ;;  %v8811_v26 = vadd.f32 %v358_v21, %v242_v62 }
 0x1d9   :  { %7378 = vmatprep.subr.bf16.mxu1 %v7377_v22  ;;  %v361_v29 = vadd.f32 %v360_v24, %v246_v3  ;;  %v8910_v24 = vld [vmem:[%s10438_s30 + $0x10] sm:$0xff] }
 0x1da   :  { %7380 = vmatpush3.bf16.msra.mxu1 %v7377_v22 }
 0x1db   :  { %v364_v25 = vpop.f32.mrb[10].mxu1 }
 0x1dc   :  { %v8813_v27 = vadd.f32 %v364_v25, %v242_v62  ;;  %v366_v28 = vpop.f32.mrb[11].mxu1  ;;  %7855 = vrot.lane.b32.xlu0 %v8805_v20, %s8505_s2  ;;  %v8915_v25 = vld [vmem:[%s10438_s30 + $0x20] sm:$0xff] }
 0x1dd   :  { %v367_v30 = vadd.f32 %v366_v28, %v246_v3 }
 0x1de   :  { %v8819_v31 = vpack.i.bf16 %v8813_v27, %v8811_v26 }
 0x1df   :  { %v7381_v32 = vpack.c.bf16 %v367_v30, %v361_v29  ;;  %v8821_v33 = vpack.i.bf16 %v367_v30, %v361_v29 }
 0x1e0   :  { %7845 = vrot.lane.b32.xlu1 %v8819_v31, %s8504_s29  ;;  %686 = vrot.lane.b32.xlu0 %v8784_v1, %s8506_s14 }
 0x1e1   :  { %7382 = vmatprep.subr.bf16.mxu1 %v7381_v32 }
 0x1e2   :  { %7384 = vmatpush3.bf16.msra.mxu1 %v7381_v32  ;;  %v8922_v32 = vld [vmem:[%s10438_s30 + $0x28] sm:$0xff] }
 0x1e4   :  { %7850 = vrot.lane.b32.xlu1 %v8793_v9, %s8505_s2  ;;  %690 = vrot.lane.b32.xlu0 %v8799_v15, %s8506_s14 }
 0x1e8   :  { %7860 = vrot.lane.b32.xlu1 %v8819_v31, %s8505_s2  ;;  %694 = vrot.lane.b32.xlu0 %v8811_v26, %s8506_s14 }
 0x1ec   :  { %688 = vrot.lane.b32.xlu1 %v8789_v5, %s8506_s14 }
 0x1f0   :  { %692 = vrot.lane.b32.xlu1 %v8801_v16, %s8506_s14 }
 0x1f4   :  { %696 = vrot.lane.b32.xlu1 %v8813_v27, %s8506_s14 }
 0x242   :  { %v7836_v34 = vpop.permute.xlu0 %7835 }
 0x243   :  { %v7838_v35 = vunpack.i.h.bf16 %v7836_v34  ;;  %v7837_v36 = vunpack.i.l.bf16 %v7836_v34 }
 0x245   :  { %v7355_v38 = vpack.c.bf16 %v7838_v35, %v7837_v36 }
 0x247   :  { %7357 = vmatprep.subr.msk.bf16.mxu0 %vm8843_vm3, %v7355_v38 }
 0x248   :  { %7360 = vmatpush3.bf16.xpose.msk.msra.mxu0 %vm8843_vm3, %v7355_v38 }
 0x24a   :  { %v7841_v40 = vpop.permute.xlu0 %7840 }
 0x24b   :  { %v7843_v41 = vunpack.i.h.bf16 %v7841_v40  ;;  %v7842_v42 = vunpack.i.l.bf16 %v7841_v40 }
 0x24d   :  { %v7361_v43 = vpack.c.bf16 %v7843_v41, %v7842_v42 }
 0x24e   :  { %v7856_v51 = vpop.permute.xlu0 %7855 }
 0x24f   :  { %7363 = vmatprep.subr.msk.bf16.mxu0 %vm8843_vm3, %v7361_v43  ;;  %v7858_v53 = vunpack.i.h.bf16 %v7856_v51  ;;  %v7857_v54 = vunpack.i.l.bf16 %v7856_v51 }
 0x250   :  { %7366 = vmatpush3.bf16.xpose.msk.msra.mxu0 %vm8843_vm3, %v7361_v43 }
 0x251   :  { %v7391_v55 = vpack.c.bf16 %v7858_v53, %v7857_v54 }
 0x252   :  { %v7846_v44 = vpop.permute.xlu1 %7845  ;;  %v687_v59 = vpop.permute.xlu0 %686 }
 0x253   :  { %v7848_v45 = vunpack.i.h.bf16 %v7846_v44  ;;  %v7847_v46 = vunpack.i.l.bf16 %v7846_v44 }
 0x255   :  { %v7367_v47 = vpack.c.bf16 %v7848_v45, %v7847_v46 }
 0x256   :  { %v7851_v48 = vpop.permute.xlu1 %7850  ;;  %v691_v0 = vpop.permute.xlu0 %690 }
 0x257   :  { %v7853_v49 = vunpack.i.h.bf16 %v7851_v48  ;;  %v7852_v50 = vunpack.i.l.bf16 %v7851_v48  ;;  %7369 = vmatprep.subr.msk.bf16.mxu0 %vm8843_vm3, %v7367_v47 }
 0x258   :  { %7372 = vmatpush3.bf16.xpose.msk.msra.mxu0 %vm8843_vm3, %v7367_v47 }
 0x259   :  { %v7385_v52 = vpack.c.bf16 %v7853_v49, %v7852_v50 }
 0x25a   :  { %v7861_v56 = vpop.permute.xlu1 %7860  ;;  %v695_v3 = vpop.permute.xlu0 %694 }
 0x25b   :  { %7387 = vmatprep.subr.msk.bf16.mxu0 %vm8843_vm3, %v7385_v52  ;;  %v7863_v57 = vunpack.i.h.bf16 %v7861_v56  ;;  %v7862_v58 = vunpack.i.l.bf16 %v7861_v56 }
 0x25d   :  { %v7397_v61 = vpack.c.bf16 %v7863_v57, %v7862_v58 }
 0x25e   :  { %v689_v62 = vpop.permute.xlu1 %688 }
 0x25f   :  { %6736 = vmatmul.mubr.msk.f32.vlgmr.msra.gmra.mrb[6].mxu0 %vm387_vm2, %v8789_v5 }
 0x260   :  { %6738 = vmatprep.mubr.msk.f32.mxu0 %vm387_vm2, %v8799_v15  ;;  %7390 = vmatpush3.bf16.xpose.msk.msra.mxu0 %vm8843_vm3, %v7385_v52 }
 0x261   :  { %7393 = vmatprep.subr.msk.bf16.mxu0 %vm8843_vm3, %v7391_v55 }
 0x262   :  { %v693_v2 = vpop.permute.xlu1 %692 }
 0x263   :  { %6739 = vmatmul.mubr.msk.f32.gmra.mrb[8].mxu0 %vm387_vm2, %v8801_v16 }
 0x264   :  { %6741 = vmatprep.mubr.msk.f32.mxu0 %vm387_vm2, %v8811_v26 }
 0x266   :  { %v697_v4 = vpop.permute.xlu1 %696 }
 0x267   :  { %6742 = vmatmul.mubr.msk.f32.gmra.mrb[10].mxu0 %vm387_vm2, %v8813_v27 }
 0x268   :  { %7396 = vmatpush3.bf16.xpose.msk.msra.mxu0 %vm8843_vm3, %v7391_v55  ;;  %6777 = vmatprep.mubr.msk.f32.mxu0 %vm387_vm2, %v687_v59 }
 0x269   :  { %7399 = vmatprep.subr.msk.bf16.mxu0 %vm8843_vm3, %v7397_v61 }
 0x270   :  { %7402 = vmatpush3.bf16.xpose.msk.msra.mxu0 %vm8843_vm3, %v7397_v61 }
 0x277   :  { %6778 = vmatmul.mubr.msk.f32.vlgmr.msra.gmra.mrb[12].mxu0 %vm387_vm2, %v689_v62 }
 0x278   :  { %6780 = vmatprep.mubr.msk.f32.mxu0 %vm387_vm2, %v691_v0 }
 0x27b   :  { %6781 = vmatmul.mubr.msk.f32.gmra.mrb[14].mxu0 %vm387_vm2, %v693_v2 }
 0x27c   :  { %6783 = vmatprep.mubr.msk.f32.mxu0 %vm387_vm2, %v695_v3 }
 0x27f   :  { %6784 = vmatmul.mubr.msk.f32.gmra.mrb[16].mxu0 %vm387_vm2, %v697_v4 }
 0x332   :  { %v6737_v8 = vpop.f32.mrb[6].mxu0 }
 0x333   :  { %v484_v10 = vadd.f32 %v6737_v8, %v8890_v6  ;;  %v478_v11 = vpop.f32.mrb[7].mxu0 }
 0x334   :  { %v479_v13 = vadd.f32 %v478_v11, %v8895_v7 }
 0x335   :  { %v510_v17 = vsel %vm101_vm0, %v484_v10, -inf }
 0x336   :  { %511 = vmax.xlane.f32.xlu1 %v510_v17  ;;  %v6740_v18 = vpop.f32.mrb[8].mxu0  ;;  %v507_v19 = vsel %vm101_vm0, %v479_v13, -inf }
 0x337   :  { %v494_v21 = vadd.f32 %v6740_v18, %v8902_v14  ;;  %v488_v22 = vpop.f32.mrb[9].mxu0  ;;  %508 = vmax.xlane.f32.xlu0 %v507_v19 }
 0x338   :  { %v489_v29 = vadd.f32 %v488_v22, %v8910_v24 }
 0x339   :  { %v516_v28 = vsel %vm101_vm0, %v494_v21, -inf }
 0x33a   :  { %v6743_v30 = vpop.f32.mrb[10].mxu0  ;;  %v513_v40 = vsel %vm101_vm0, %v489_v29, -inf }
 0x33b   :  { %v498_v34 = vpop.f32.mrb[11].mxu0  ;;  %517 = vmax.xlane.f32.xlu0 %v516_v28  ;;  %v504_v36 = vadd.f32 %v6743_v30, %v8922_v32 }
 0x33c   :  { %v499_v35 = vadd.f32 %v498_v34, %v8915_v25 }
 0x33d   :  { %v522_v41 = vsel %vm101_vm0, %v504_v36, -inf }
 0x33e   :  { %v519_v38 = vsel %vm101_vm0, %v499_v35, -inf }
 0x33f   :  { %520 = vmax.xlane.f32.xlu1 %v519_v38  ;;  %514 = vmax.xlane.f32.xlu0 %v513_v40 }
 0x343   :  { %523 = vmax.xlane.f32.xlu0 %v522_v41 }
 0x34a   :  { %v6779_v42 = vpop.f32.mrb[12].mxu0 }
 0x34b   :  { %v8930_v43 = vadd.f32 %v6779_v42, %v8890_v6  ;;  %v800_v44 = vpop.f32.mrb[13].mxu0 }
 0x34c   :  { %v8933_v45 = vadd.f32 %v800_v44, %v8895_v7 }
 0x34d   :  { %v832_v46 = vsel %vm101_vm0, %v8930_v43, -inf }
 0x34e   :  { %v6782_v47 = vpop.f32.mrb[14].mxu0  ;;  %833 = vmax.xlane.f32.xlu0 %v832_v46  ;;  %v829_v48 = vsel %vm101_vm0, %v8933_v45, -inf }
 0x34f   :  { %v8940_v49 = vadd.f32 %v6782_v47, %v8902_v14  ;;  %v810_v50 = vpop.f32.mrb[15].mxu0  ;;  %830 = vmax.xlane.f32.xlu1 %v829_v48 }
 0x350   :  { %v8954_v56 = vadd.f32 %v810_v50, %v8910_v24 }
 0x351   :  { %v838_v51 = vsel %vm101_vm0, %v8940_v49, -inf }
 0x352   :  { %v6785_v52 = vpop.f32.mrb[16].mxu0  ;;  %839 = vmax.xlane.f32.xlu0 %v838_v51  ;;  %v835_v58 = vsel %vm101_vm0, %v8954_v56, -inf }
 0x353   :  { %v8945_v53 = vadd.f32 %v6785_v52, %v8922_v32  ;;  %v820_v54 = vpop.f32.mrb[17].mxu0 }
 0x354   :  { %v8957_v57 = vadd.f32 %v820_v54, %v8915_v25 }
 0x355   :  { %v844_v55 = vsel %vm101_vm0, %v8945_v53, -inf }
 0x356   :  { %845 = vmax.xlane.f32.xlu0 %v844_v55  ;;  %v841_v59 = vsel %vm101_vm0, %v8957_v57, -inf }
 0x360   :  { %7865 = vrot.lane.b32.xlu1 %v8795_v12, %s8506_s14 }
 0x36c   :  { %7870 = vrot.lane.b32.xlu0 %v8807_v23, %s8506_s14 }
 0x384   :  { %836 = vmax.xlane.f32.xlu1 %v835_v58 }
 0x388   :  { %842 = vmax.xlane.f32.xlu1 %v841_v59 }
 0x399   :  { %7875 = vrot.lane.b32.xlu1 %v8821_v33, %s8506_s14  ;;  %s10412_s14 = smov 48  }
 0x3c3   :  { %v512_v61 = vpop.xlane.xlu1 %511 }
 0x3c4   :  { %v526_v62 = vsub.f32 %v484_v10, %v512_v61  ;;  %v509_v0 = vpop.xlane.xlu0 %508 }
 0x3c5   :  { %v525_v2 = vsub.f32 %v479_v13, %v509_v0 }
 0x3c6   :  { %v533_v3 = vmul.f32 1.442695, %v526_v62 }
 0x3c7   :  { %v531_v4 = vmul.f32 1.442695, %v525_v2 }
 0x3c8   :  { %8234 = vpow2.f32 %v533_v3  ;;  %v518_v8 = vpop.xlane.xlu0 %517 }
 0x3c9   :  { %8236 = vpow2.f32 %v531_v4  ;;  %v528_v11 = vsub.f32 %v494_v21, %v518_v8 }
 0x3cb   :  { %v537_v17 = vmul.f32 1.442695, %v528_v11 }
 0x3cc   :  { %v521_v18 = vpop.xlane.xlu1 %520  ;;  %v515_v19 = vpop.xlane.xlu0 %514 }
 0x3cd   :  { %8238 = vpow2.f32 %v537_v17  ;;  %v529_v22 = vsub.f32 %v499_v35, %v521_v18  ;;  %v527_v28 = vsub.f32 %v489_v29, %v515_v19 }
 0x3cf   :  { %v535_v30 = vmul.f32 1.442695, %v527_v28  ;;  %v539_v34 = vmul.f32 1.442695, %v529_v22 }
 0x3d0   :  { %v524_v38 = vpop.xlane.xlu0 %523 }
 0x3d1   :  { %v530_v40 = vsub.f32 %v504_v36, %v524_v38  ;;  %8240 = vpow2.f32 %v535_v30 }
 0x3d2   :  { %v8965_v41 = vpop.eup %8234  ;;  %8242 = vpow2.f32 %v539_v34 }
 0x3d3   :  { %v8967_v10 = vpop.eup %8236  ;;  %v541_v13 = vmul.f32 1.442695, %v530_v40  ;;  %v546_v42 = vsel %vm101_vm0, %v8965_v41, 0.0 }
 0x3d4   :  { %547 = vadd.xlane.f32.xlu0 %v546_v42  ;;  %v543_v21 = vsel %vm101_vm0, %v8967_v10, 0.0 }
 0x3d5   :  { %8244 = vpow2.f32 %v541_v13  ;;  %544 = vadd.xlane.f32.xlu1 %v543_v21 }
 0x3d7   :  { %v8973_v29 = vpop.eup %8238 }
 0x3d8   :  { %v552_v35 = vsel %vm101_vm0, %v8973_v29, 0.0 }
 0x3d9   :  { %553 = vadd.xlane.f32.xlu0 %v552_v35 }
 0x3db   :  { %v834_v36 = vpop.xlane.xlu0 %833  ;;  %v8977_v44 = vpop.eup %8240 }
 0x3dc   :  { %v848_v46 = vsub.f32 %v8930_v43, %v834_v36  ;;  %v831_v47 = vpop.xlane.xlu1 %830  ;;  %v549_v50 = vsel %vm101_vm0, %v8977_v44, 0.0  ;;  %v8983_v51 = vpop.eup %8242 }
 0x3dd   :  { %v847_v48 = vsub.f32 %v8933_v45, %v831_v47  ;;  %550 = vadd.xlane.f32.xlu1 %v549_v50  ;;  %v555_v0 = vsel %vm101_vm0, %v8983_v51, 0.0 }
 0x3de   :  { %v855_v52 = vmul.f32 1.442695, %v848_v46 }
 0x3df   :  { %v8985_v54 = vpop.eup %8244  ;;  %v853_v55 = vmul.f32 1.442695, %v847_v48  ;;  %v840_v58 = vpop.xlane.xlu0 %839 }
 0x3e0   :  { %8246 = vpow2.f32 %v855_v52  ;;  %v850_v59 = vsub.f32 %v8940_v49, %v840_v58  ;;  %v7866_v61 = vpop.permute.xlu1 %7865  ;;  %v558_v43 = vsel %vm101_vm0, %v8985_v54, 0.0 }
 0x3e1   :  { %8248 = vpow2.f32 %v853_v55  ;;  %v7868_v45 = vunpack.i.h.bf16 %v7866_v61  ;;  %v7867_v62 = vunpack.i.l.bf16 %v7866_v61  ;;  %559 = vadd.xlane.f32.xlu0 %v558_v43  ;;  %556 = vadd.xlane.f32.xlu1 %v555_v0 }
 0x3e2   :  { %v859_v2 = vmul.f32 1.442695, %v850_v59 }
 0x3e3   :  { %v846_v3 = vpop.xlane.xlu0 %845  ;;  %v8992_v4 = vpack.c.bf16 %v7868_v45, %v7867_v62 }
 0x3e4   :  { %8250 = vpow2.f32 %v859_v2  ;;  %v852_v8 = vsub.f32 %v8945_v53, %v846_v3 }
 0x3e5   :  { %7404 = vmatprep.subr.bf16.mxu1 %v8992_v4 }
 0x3e6   :  { %v863_v49 = vmul.f32 1.442695, %v852_v8 }
 0x3e8   :  { %8252 = vpow2.f32 %v863_v49 }
 0x3ea   :  { %v8996_v11 = vpop.eup %8246 }
 0x3eb   :  { %v8998_v17 = vpop.eup %8248  ;;  %v868_v18 = vsel %vm101_vm0, %v8996_v11, 0.0 }
 0x3ec   :  { %869 = vadd.xlane.f32.xlu0 %v868_v18  ;;  %v865_v19 = vsel %vm101_vm0, %v8998_v17, 0.0 }
 0x3ed   :  { %866 = vadd.xlane.f32.xlu1 %v865_v19 }
 0x3ee   :  { %v9004_v22 = vpop.eup %8250 }
 0x3ef   :  { %v874_v53 = vsel %vm101_vm0, %v9004_v22, 0.0 }
 0x3f0   :  { %875 = vadd.xlane.f32.xlu0 %v874_v53 }
 0x3f2   :  { %v9008_v28 = vpop.eup %8252 }
 0x3f3   :  { %v880_v30 = vsel %vm101_vm0, %v9008_v28, 0.0 }
 0x3f4   :  { %881 = vadd.xlane.f32.xlu0 %v880_v30 }
 0x411   :  { %v837_v34 = vpop.xlane.xlu1 %836 }
 0x412   :  { %v849_v38 = vsub.f32 %v8954_v56, %v837_v34  ;;  %v7871_v56 = vpop.permute.xlu0 %7870 }
 0x413   :  { %v7873_v61 = vunpack.i.h.bf16 %v7871_v56  ;;  %v7872_v43 = vunpack.i.l.bf16 %v7871_v56 }
 0x414   :  { %v857_v40 = vmul.f32 1.442695, %v849_v38 }
 0x415   :  { %v843_v13 = vpop.xlane.xlu1 %842  ;;  %v7407_v49 = vpack.c.bf16 %v7873_v61, %v7872_v43 }
 0x416   :  { %8254 = vpow2.f32 %v857_v40  ;;  %v851_v42 = vsub.f32 %v8957_v57, %v843_v13 }
 0x418   :  { %v861_v21 = vmul.f32 1.442695, %v851_v42 }
 0x419   :  { %v7876_v57 = vpop.permute.xlu1 %7875 }
 0x41a   :  { %8256 = vpow2.f32 %v861_v21  ;;  %v7878_v3 = vunpack.i.h.bf16 %v7876_v57  ;;  %v7877_v8 = vunpack.i.l.bf16 %v7876_v57 }
 0x41c   :  { %v7411_v19 = vpack.c.bf16 %v7878_v3, %v7877_v8 }
 0x420   :  { %v9014_v35 = vpop.eup %8254 }
 0x421   :  { %v871_v36 = vsel %vm101_vm0, %v9014_v35, 0.0 }
 0x422   :  { %872 = vadd.xlane.f32.xlu1 %v871_v36 }
 0x424   :  { %v9018_v46 = vpop.eup %8256 }
 0x425   :  { %v877_v47 = vsel %vm101_vm0, %v9018_v46, 0.0 }
 0x426   :  { %878 = vadd.xlane.f32.xlu0 %v877_v47 }
 0x433   :  { %7885 = vrot.lane.b32.xlu1 %v8805_v20, %s10412_s14 }
 0x437   :  { %7890 = vrot.lane.b32.xlu1 %v8819_v31, %s10412_s14 }
 0x43b   :  { %1032 = vrot.lane.b32.xlu1 %v8784_v1, %s8508_s9 }
 0x43c   :  { %7880 = vrot.lane.b32.xlu0 %v8793_v9, %s10412_s14 }
 0x43f   :  { %1034 = vrot.lane.b32.xlu1 %v8789_v5, %s8508_s9 }
 0x440   :  { %1036 = vrot.lane.b32.xlu0 %v8799_v15, %s8508_s9 }
 0x443   :  { %1038 = vrot.lane.b32.xlu1 %v8801_v16, %s8508_s9 }
 0x444   :  { %1040 = vrot.lane.b32.xlu0 %v8811_v26, %s8508_s9 }
 0x447   :  { %1042 = vrot.lane.b32.xlu1 %v8813_v27, %s8508_s9 }
 0x461   :  { %v548_v48 = vpop.xlane.xlu0 %547 }
 0x462   :  { %8258 = vrcp.f32 %v548_v48  ;;  %v545_v50 = vpop.xlane.xlu1 %544 }
 0x463   :  { %8260 = vrcp.f32 %v545_v50 }
 0x466   :  { %v554_v52 = vpop.xlane.xlu0 %553 }
 0x467   :  { %8262 = vrcp.f32 %v554_v52 }
 0x46a   :  { %v551_v55 = vpop.xlane.xlu1 %550 }
 0x46b   :  { %8264 = vrcp.f32 %v551_v55 }
 0x46c   :  { %v8259_v58 = vpop.eup %8258 }
 0x46d   :  { %v8261_v59 = vpop.eup %8260  ;;  %v568_v0 = vmul.f32 %v8259_v58, %v8965_v41 }
 0x46e   :  { %v560_v45 = vpop.xlane.xlu0 %559  ;;  %v567_v62 = vmul.f32 %v8261_v59, %v8967_v10  ;;  %v557_v2 = vpop.xlane.xlu1 %556 }
 0x46f   :  { %8266 = vrcp.f32 %v560_v45 }
 0x470   :  { %8268 = vrcp.f32 %v557_v2  ;;  %6756 = vmatprep.mubr.msk.f32.mxu1 %vm101_vm0, %v567_v62 }
 0x471   :  { %6757 = vmatmul.mubr.msk.f32.vlgmr.msra.gmra.mrb[12].mxu1 %vm101_vm0, %v568_v0  ;;  %v8263_v18 = vpop.eup %8262 }
 0x472   :  { %7406 = vmatpush3.bf16.msra.mxu1 %v8992_v4  ;;  %v570_v10 = vmul.f32 %v8263_v18, %v8973_v29 }
 0x473   :  { %7408 = vmatprep.subr.bf16.mxu1 %v7407_v49 }
 0x475   :  { %v8265_v53 = vpop.eup %8264 }
 0x476   :  { %7410 = vmatpush3.bf16.msra.mxu1 %v7407_v49  ;;  %v569_v41 = vmul.f32 %v8265_v53, %v8977_v44 }
 0x477   :  { %7412 = vmatprep.subr.bf16.mxu1 %v7411_v19 }
 0x478   :  { %6759 = vmatprep.mubr.msk.f32.mxu1 %vm101_vm0, %v569_v41 }
 0x479   :  { %v8267_v30 = vpop.eup %8266  ;;  %v870_v34 = vpop.xlane.xlu0 %869  ;;  %6760 = vmatmul.mubr.msk.f32.gmra.mrb[14].mxu1 %vm101_vm0, %v570_v10 }
 0x47a   :  { %v8269_v38 = vpop.eup %8268  ;;  %8270 = vrcp.f32 %v870_v34  ;;  %v867_v40 = vpop.xlane.xlu1 %866  ;;  %v572_v4 = vmul.f32 %v8267_v30, %v8985_v54  ;;  %7414 = vmatpush3.bf16.msra.mxu1 %v7411_v19 }
 0x47b   :  { %8272 = vrcp.f32 %v867_v40  ;;  %v571_v13 = vmul.f32 %v8269_v38, %v8983_v51 }
 0x47d   :  { %6762 = vmatprep.mubr.msk.f32.mxu1 %vm101_vm0, %v571_v13  ;;  %v876_v36 = vpop.xlane.xlu0 %875 }
 0x47e   :  { %6763 = vmatmul.mubr.msk.f32.gmra.mrb[16].mxu1 %vm101_vm0, %v572_v4  ;;  %8274 = vrcp.f32 %v876_v36 }
 0x481   :  { %v882_v54 = vpop.xlane.xlu0 %881 }
 0x484   :  { %v8271_v29 = vpop.eup %8270 }
 0x485   :  { %v8273_v44 = vpop.eup %8272  ;;  %v890_v21 = vmul.f32 %v8271_v29, %v8996_v11 }
 0x486   :  { %v889_v42 = vmul.f32 %v8273_v44, %v8998_v17 }
 0x488   :  { %6798 = vmatprep.mubr.msk.f32.mxu1 %vm101_vm0, %v889_v42  ;;  %v8275_v55 = vpop.eup %8274 }
 0x489   :  { %6799 = vmatmul.mubr.msk.f32.vlgmr.msra.gmra.mrb[18].mxu1 %vm101_vm0, %v890_v21  ;;  %v892_v45 = vmul.f32 %v8275_v55, %v9004_v22 }
 0x4af   :  { %v873_v47 = vpop.xlane.xlu1 %872 }
 0x4b0   :  { %8276 = vrcp.f32 %v873_v47 }
 0x4b1   :  { %8278 = vrcp.f32 %v882_v54 }
 0x4b3   :  { %v879_v51 = vpop.xlane.xlu0 %878  ;;  %v7886_v56 = vpop.permute.xlu1 %7885 }
 0x4b4   :  { %8280 = vrcp.f32 %v879_v51  ;;  %v7888_v48 = vunpack.i.h.bf16 %v7886_v56  ;;  %v7887_v50 = vunpack.i.l.bf16 %v7886_v56 }
 0x4b6   :  { %v7421_v61 = vpack.c.bf16 %v7888_v48, %v7887_v50 }
 0x4b7   :  { %v7881_v57 = vpop.permute.xlu0 %7880  ;;  %v7891_v43 = vpop.permute.xlu1 %7890 }
 0x4b8   :  { %v7883_v52 = vunpack.i.h.bf16 %v7881_v57  ;;  %v7882_v17 = vunpack.i.l.bf16 %v7881_v57  ;;  %v7893_v2 = vunpack.i.h.bf16 %v7891_v43  ;;  %v7892_v3 = vunpack.i.l.bf16 %v7891_v43 }
 0x4ba   :  { %v8277_v11 = vpop.eup %8276  ;;  %v7415_v58 = vpack.c.bf16 %v7883_v52, %v7882_v17  ;;  %v7427_v49 = vpack.c.bf16 %v7893_v2, %v7892_v3 }
 0x4bb   :  { %v891_v59 = vmul.f32 %v8277_v11, %v9014_v35  ;;  %v8279_v62 = vpop.eup %8278  ;;  %v1033_v22 = vpop.permute.xlu1 %1032 }
 0x4bc   :  { %7417 = vmatprep.subr.msk.bf16.mxu1 %vm8843_vm3, %v7415_v58  ;;  %v894_v8 = vmul.f32 %v8279_v62, %v9008_v28  ;;  %v1037_v18 = vpop.permute.xlu0 %1036 }
 0x4bd   :  { %6801 = vmatprep.mubr.msk.f32.mxu1 %vm101_vm0, %v891_v59  ;;  %7420 = vmatpush3.bf16.xpose.msk.msra.mxu1 %vm8843_vm3, %v7415_v58 }
 0x4be   :  { %v8281_v0 = vpop.eup %8280  ;;  %6802 = vmatmul.mubr.msk.f32.gmra.mrb[20].mxu1 %vm101_vm0, %v892_v45  ;;  %7423 = vmatprep.subr.msk.bf16.mxu1 %vm8843_vm3, %v7421_v61 }
 0x4bf   :  { %v893_v35 = vmul.f32 %v8281_v0, %v9018_v46  ;;  %v1035_v46 = vpop.permute.xlu1 %1034 }
 0x4c0   :  { %v1041_v19 = vpop.permute.xlu0 %1040 }
 0x4c1   :  { %6804 = vmatprep.mubr.msk.f32.mxu1 %vm101_vm0, %v893_v35 }
 0x4c2   :  { %6805 = vmatmul.mubr.msk.f32.gmra.mrb[22].mxu1 %vm101_vm0, %v894_v8 }
 0x4c3   :  { %6819 = vmatprep.mubr.msk.f32.mxu1 %vm387_vm2, %v1033_v22  ;;  %v1039_v28 = vpop.permute.xlu1 %1038 }
 0x4c5   :  { %7426 = vmatpush3.bf16.xpose.msk.msra.mxu1 %vm8843_vm3, %v7421_v61 }
 0x4c6   :  { %7429 = vmatprep.subr.msk.bf16.mxu1 %vm8843_vm3, %v7427_v49 }
 0x4c7   :  { %v1043_v53 = vpop.permute.xlu1 %1042 }
 0x4cd   :  { %7432 = vmatpush3.bf16.xpose.msk.msra.mxu1 %vm8843_vm3, %v7427_v49 }
 0x4d4   :  { %6820 = vmatmul.mubr.msk.f32.vlgmr.msra.gmra.mrb[24].mxu1 %vm387_vm2, %v1035_v46 }
 0x4d5   :  { %6822 = vmatprep.mubr.msk.f32.mxu1 %vm387_vm2, %v1037_v18 }
 0x4d8   :  { %6823 = vmatmul.mubr.msk.f32.gmra.mrb[26].mxu1 %vm387_vm2, %v1039_v28 }
 0x4d9   :  { %6825 = vmatprep.mubr.msk.f32.mxu1 %vm387_vm2, %v1041_v19 }
 0x4dc   :  { %6826 = vmatmul.mubr.msk.f32.gmra.mrb[28].mxu1 %vm387_vm2, %v1043_v53 }
 0x544   :  { %v9083_v41 = vpop.f32.mrb[12].mxu1 }
 0x545   :  { %10439 = vst [vmem:[#allocation4_spill] sm:$0xff] %v9083_v41  ;;  %v9085_v10 = vpop.f32.mrb[13].mxu1 }
 0x546   :  { %10440 = vst [vmem:[#allocation5_spill] sm:$0xff] %v9085_v10 }
 0x54c   :  { %v9087_v30 = vpop.f32.mrb[14].mxu1 }
 0x54d   :  { %10441 = vst [vmem:[#allocation6_spill] sm:$0xff] %v9087_v30  ;;  %v9089_v34 = vpop.f32.mrb[15].mxu1 }
 0x54e   :  { %10442 = vst [vmem:[#allocation7_spill] sm:$0xff] %v9089_v34 }
 0x551   :  { %v9091_v38 = vpop.f32.mrb[16].mxu1 }
 0x552   :  { %10443 = vst [vmem:[#allocation8_spill] sm:$0xff] %v9091_v38  ;;  %v9093_v40 = vpop.f32.mrb[17].mxu1 }
 0x553   :  { %10444 = vst [vmem:[#allocation9_spill] sm:$0xff] %v9093_v40 }
 0x55c   :  { %v9095_v4 = vpop.f32.mrb[18].mxu1 }
 0x55d   :  { %v9097_v13 = vpop.f32.mrb[19].mxu1 }
 0x591   :  { %v9101_v44 = vpop.f32.mrb[20].mxu1 }
 0x592   :  { %v9103_v42 = vpop.f32.mrb[21].mxu1 }
 0x595   :  { %v9107_v36 = vpop.f32.mrb[22].mxu1 }
 0x596   :  { %v9109_v54 = vpop.f32.mrb[23].mxu1 }
 0x5a7   :  { %v6821_v51 = vpop.f32.mrb[24].mxu1 }
 0x5a8   :  { %v1152_v56 = vadd.f32 %v6821_v51, %v8890_v6  ;;  %v1146_v57 = vpop.f32.mrb[25].mxu1 }
 0x5a9   :  { %v1147_v48 = vadd.f32 %v1146_v57, %v8895_v7 }
 0x5aa   :  { %v1178_v50 = vsel %vm101_vm0, %v1152_v56, -inf }
 0x5ab   :  { %1179 = vmax.xlane.f32.xlu1 %v1178_v50  ;;  %v6824_v52 = vpop.f32.mrb[26].mxu1  ;;  %v1175_v17 = vsel %vm101_vm0, %v1147_v48, -inf }
 0x5ac   :  { %v1162_v55 = vadd.f32 %v6824_v52, %v8902_v14  ;;  %v1156_v11 = vpop.f32.mrb[27].mxu1  ;;  %1176 = vmax.xlane.f32.xlu0 %v1175_v17 }
 0x5ad   :  { %v1157_v59 = vadd.f32 %v1156_v11, %v8910_v24 }
 0x5ae   :  { %v1184_v58 = vsel %vm101_vm0, %v1162_v55, -inf }
 0x5af   :  { %v6827_v61 = vpop.f32.mrb[28].mxu1  ;;  %v1181_v35 = vsel %vm101_vm0, %v1157_v59, -inf }
 0x5b0   :  { %v1166_v43 = vpop.f32.mrb[29].mxu1  ;;  %1185 = vmax.xlane.f32.xlu0 %v1184_v58  ;;  %v1172_v62 = vadd.f32 %v6827_v61, %v8922_v32 }
 0x5b1   :  { %v1167_v45 = vadd.f32 %v1166_v43, %v8915_v25 }
 0x5b2   :  { %v1190_v2 = vsel %vm101_vm0, %v1172_v62, -inf }
 0x5b3   :  { %v1187_v0 = vsel %vm101_vm0, %v1167_v45, -inf }
 0x5b4   :  { %1188 = vmax.xlane.f32.xlu1 %v1187_v0  ;;  %1182 = vmax.xlane.f32.xlu0 %v1181_v35 }
 0x5b8   :  { %1191 = vmax.xlane.f32.xlu0 %v1190_v2 }
 0x5c5   :  { %7895 = vrot.lane.b32.xlu1 %v8795_v12, %s8508_s9 }
 0x5c9   :  { %7905 = vrot.lane.b32.xlu1 %v8821_v33, %s8508_s9 }
 0x5ce   :  { %7900 = vrot.lane.b32.xlu0 %v8807_v23, %s8508_s9 }
 0x638   :  { %v1180_v3 = vpop.xlane.xlu1 %1179 }
 0x639   :  { %v1194_v8 = vsub.f32 %v1152_v56, %v1180_v3  ;;  %v1177_v22 = vpop.xlane.xlu0 %1176 }
 0x63a   :  { %v1193_v49 = vsub.f32 %v1147_v48, %v1177_v22 }
 0x63b   :  { %v1201_v46 = vmul.f32 1.442695, %v1194_v8 }
 0x63c   :  { %v1199_v18 = vmul.f32 1.442695, %v1193_v49 }
 0x63d   :  { %8282 = vpow2.f32 %v1201_v46  ;;  %v1186_v28 = vpop.xlane.xlu0 %1185 }
 0x63e   :  { %8284 = vpow2.f32 %v1199_v18  ;;  %v1196_v19 = vsub.f32 %v1162_v55, %v1186_v28 }
 0x640   :  { %v1205_v53 = vmul.f32 1.442695, %v1196_v19 }
 0x641   :  { %v1189_v51 = vpop.xlane.xlu1 %1188  ;;  %v1183_v57 = vpop.xlane.xlu0 %1182 }
 0x642   :  { %8286 = vpow2.f32 %v1205_v53  ;;  %v1195_v50 = vsub.f32 %v1157_v59, %v1183_v57  ;;  %v1197_v52 = vsub.f32 %v1167_v45, %v1189_v51 }
 0x644   :  { %v1203_v17 = vmul.f32 1.442695, %v1195_v50  ;;  %v1207_v35 = vmul.f32 1.442695, %v1197_v52 }
 0x645   :  { %v7896_v11 = vpop.permute.xlu1 %7895  ;;  %v1192_v58 = vpop.xlane.xlu0 %1191 }
 0x646   :  { %v7898_v61 = vunpack.i.h.bf16 %v7896_v11  ;;  %v7897_v43 = vunpack.i.l.bf16 %v7896_v11  ;;  %v1198_v56 = vsub.f32 %v1172_v62, %v1192_v58  ;;  %8288 = vpow2.f32 %v1203_v17 }
 0x647   :  { %v8283_v0 = vpop.eup %8282 }
 0x648   :  { %v8285_v48 = vpop.eup %8284  ;;  %v1209_v2 = vmul.f32 1.442695, %v1198_v56  ;;  %v1214_v3 = vsel %vm101_vm0, %v8283_v0, 0.0  ;;  %v7433_v55 = vpack.c.bf16 %v7898_v61, %v7897_v43 }
 0x649   :  { %v7906_v8 = vpop.permute.xlu1 %7905  ;;  %1215 = vadd.xlane.f32.xlu0 %v1214_v3  ;;  %v7901_v22 = vpop.permute.xlu0 %7900  ;;  %v1211_v59 = vsel %vm101_vm0, %v8285_v48, 0.0 }
 0x64a   :  { %8290 = vpow2.f32 %v1209_v2  ;;  %v7903_v45 = vunpack.i.h.bf16 %v7901_v22  ;;  %7434 = vmatprep.subr.bf16.mxu0 %v7433_v55  ;;  %1212 = vadd.xlane.f32.xlu1 %v1211_v59  ;;  %v7908_v49 = vunpack.i.h.bf16 %v7906_v8  ;;  %v7907_v46 = vunpack.i.l.bf16 %v7906_v8 }
 0x64b   :  { %v7902_v62 = vunpack.i.l.bf16 %v7901_v22  ;;  %7436 = vmatpush3.bf16.msra.mxu0 %v7433_v55  ;;  %8292 = vpow2.f32 %v1207_v35 }
 0x64c   :  { %v8287_v18 = vpop.eup %8286  ;;  %v7441_v53 = vpack.c.bf16 %v7908_v49, %v7907_v46 }
 0x64d   :  { %v1220_v28 = vsel %vm101_vm0, %v8287_v18, 0.0  ;;  %v7437_v19 = vpack.c.bf16 %v7903_v45, %v7902_v62 }
 0x64e   :  { %1221 = vadd.xlane.f32.xlu0 %v1220_v28 }
 0x64f   :  { %7438 = vmatprep.subr.bf16.mxu0 %v7437_v19 }
 0x650   :  { %7440 = vmatpush3.bf16.msra.mxu0 %v7437_v19  ;;  %v8289_v51 = vpop.eup %8288 }
 0x651   :  { %7442 = vmatprep.subr.bf16.mxu0 %v7441_v53  ;;  %v1217_v57 = vsel %vm101_vm0, %v8289_v51, 0.0 }
 0x652   :  { %1218 = vadd.xlane.f32.xlu1 %v1217_v57 }
 0x654   :  { %v8291_v50 = vpop.eup %8290  ;;  %7444 = vmatpush3.bf16.msra.mxu0 %v7441_v53 }
 0x655   :  { %v1226_v52 = vsel %vm101_vm0, %v8291_v50, 0.0  ;;  %v8293_v17 = vpop.eup %8292 }
 0x656   :  { %1227 = vadd.xlane.f32.xlu0 %v1226_v52  ;;  %v1223_v11 = vsel %vm101_vm0, %v8293_v17, 0.0 }
 0x65a   :  { %1224 = vadd.xlane.f32.xlu0 %v1223_v11 }
 0x663   :  { %7915 = vrot.lane.b32.xlu1 %v8805_v20, %s8509_s3 }
 0x667   :  { %7920 = vrot.lane.b32.xlu1 %v8819_v31, %s8509_s3 }
 0x66b   :  { %1372 = vrot.lane.b32.xlu1 %v8784_v1, %s8510_s7 }
 0x66f   :  { %1374 = vrot.lane.b32.xlu1 %v8789_v5, %s8510_s7 }
 0x670   :  { %7910 = vrot.lane.b32.xlu0 %v8793_v9, %s8509_s3 }
 0x673   :  { %1378 = vrot.lane.b32.xlu1 %v8801_v16, %s8510_s7 }
 0x674   :  { %1376 = vrot.lane.b32.xlu0 %v8799_v15, %s8510_s7 }
 0x677   :  { %1382 = vrot.lane.b32.xlu1 %v8813_v27, %s8510_s7 }
 0x678   :  { %1380 = vrot.lane.b32.xlu0 %v8811_v26, %s8510_s7 }
 0x6d6   :  { %v1216_v58 = vpop.xlane.xlu0 %1215 }
 0x6d7   :  { %8294 = vrcp.f32 %v1216_v58  ;;  %v1213_v61 = vpop.xlane.xlu1 %1212 }
 0x6d8   :  { %8296 = vrcp.f32 %v1213_v61 }
 0x6db   :  { %v1222_v43 = vpop.xlane.xlu0 %1221 }
 0x6dc   :  { %8298 = vrcp.f32 %v1222_v43 }
 0x6df   :  { %v1219_v56 = vpop.xlane.xlu1 %1218 }
 0x6e0   :  { %8300 = vrcp.f32 %v1219_v56 }
 0x6e1   :  { %v8295_v35 = vpop.eup %8294 }
 0x6e2   :  { %v8297_v2 = vpop.eup %8296  ;;  %v1236_v8 = vmul.f32 %v8295_v35, %v8283_v0 }
 0x6e3   :  { %v1228_v3 = vpop.xlane.xlu0 %1227  ;;  %v1235_v55 = vmul.f32 %v8297_v2, %v8285_v48  ;;  %v7916_v59 = vpop.permute.xlu1 %7915 }
 0x6e4   :  { %8302 = vrcp.f32 %v1228_v3  ;;  %v7918_v46 = vunpack.i.h.bf16 %v7916_v59  ;;  %v7917_v28 = vunpack.i.l.bf16 %v7916_v59 }
 0x6e5   :  { %6840 = vmatprep.mubr.msk.f32.mxu0 %vm101_vm0, %v1235_v55 }
 0x6e6   :  { %6841 = vmatmul.mubr.msk.f32.vlgmr.msra.gmra.mrb[18].mxu0 %vm101_vm0, %v1236_v8  ;;  %v8299_v45 = vpop.eup %8298  ;;  %v7451_v0 = vpack.c.bf16 %v7918_v46, %v7917_v28 }
 0x6e7   :  { %v1225_v22 = vpop.xlane.xlu0 %1224  ;;  %v1238_v52 = vmul.f32 %v8299_v45, %v8287_v18  ;;  %v7921_v48 = vpop.permute.xlu1 %7920 }
 0x6e8   :  { %8304 = vrcp.f32 %v1225_v22  ;;  %v7923_v18 = vunpack.i.h.bf16 %v7921_v48  ;;  %v7922_v43 = vunpack.i.l.bf16 %v7921_v48 }
 0x6ea   :  { %v8301_v49 = vpop.eup %8300  ;;  %v7457_v2 = vpack.c.bf16 %v7923_v18, %v7922_v43 }
 0x6eb   :  { %v7911_v62 = vpop.permute.xlu0 %7910  ;;  %v1237_v57 = vmul.f32 %v8301_v49, %v8289_v51  ;;  %v1373_v35 = vpop.permute.xlu1 %1372 }
 0x6ec   :  { %v7913_v19 = vunpack.i.h.bf16 %v7911_v62  ;;  %v7912_v53 = vunpack.i.l.bf16 %v7911_v62 }
 0x6ed   :  { %6843 = vmatprep.mubr.msk.f32.mxu0 %vm101_vm0, %v1237_v57 }
 0x6ee   :  { %v7445_v11 = vpack.c.bf16 %v7913_v19, %v7912_v53  ;;  %6844 = vmatmul.mubr.msk.f32.gmra.mrb[20].mxu0 %vm101_vm0, %v1238_v52  ;;  %v8303_v58 = vpop.eup %8302 }
 0x6ef   :  { %v1240_v56 = vmul.f32 %v8303_v58, %v8291_v50  ;;  %v1377_v3 = vpop.permute.xlu0 %1376 }
 0x6f0   :  { %7447 = vmatprep.subr.msk.bf16.mxu0 %vm8843_vm3, %v7445_v11 }
 0x6f1   :  { %7450 = vmatpush3.bf16.xpose.msk.msra.mxu0 %vm8843_vm3, %v7445_v11 }
 0x6f2   :  { %v8305_v61 = vpop.eup %8304  ;;  %7453 = vmatprep.subr.msk.bf16.mxu0 %vm8843_vm3, %v7451_v0 }
 0x6f3   :  { %v1239_v51 = vmul.f32 %v8305_v61, %v8293_v17  ;;  %v1375_v17 = vpop.permute.xlu1 %1374  ;;  %v1381_v55 = vpop.permute.xlu0 %1380 }
 0x6f5   :  { %6846 = vmatprep.mubr.msk.f32.mxu0 %vm101_vm0, %v1239_v51 }
 0x6f6   :  { %6847 = vmatmul.mubr.msk.f32.gmra.mrb[22].mxu0 %vm101_vm0, %v1240_v56 }
 0x6f7   :  { %6861 = vmatprep.mubr.msk.f32.mxu0 %vm387_vm2, %v1373_v35  ;;  %v1379_v50 = vpop.permute.xlu1 %1378 }
 0x6f9   :  { %7456 = vmatpush3.bf16.xpose.msk.msra.mxu0 %vm8843_vm3, %v7451_v0 }
 0x6fa   :  { %7459 = vmatprep.subr.msk.bf16.mxu0 %vm8843_vm3, %v7457_v2 }
 0x6fb   :  { %v1383_v8 = vpop.permute.xlu1 %1382 }
 0x701   :  { %7462 = vmatpush3.bf16.xpose.msk.msra.mxu0 %vm8843_vm3, %v7457_v2 }
 0x708   :  { %6862 = vmatmul.mubr.msk.f32.vlgmr.msra.gmra.mrb[24].mxu0 %vm387_vm2, %v1375_v17 }
 0x709   :  { %6864 = vmatprep.mubr.msk.f32.mxu0 %vm387_vm2, %v1377_v3 }
 0x70c   :  { %6865 = vmatmul.mubr.msk.f32.gmra.mrb[26].mxu0 %vm387_vm2, %v1379_v50 }
 0x70d   :  { %6867 = vmatprep.mubr.msk.f32.mxu0 %vm387_vm2, %v1381_v55 }
 0x710   :  { %6868 = vmatmul.mubr.msk.f32.gmra.mrb[28].mxu0 %vm387_vm2, %v1383_v8 }
 0x7b9   :  { %v9179_v22 = vpop.f32.mrb[18].mxu0 }
 0x7ba   :  { %v9181_v59 = vpop.f32.mrb[19].mxu0 }
 0x7c1   :  { %v9185_v49 = vpop.f32.mrb[20].mxu0 }
 0x7c2   :  { %v9187_v46 = vpop.f32.mrb[21].mxu0 }
 0x7c9   :  { %v9191_v28 = vpop.f32.mrb[22].mxu0 }
 0x7ca   :  { %10445 = vst [vmem:[#allocation10_spill] sm:$0xff] %v9191_v28  ;;  %v9193_v19 = vpop.f32.mrb[23].mxu0 }
 0x7cb   :  { %10446 = vst [vmem:[#allocation11_spill] sm:$0xff] %v9193_v19 }
 0x7db   :  { %v6863_v57 = vpop.f32.mrb[24].mxu0 }
 0x7dc   :  { %v1492_v52 = vadd.f32 %v6863_v57, %v8890_v6  ;;  %v1486_v11 = vpop.f32.mrb[25].mxu0 }
 0x7dd   :  { %v1487_v0 = vadd.f32 %v1486_v11, %v8895_v7 }
 0x7de   :  { %v1518_v48 = vsel %vm101_vm0, %v1492_v52, -inf }
 0x7df   :  { %1519 = vmax.xlane.f32.xlu1 %v1518_v48  ;;  %v6866_v58 = vpop.f32.mrb[26].mxu0  ;;  %v1515_v61 = vsel %vm101_vm0, %v1487_v0, -inf }
 0x7e0   :  { %v1502_v51 = vadd.f32 %v6866_v58, %v8902_v14  ;;  %v1496_v18 = vpop.f32.mrb[27].mxu0  ;;  %1516 = vmax.xlane.f32.xlu0 %v1515_v61 }
 0x7e1   :  { %v1497_v56 = vadd.f32 %v1496_v18, %v8910_v24 }
 0x7e2   :  { %v1524_v43 = vsel %vm101_vm0, %v1502_v51, -inf }
 0x7e3   :  { %v6869_v35 = vpop.f32.mrb[28].mxu0  ;;  %v1521_v3 = vsel %vm101_vm0, %v1497_v56, -inf }
 0x7e4   :  { %v1506_v2 = vpop.f32.mrb[29].mxu0  ;;  %1525 = vmax.xlane.f32.xlu0 %v1524_v43  ;;  %v1512_v7 = vadd.f32 %v6869_v35, %v8922_v32 }
 0x7e5   :  { %v1507_v6 = vadd.f32 %v1506_v2, %v8915_v25 }
 0x7e6   :  { %v1530_v14 = vsel %vm101_vm0, %v1512_v7, -inf }
 0x7e7   :  { %v1527_v17 = vsel %vm101_vm0, %v1507_v6, -inf }
 0x7e8   :  { %1528 = vmax.xlane.f32.xlu1 %v1527_v17  ;;  %1522 = vmax.xlane.f32.xlu0 %v1521_v3 }
 0x7ec   :  { %1531 = vmax.xlane.f32.xlu0 %v1530_v14 }
 0x7f9   :  { %7925 = vrot.lane.b32.xlu1 %v8795_v12, %s8510_s7 }
 0x7fd   :  { %7935 = vrot.lane.b32.xlu1 %v8821_v33, %s8510_s7 }
 0x802   :  { %7930 = vrot.lane.b32.xlu0 %v8807_v23, %s8510_s7  ;;  %s8514_s7 = smov 88  }
 0x86c   :  { %v1520_v24 = vpop.xlane.xlu1 %1519 }
 0x86d   :  { %v1534_v25 = vsub.f32 %v1492_v52, %v1520_v24  ;;  %v1517_v32 = vpop.xlane.xlu0 %1516 }
 0x86e   :  { %v1533_v50 = vsub.f32 %v1487_v0, %v1517_v32 }
 0x86f   :  { %v1541_v55 = vmul.f32 1.442695, %v1534_v25 }
 0x870   :  { %v1539_v8 = vmul.f32 1.442695, %v1533_v50 }
 0x871   :  { %8306 = vpow2.f32 %v1541_v55  ;;  %v1526_v57 = vpop.xlane.xlu0 %1525 }
 0x872   :  { %8308 = vpow2.f32 %v1539_v8  ;;  %v1536_v11 = vsub.f32 %v1502_v51, %v1526_v57 }
 0x874   :  { %v1545_v48 = vmul.f32 1.442695, %v1536_v11 }
 0x875   :  { %v1529_v58 = vpop.xlane.xlu1 %1528  ;;  %v1523_v61 = vpop.xlane.xlu0 %1522 }
 0x876   :  { %8310 = vpow2.f32 %v1545_v48  ;;  %v1535_v18 = vsub.f32 %v1497_v56, %v1523_v61  ;;  %v1537_v43 = vsub.f32 %v1507_v6, %v1529_v58 }
 0x878   :  { %v1543_v35 = vmul.f32 1.442695, %v1535_v18  ;;  %v1547_v25 = vmul.f32 1.442695, %v1537_v43 }
 0x879   :  { %v7926_v2 = vpop.permute.xlu1 %7925  ;;  %v1532_v17 = vpop.xlane.xlu0 %1531 }
 0x87a   :  { %v7928_v3 = vunpack.i.h.bf16 %v7926_v2  ;;  %v7927_v14 = vunpack.i.l.bf16 %v7926_v2  ;;  %v1538_v52 = vsub.f32 %v1512_v7, %v1532_v17  ;;  %8312 = vpow2.f32 %v1543_v35 }
 0x87b   :  { %v8307_v24 = vpop.eup %8306 }
 0x87c   :  { %v8309_v0 = vpop.eup %8308  ;;  %v1549_v32 = vmul.f32 1.442695, %v1538_v52  ;;  %v1554_v50 = vsel %vm101_vm0, %v8307_v24, 0.0  ;;  %v7463_v51 = vpack.c.bf16 %v7928_v3, %v7927_v14 }
 0x87d   :  { %v7936_v55 = vpop.permute.xlu1 %7935  ;;  %1555 = vadd.xlane.f32.xlu0 %v1554_v50  ;;  %v7931_v8 = vpop.permute.xlu0 %7930  ;;  %v1551_v56 = vsel %vm101_vm0, %v8309_v0, 0.0 }
 0x87e   :  { %8314 = vpow2.f32 %v1549_v32  ;;  %v7933_v6 = vunpack.i.h.bf16 %v7931_v8  ;;  %7464 = vmatprep.subr.bf16.mxu1 %v7463_v51  ;;  %1552 = vadd.xlane.f32.xlu1 %v1551_v56  ;;  %v7938_v57 = vunpack.i.h.bf16 %v7936_v55  ;;  %v7937_v11 = vunpack.i.l.bf16 %v7936_v55 }
 0x87f   :  { %v7932_v7 = vunpack.i.l.bf16 %v7931_v8  ;;  %7466 = vmatpush3.bf16.msra.mxu1 %v7463_v51  ;;  %8316 = vpow2.f32 %v1547_v25 }
 0x880   :  { %v8311_v48 = vpop.eup %8310  ;;  %v7471_v18 = vpack.c.bf16 %v7938_v57, %v7937_v11 }
 0x881   :  { %v1560_v58 = vsel %vm101_vm0, %v8311_v48, 0.0  ;;  %v7467_v61 = vpack.c.bf16 %v7933_v6, %v7932_v7 }
 0x882   :  { %1561 = vadd.xlane.f32.xlu0 %v1560_v58 }
 0x883   :  { %7468 = vmatprep.subr.bf16.mxu1 %v7467_v61 }
 0x884   :  { %7470 = vmatpush3.bf16.msra.mxu1 %v7467_v61  ;;  %v8313_v43 = vpop.eup %8312 }
 0x885   :  { %7472 = vmatprep.subr.bf16.mxu1 %v7471_v18  ;;  %v1557_v35 = vsel %vm101_vm0, %v8313_v43, 0.0 }
 0x886   :  { %1558 = vadd.xlane.f32.xlu1 %v1557_v35 }
 0x888   :  { %v8315_v2 = vpop.eup %8314  ;;  %7474 = vmatpush3.bf16.msra.mxu1 %v7471_v18 }
 0x889   :  { %v1566_v17 = vsel %vm101_vm0, %v8315_v2, 0.0  ;;  %v8317_v3 = vpop.eup %8316 }
 0x88a   :  { %1567 = vadd.xlane.f32.xlu0 %v1566_v17  ;;  %v1563_v14 = vsel %vm101_vm0, %v8317_v3, 0.0 }
 0x88e   :  { %1564 = vadd.xlane.f32.xlu0 %v1563_v14 }
 0x897   :  { %7945 = vrot.lane.b32.xlu1 %v8805_v20, %s10416_s11 }
 0x89b   :  { %7950 = vrot.lane.b32.xlu1 %v8819_v31, %s10416_s11 }
 0x89f   :  { %1712 = vrot.lane.b32.xlu1 %v8784_v1, %s10414_s5 }
 0x8a3   :  { %1714 = vrot.lane.b32.xlu1 %v8789_v5, %s10414_s5 }
 0x8a4   :  { %7940 = vrot.lane.b32.xlu0 %v8793_v9, %s10416_s11 }
 0x8a7   :  { %1718 = vrot.lane.b32.xlu1 %v8801_v16, %s10414_s5 }
 0x8a8   :  { %1716 = vrot.lane.b32.xlu0 %v8799_v15, %s10414_s5 }
 0x8ab   :  { %1722 = vrot.lane.b32.xlu1 %v8813_v27, %s10414_s5 }
 0x8ac   :  { %1720 = vrot.lane.b32.xlu0 %v8811_v26, %s10414_s5 }
 0x90a   :  { %v1556_v52 = vpop.xlane.xlu0 %1555 }
 0x90b   :  { %8318 = vrcp.f32 %v1556_v52  ;;  %v1553_v25 = vpop.xlane.xlu1 %1552 }
 0x90c   :  { %8320 = vrcp.f32 %v1553_v25 }
 0x90f   :  { %v1562_v32 = vpop.xlane.xlu0 %1561 }
 0x910   :  { %8322 = vrcp.f32 %v1562_v32 }
 0x913   :  { %v1559_v50 = vpop.xlane.xlu1 %1558 }
 0x914   :  { %8324 = vrcp.f32 %v1559_v50 }
 0x915   :  { %v8319_v51 = vpop.eup %8318 }
 0x916   :  { %v8321_v55 = vpop.eup %8320  ;;  %v1576_v6 = vmul.f32 %v8319_v51, %v8307_v24 }
 0x917   :  { %v1568_v8 = vpop.xlane.xlu0 %1567  ;;  %v1575_v56 = vmul.f32 %v8321_v55, %v8309_v0  ;;  %v7946_v11 = vpop.permute.xlu1 %7945 }
 0x918   :  { %8326 = vrcp.f32 %v1568_v8  ;;  %v7948_v61 = vunpack.i.h.bf16 %v7946_v11  ;;  %v7947_v35 = vunpack.i.l.bf16 %v7946_v11 }
 0x919   :  { %6882 = vmatprep.mubr.msk.f32.mxu1 %vm101_vm0, %v1575_v56 }
 0x91a   :  { %6883 = vmatmul.mubr.msk.f32.vlgmr.msra.gmra.mrb[30].mxu1 %vm101_vm0, %v1576_v6  ;;  %v8323_v7 = vpop.eup %8322  ;;  %v7481_v24 = vpack.c.bf16 %v7948_v61, %v7947_v35 }
 0x91b   :  { %v1565_v57 = vpop.xlane.xlu0 %1564  ;;  %v1578_v25 = vmul.f32 %v8323_v7, %v8311_v48  ;;  %v7951_v0 = vpop.permute.xlu1 %7950 }
 0x91c   :  { %8328 = vrcp.f32 %v1565_v57  ;;  %v7953_v48 = vunpack.i.h.bf16 %v7951_v0  ;;  %v7952_v55 = vunpack.i.l.bf16 %v7951_v0  ;;  %v9284_v0 = vld [vmem:[%s10438_s30 + $0x8] sm:$0xff] }
 0x91e   :  { %v8325_v58 = vpop.eup %8324  ;;  %v7487_v6 = vpack.c.bf16 %v7953_v48, %v7952_v55 }
 0x91f   :  { %v7941_v18 = vpop.permute.xlu0 %7940  ;;  %v1577_v52 = vmul.f32 %v8325_v58, %v8313_v43  ;;  %v1713_v56 = vpop.permute.xlu1 %1712 }
 0x920   :  { %v7943_v17 = vunpack.i.h.bf16 %v7941_v18  ;;  %v7942_v14 = vunpack.i.l.bf16 %v7941_v18 }
 0x921   :  { %6885 = vmatprep.mubr.msk.f32.mxu1 %vm101_vm0, %v1577_v52 }
 0x922   :  { %v7475_v32 = vpack.c.bf16 %v7943_v17, %v7942_v14  ;;  %6886 = vmatmul.mubr.msk.f32.gmra.mrb[32].mxu1 %vm101_vm0, %v1578_v25  ;;  %v8327_v50 = vpop.eup %8326 }
 0x923   :  { %v1580_v8 = vmul.f32 %v8327_v50, %v8315_v2  ;;  %v1717_v57 = vpop.permute.xlu0 %1716 }
 0x924   :  { %7477 = vmatprep.subr.msk.bf16.mxu1 %vm8843_vm3, %v7475_v32 }
 0x925   :  { %7480 = vmatpush3.bf16.xpose.msk.msra.mxu1 %vm8843_vm3, %v7475_v32 }
 0x926   :  { %v8329_v51 = vpop.eup %8328  ;;  %7483 = vmatprep.subr.msk.bf16.mxu1 %vm8843_vm3, %v7481_v24 }
 0x927   :  { %v1579_v43 = vmul.f32 %v8329_v51, %v8317_v3  ;;  %v1715_v3 = vpop.permute.xlu1 %1714  ;;  %v1721_v11 = vpop.permute.xlu0 %1720 }
 0x929   :  { %6888 = vmatprep.mubr.msk.f32.mxu1 %vm101_vm0, %v1579_v43  ;;  %v9290_v43 = vld [vmem:[%s10438_s30] sm:$0xff] }
 0x92a   :  { %6889 = vmatmul.mubr.msk.f32.gmra.mrb[34].mxu1 %vm101_vm0, %v1580_v8 }
 0x92b   :  { %6903 = vmatprep.mubr.msk.f32.mxu1 %vm387_vm2, %v1713_v56  ;;  %v1719_v2 = vpop.permute.xlu1 %1718 }
 0x92d   :  { %7486 = vmatpush3.bf16.xpose.msk.msra.mxu1 %vm8843_vm3, %v7481_v24 }
 0x92e   :  { %7489 = vmatprep.subr.msk.bf16.mxu1 %vm8843_vm3, %v7487_v6 }
 0x92f   :  { %v1723_v7 = vpop.permute.xlu1 %1722 }
 0x935   :  { %7492 = vmatpush3.bf16.xpose.msk.msra.mxu1 %vm8843_vm3, %v7487_v6  ;;  %v9298_v6 = vld [vmem:[%s10438_s30 + $0x18] sm:$0xff] }
 0x93c   :  { %6904 = vmatmul.mubr.msk.f32.vlgmr.msra.gmra.mrb[36].mxu1 %vm387_vm2, %v1715_v3 }
 0x93d   :  { %6906 = vmatprep.mubr.msk.f32.mxu1 %vm387_vm2, %v1717_v57 }
 0x940   :  { %6907 = vmatmul.mubr.msk.f32.gmra.mrb[38].mxu1 %vm387_vm2, %v1719_v2 }
 0x941   :  { %6909 = vmatprep.mubr.msk.f32.mxu1 %vm387_vm2, %v1721_v11  ;;  %v9305_v11 = vld [vmem:[%s10438_s30 + $0x10] sm:$0xff] }
 0x944   :  { %6910 = vmatmul.mubr.msk.f32.gmra.mrb[40].mxu1 %vm387_vm2, %v1723_v7 }
 0x9ed   :  { %v9263_v58 = vpop.f32.mrb[30].mxu1 }
 0x9ee   :  { %v9265_v61 = vpop.f32.mrb[31].mxu1 }
 0x9f5   :  { %v9269_v35 = vpop.f32.mrb[32].mxu1 }
 0x9f6   :  { %v9271_v17 = vpop.f32.mrb[33].mxu1 }
 0x9fd   :  { %v9275_v52 = vpop.f32.mrb[34].mxu1 }
 0x9fe   :  { %10447 = vst [vmem:[#allocation12_spill] sm:$0xff] %v9275_v52  ;;  %v9277_v25 = vpop.f32.mrb[35].mxu1 }
 0x9ff   :  { %10448 = vst [vmem:[#allocation13_spill] sm:$0xff] %v9277_v25 }
 0xa0f   :  { %v6905_v24 = vpop.f32.mrb[36].mxu1 }
 0xa10   :  { %v1832_v50 = vadd.f32 %v9284_v0, %v6905_v24  ;;  %v1826_v51 = vpop.f32.mrb[37].mxu1 }
 0xa11   :  { %v1827_v48 = vadd.f32 %v9290_v43, %v1826_v51 }
 0xa12   :  { %v1858_v55 = vsel %vm101_vm0, %v1832_v50, -inf }
 0xa13   :  { %1859 = vmax.xlane.f32.xlu1 %v1858_v55  ;;  %v6908_v8 = vpop.f32.mrb[38].mxu1  ;;  %v1855_v56 = vsel %vm101_vm0, %v1827_v48, -inf  ;;  %v9311_v55 = vld [vmem:[%s10438_s30 + $0x20] sm:$0xff] }
 0xa14   :  { %v1842_v3 = vadd.f32 %v9298_v6, %v6908_v8  ;;  %v1836_v57 = vpop.f32.mrb[39].mxu1  ;;  %1856 = vmax.xlane.f32.xlu0 %v1855_v56  ;;  %v9317_v56 = vld [vmem:[%s10438_s30 + $0x28] sm:$0xff] }
 0xa15   :  { %v1837_v7 = vadd.f32 %v9305_v11, %v1836_v57 }
 0xa16   :  { %v1864_v2 = vsel %vm101_vm0, %v1842_v3, -inf }
 0xa17   :  { %v6911_v24 = vpop.f32.mrb[40].mxu1  ;;  %v1861_v57 = vsel %vm101_vm0, %v1837_v7, -inf }
 0xa18   :  { %v1846_v51 = vpop.f32.mrb[41].mxu1  ;;  %1865 = vmax.xlane.f32.xlu0 %v1864_v2  ;;  %v1852_v39 = vadd.f32 %v9317_v56, %v6911_v24 }
 0xa19   :  { %v1847_v8 = vadd.f32 %v9311_v55, %v1846_v51 }
 0xa1a   :  { %v1870_v2 = vsel %vm101_vm0, %v1852_v39, -inf }
 0xa1b   :  { %v1867_v32 = vsel %vm101_vm0, %v1847_v8, -inf }
 0xa1c   :  { %1868 = vmax.xlane.f32.xlu1 %v1867_v32  ;;  %1862 = vmax.xlane.f32.xlu0 %v1861_v57 }
 0xa20   :  { %1871 = vmax.xlane.f32.xlu0 %v1870_v2 }
 0xa2d   :  { %7955 = vrot.lane.b32.xlu1 %v8795_v12, %s10414_s5 }
 0xa31   :  { %7965 = vrot.lane.b32.xlu1 %v8821_v33, %s10414_s5 }
 0xa36   :  { %7960 = vrot.lane.b32.xlu0 %v8807_v23, %s10414_s5 }
 0xaa0   :  { %v1860_v51 = vpop.xlane.xlu1 %1859 }
 0xaa1   :  { %v1874_v24 = vsub.f32 %v1832_v50, %v1860_v51  ;;  %v1857_v53 = vpop.xlane.xlu0 %1856 }
 0xaa2   :  { %v1873_v47 = vsub.f32 %v1827_v48, %v1857_v53 }
 0xaa3   :  { %v1881_v14 = vmul.f32 1.442695, %v1874_v24 }
 0xaa4   :  { %v1879_v62 = vmul.f32 1.442695, %v1873_v47 }
 0xaa5   :  { %8330 = vpow2.f32 %v1881_v14  ;;  %v1866_v32 = vpop.xlane.xlu0 %1865 }
 0xaa6   :  { %8332 = vpow2.f32 %v1879_v62  ;;  %v1876_v57 = vsub.f32 %v1842_v3, %v1866_v32 }
 0xaa8   :  { %v1885_v2 = vmul.f32 1.442695, %v1876_v57 }
 0xaa9   :  { %v1869_v45 = vpop.xlane.xlu1 %1868  ;;  %v1863_v21 = vpop.xlane.xlu0 %1862 }
 0xaaa   :  { %8334 = vpow2.f32 %v1885_v2  ;;  %v1875_v18 = vsub.f32 %v1837_v7, %v1863_v21  ;;  %v1877_v29 = vsub.f32 %v1847_v8, %v1869_v45 }
 0xaac   :  { %v1883_v63 = vmul.f32 1.442695, %v1875_v18  ;;  %v1887_v47 = vmul.f32 1.442695, %v1877_v29 }
 0xaad   :  { %v7956_v60 = vpop.permute.xlu1 %7955  ;;  %v1872_v40 = vpop.xlane.xlu0 %1871 }
 0xaae   :  { %v7958_v38 = vunpack.i.h.bf16 %v7956_v60  ;;  %v7957_v30 = vunpack.i.l.bf16 %v7956_v60  ;;  %v1878_v50 = vsub.f32 %v1852_v39, %v1872_v40  ;;  %8336 = vpow2.f32 %v1883_v63 }
 0xaaf   :  { %v8331_v51 = vpop.eup %8330 }
 0xab0   :  { %v8333_v53 = vpop.eup %8332  ;;  %v1889_v14 = vmul.f32 1.442695, %v1878_v50  ;;  %v1894_v62 = vsel %vm101_vm0, %v8331_v51, 0.0  ;;  %v7493_v48 = vpack.c.bf16 %v7958_v38, %v7957_v30 }
 0xab1   :  { %v7966_v3 = vpop.permute.xlu1 %7965  ;;  %1895 = vadd.xlane.f32.xlu0 %v1894_v62  ;;  %v7961_v24 = vpop.permute.xlu0 %7960  ;;  %v1891_v21 = vsel %vm101_vm0, %v8333_v53, 0.0 }
 0xab2   :  { %8338 = vpow2.f32 %v1889_v14  ;;  %v7963_v45 = vunpack.i.h.bf16 %v7961_v24  ;;  %7494 = vmatprep.subr.bf16.mxu0 %v7493_v48  ;;  %1892 = vadd.xlane.f32.xlu1 %v1891_v21  ;;  %v7968_v18 = vunpack.i.h.bf16 %v7966_v3  ;;  %v7967_v60 = vunpack.i.l.bf16 %v7966_v3 }
 0xab3   :  { %v7962_v39 = vunpack.i.l.bf16 %v7961_v24  ;;  %7496 = vmatpush3.bf16.msra.mxu0 %v7493_v48  ;;  %8340 = vpow2.f32 %v1887_v47 }
 0xab4   :  { %v8335_v63 = vpop.eup %8334  ;;  %v7501_v30 = vpack.c.bf16 %v7968_v18, %v7967_v60 }
 0xab5   :  { %v1900_v40 = vsel %vm101_vm0, %v8335_v63, 0.0  ;;  %v7497_v29 = vpack.c.bf16 %v7963_v45, %v7962_v39 }
 0xab6   :  { %1901 = vadd.xlane.f32.xlu0 %v1900_v40 }
 0xab7   :  { %7498 = vmatprep.subr.bf16.mxu0 %v7497_v29 }
 0xab8   :  { %7500 = vmatpush3.bf16.msra.mxu0 %v7497_v29  ;;  %v8337_v38 = vpop.eup %8336 }
 0xab9   :  { %7502 = vmatprep.subr.bf16.mxu0 %v7501_v30  ;;  %v1897_v7 = vsel %vm101_vm0, %v8337_v38, 0.0 }
 0xaba   :  { %1898 = vadd.xlane.f32.xlu1 %v1897_v7 }
 0xabc   :  { %v8339_v8 = vpop.eup %8338  ;;  %7504 = vmatpush3.bf16.msra.mxu0 %v7501_v30 }
 0xabd   :  { %v1906_v32 = vsel %vm101_vm0, %v8339_v8, 0.0  ;;  %v8341_v57 = vpop.eup %8340 }
 0xabe   :  { %1907 = vadd.xlane.f32.xlu0 %v1906_v32  ;;  %v1903_v2 = vsel %vm101_vm0, %v8341_v57, 0.0 }
 0xac2   :  { %1904 = vadd.xlane.f32.xlu0 %v1903_v2 }
 0xacb   :  { %7975 = vrot.lane.b32.xlu1 %v8805_v20, %s8513_s8 }
 0xacf   :  { %7980 = vrot.lane.b32.xlu1 %v8819_v31, %s8513_s8 }
 0xad3   :  { %2052 = vrot.lane.b32.xlu1 %v8784_v1, %s8514_s7 }
 0xad7   :  { %2054 = vrot.lane.b32.xlu1 %v8789_v5, %s8514_s7 }
 0xad8   :  { %7970 = vrot.lane.b32.xlu0 %v8793_v9, %s8513_s8 }
 0xadb   :  { %2058 = vrot.lane.b32.xlu1 %v8801_v16, %s8514_s7 }
 0xadc   :  { %2056 = vrot.lane.b32.xlu0 %v8799_v15, %s8514_s7 }
 0xadf   :  { %2062 = vrot.lane.b32.xlu1 %v8813_v27, %s8514_s7 }
 0xae0   :  { %2060 = vrot.lane.b32.xlu0 %v8811_v26, %s8514_s7 }
 0xb3e   :  { %v1896_v50 = vpop.xlane.xlu0 %1895 }
 0xb3f   :  { %8342 = vrcp.f32 %v1896_v50  ;;  %v1893_v47 = vpop.xlane.xlu1 %1892 }
 0xb40   :  { %8344 = vrcp.f32 %v1893_v47 }
 0xb43   :  { %v1902_v14 = vpop.xlane.xlu0 %1901 }
 0xb44   :  { %8346 = vrcp.f32 %v1902_v14 }
 0xb47   :  { %v1899_v62 = vpop.xlane.xlu1 %1898 }
 0xb48   :  { %8348 = vrcp.f32 %v1899_v62 }
 0xb49   :  { %v8343_v48 = vpop.eup %8342 }
 0xb4a   :  { %v8345_v3 = vpop.eup %8344  ;;  %v1916_v45 = vmul.f32 %v8343_v48, %v8331_v51 }
 0xb4b   :  { %v1908_v24 = vpop.xlane.xlu0 %1907  ;;  %v1915_v21 = vmul.f32 %v8345_v3, %v8333_v53  ;;  %v7976_v60 = vpop.permute.xlu1 %7975 }
 0xb4c   :  { %8350 = vrcp.f32 %v1908_v24  ;;  %v7978_v29 = vunpack.i.h.bf16 %v7976_v60  ;;  %v7977_v7 = vunpack.i.l.bf16 %v7976_v60 }
 0xb4d   :  { %6924 = vmatprep.mubr.msk.f32.mxu0 %vm101_vm0, %v1915_v21 }
 0xb4e   :  { %6925 = vmatmul.mubr.msk.f32.vlgmr.msra.gmra.mrb[30].mxu0 %vm101_vm0, %v1916_v45  ;;  %v8347_v39 = vpop.eup %8346  ;;  %v7511_v51 = vpack.c.bf16 %v7978_v29, %v7977_v7 }
 0xb4f   :  { %v1905_v18 = vpop.xlane.xlu0 %1904  ;;  %v1918_v47 = vmul.f32 %v8347_v39, %v8335_v63  ;;  %v7981_v53 = vpop.permute.xlu1 %7980 }
 0xb50   :  { %8352 = vrcp.f32 %v1905_v18  ;;  %v7983_v63 = vunpack.i.h.bf16 %v7981_v53  ;;  %v7982_v3 = vunpack.i.l.bf16 %v7981_v53 }
 0xb52   :  { %v8349_v40 = vpop.eup %8348  ;;  %v7517_v45 = vpack.c.bf16 %v7983_v63, %v7982_v3 }
 0xb53   :  { %v7971_v30 = vpop.permute.xlu0 %7970  ;;  %v1917_v50 = vmul.f32 %v8349_v40, %v8337_v38  ;;  %v2053_v21 = vpop.permute.xlu1 %2052 }
 0xb54   :  { %v7973_v32 = vunpack.i.h.bf16 %v7971_v30  ;;  %v7972_v2 = vunpack.i.l.bf16 %v7971_v30 }
 0xb55   :  { %6927 = vmatprep.mubr.msk.f32.mxu0 %vm101_vm0, %v1917_v50 }
 0xb56   :  { %v7505_v14 = vpack.c.bf16 %v7973_v32, %v7972_v2  ;;  %6928 = vmatmul.mubr.msk.f32.gmra.mrb[32].mxu0 %vm101_vm0, %v1918_v47  ;;  %v8351_v62 = vpop.eup %8350 }
 0xb57   :  { %v1920_v24 = vmul.f32 %v8351_v62, %v8339_v8  ;;  %v2057_v18 = vpop.permute.xlu0 %2056 }
 0xb58   :  { %7507 = vmatprep.subr.msk.bf16.mxu0 %vm8843_vm3, %v7505_v14 }
 0xb59   :  { %7510 = vmatpush3.bf16.xpose.msk.msra.mxu0 %vm8843_vm3, %v7505_v14 }
 0xb5a   :  { %v8353_v48 = vpop.eup %8352  ;;  %7513 = vmatprep.subr.msk.bf16.mxu0 %vm8843_vm3, %v7511_v51 }
 0xb5b   :  { %v1919_v38 = vmul.f32 %v8353_v48, %v8341_v57  ;;  %v2055_v57 = vpop.permute.xlu1 %2054  ;;  %v2061_v60 = vpop.permute.xlu0 %2060 }
 0xb5d   :  { %6930 = vmatprep.mubr.msk.f32.mxu0 %vm101_vm0, %v1919_v38 }
 0xb5e   :  { %6931 = vmatmul.mubr.msk.f32.gmra.mrb[34].mxu0 %vm101_vm0, %v1920_v24 }
 0xb5f   :  { %6945 = vmatprep.mubr.msk.f32.mxu0 %vm387_vm2, %v2053_v21  ;;  %v2059_v8 = vpop.permute.xlu1 %2058 }
 0xb61   :  { %7516 = vmatpush3.bf16.xpose.msk.msra.mxu0 %vm8843_vm3, %v7511_v51 }
 0xb62   :  { %7519 = vmatprep.subr.msk.bf16.mxu0 %vm8843_vm3, %v7517_v45 }
 0xb63   :  { %v2063_v39 = vpop.permute.xlu1 %2062 }
 0xb69   :  { %7522 = vmatpush3.bf16.xpose.msk.msra.mxu0 %vm8843_vm3, %v7517_v45 }
 0xb70   :  { %6946 = vmatmul.mubr.msk.f32.vlgmr.msra.gmra.mrb[36].mxu0 %vm387_vm2, %v2055_v57 }
 0xb71   :  { %6948 = vmatprep.mubr.msk.f32.mxu0 %vm387_vm2, %v2057_v18 }
 0xb74   :  { %6949 = vmatmul.mubr.msk.f32.gmra.mrb[38].mxu0 %vm387_vm2, %v2059_v8 }
 0xb75   :  { %6951 = vmatprep.mubr.msk.f32.mxu0 %vm387_vm2, %v2061_v60 }
 0xb78   :  { %6952 = vmatmul.mubr.msk.f32.gmra.mrb[40].mxu0 %vm387_vm2, %v2063_v39 }
 0xc21   :  { %v9377_v40 = vpop.f32.mrb[30].mxu0 }
 0xc22   :  { %v9379_v29 = vpop.f32.mrb[31].mxu0 }
 0xc29   :  { %v9383_v7 = vpop.f32.mrb[32].mxu0 }
 0xc2a   :  { %v9385_v32 = vpop.f32.mrb[33].mxu0 }
 0xc31   :  { %v9389_v50 = vpop.f32.mrb[34].mxu0 }
 0xc32   :  { %10449 = vst [vmem:[#allocation14_spill] sm:$0xff] %v9389_v50  ;;  %v9391_v47 = vpop.f32.mrb[35].mxu0 }
 0xc33   :  { %10450 = vst [vmem:[#allocation15_spill] sm:$0xff] %v9391_v47 }
 0xc43   :  { %v6947_v51 = vpop.f32.mrb[36].mxu0 }
 0xc44   :  { %v2172_v53 = vadd.f32 %v9284_v0, %v6947_v51  ;;  %v2166_v62 = vpop.f32.mrb[37].mxu0 }
 0xc45   :  { %v2167_v48 = vadd.f32 %v9290_v43, %v2166_v62 }
 0xc46   :  { %v2198_v38 = vsel %vm101_vm0, %v2172_v53, -inf }
 0xc47   :  { %2199 = vmax.xlane.f32.xlu1 %v2198_v38  ;;  %v6950_v63 = vpop.f32.mrb[38].mxu0  ;;  %v2195_v3 = vsel %vm101_vm0, %v2167_v48, -inf }
 0xc48   :  { %v2182_v24 = vadd.f32 %v9298_v6, %v6950_v63  ;;  %v2176_v21 = vpop.f32.mrb[39].mxu0  ;;  %2196 = vmax.xlane.f32.xlu0 %v2195_v3 }
 0xc49   :  { %v2177_v57 = vadd.f32 %v9305_v11, %v2176_v21 }
 0xc4a   :  { %v2204_v45 = vsel %vm101_vm0, %v2182_v24, -inf }
 0xc4b   :  { %v6953_v18 = vpop.f32.mrb[40].mxu0  ;;  %v2201_v62 = vsel %vm101_vm0, %v2177_v57, -inf }
 0xc4c   :  { %v2186_v8 = vpop.f32.mrb[41].mxu0  ;;  %2205 = vmax.xlane.f32.xlu0 %v2204_v45  ;;  %v2192_v39 = vadd.f32 %v9317_v56, %v6953_v18 }
 0xc4d   :  { %v2187_v60 = vadd.f32 %v9311_v55, %v2186_v8 }
 0xc4e   :  { %v2210_v38 = vsel %vm101_vm0, %v2192_v39, -inf }
 0xc4f   :  { %v2207_v51 = vsel %vm101_vm0, %v2187_v60, -inf }
 0xc50   :  { %2208 = vmax.xlane.f32.xlu1 %v2207_v51  ;;  %2202 = vmax.xlane.f32.xlu0 %v2201_v62 }
 0xc54   :  { %2211 = vmax.xlane.f32.xlu0 %v2210_v38 }
 0xc61   :  { %7985 = vrot.lane.b32.xlu1 %v8795_v12, %s8514_s7 }
 0xc65   :  { %7995 = vrot.lane.b32.xlu1 %v8821_v33, %s8514_s7 }
 0xc6a   :  { %7990 = vrot.lane.b32.xlu0 %v8807_v23, %s8514_s7 }
 0xcd4   :  { %v2200_v63 = vpop.xlane.xlu1 %2199 }
 0xcd5   :  { %v2214_v3 = vsub.f32 %v2172_v53, %v2200_v63  ;;  %v2197_v21 = vpop.xlane.xlu0 %2196 }
 0xcd6   :  { %v2213_v45 = vsub.f32 %v2167_v48, %v2197_v21 }
 0xcd7   :  { %v2221_v18 = vmul.f32 1.442695, %v2214_v3 }
 0xcd8   :  { %v2219_v8 = vmul.f32 1.442695, %v2213_v45 }
 0xcd9   :  { %8354 = vpow2.f32 %v2221_v18  ;;  %v2206_v51 = vpop.xlane.xlu0 %2205 }
 0xcda   :  { %8356 = vpow2.f32 %v2219_v8  ;;  %v2216_v62 = vsub.f32 %v2182_v24, %v2206_v51 }
 0xcdc   :  { %v2225_v38 = vmul.f32 1.442695, %v2216_v62 }
 0xcdd   :  { %v2209_v14 = vpop.xlane.xlu1 %2208  ;;  %v2203_v2 = vpop.xlane.xlu0 %2202 }
 0xcde   :  { %8358 = vpow2.f32 %v2225_v38  ;;  %v2215_v30 = vsub.f32 %v2177_v57, %v2203_v2  ;;  %v2217_v34 = vsub.f32 %v2187_v60, %v2209_v14 }
 0xce0   :  { %v2223_v41 = vmul.f32 1.442695, %v2215_v30  ;;  %v2227_v3 = vmul.f32 1.442695, %v2217_v34 }
 0xce1   :  { %v7986_v10 = vpop.permute.xlu1 %7985  ;;  %v2212_v47 = vpop.xlane.xlu0 %2211 }
 0xce2   :  { %v7988_v50 = vunpack.i.h.bf16 %v7986_v10  ;;  %v7987_v25 = vunpack.i.l.bf16 %v7986_v10  ;;  %v2218_v53 = vsub.f32 %v2192_v39, %v2212_v47  ;;  %8360 = vpow2.f32 %v2223_v41 }
 0xce3   :  { %v8355_v63 = vpop.eup %8354 }
 0xce4   :  { %v8357_v48 = vpop.eup %8356  ;;  %v2229_v21 = vmul.f32 1.442695, %v2218_v53  ;;  %v2234_v45 = vsel %vm101_vm0, %v8355_v63, 0.0  ;;  %v7523_v24 = vpack.c.bf16 %v7988_v50, %v7987_v25 }
 0xce5   :  { %v7996_v18 = vpop.permute.xlu1 %7995  ;;  %2235 = vadd.xlane.f32.xlu0 %v2234_v45  ;;  %v7991_v8 = vpop.permute.xlu0 %7990  ;;  %v2231_v2 = vsel %vm101_vm0, %v8357_v48, 0.0 }
 0xce6   :  { %8362 = vpow2.f32 %v2229_v21  ;;  %v7993_v30 = vunpack.i.h.bf16 %v7991_v8  ;;  %7524 = vmatprep.subr.bf16.mxu1 %v7523_v24  ;;  %2232 = vadd.xlane.f32.xlu1 %v2231_v2  ;;  %v7998_v14 = vunpack.i.h.bf16 %v7996_v18  ;;  %v7997_v10 = vunpack.i.l.bf16 %v7996_v18 }
 0xce7   :  { %v7992_v47 = vunpack.i.l.bf16 %v7991_v8  ;;  %7526 = vmatpush3.bf16.msra.mxu1 %v7523_v24  ;;  %8364 = vpow2.f32 %v2227_v3 }
 0xce8   :  { %v8359_v41 = vpop.eup %8358  ;;  %v7531_v25 = vpack.c.bf16 %v7998_v14, %v7997_v10 }
 0xce9   :  { %v2240_v34 = vsel %vm101_vm0, %v8359_v41, 0.0  ;;  %v7527_v57 = vpack.c.bf16 %v7993_v30, %v7992_v47 }
 0xcea   :  { %2241 = vadd.xlane.f32.xlu0 %v2240_v34 }
 0xceb   :  { %7528 = vmatprep.subr.bf16.mxu1 %v7527_v57 }
 0xcec   :  { %7530 = vmatpush3.bf16.msra.mxu1 %v7527_v57  ;;  %v8361_v50 = vpop.eup %8360 }
 0xced   :  { %7532 = vmatprep.subr.bf16.mxu1 %v7531_v25  ;;  %v2237_v60 = vsel %vm101_vm0, %v8361_v50, 0.0 }
 0xcee   :  { %2238 = vadd.xlane.f32.xlu1 %v2237_v60 }
 0xcf0   :  { %v8363_v39 = vpop.eup %8362  ;;  %7534 = vmatpush3.bf16.msra.mxu1 %v7531_v25 }
 0xcf1   :  { %v2246_v51 = vsel %vm101_vm0, %v8363_v39, 0.0  ;;  %v8365_v62 = vpop.eup %8364 }
 0xcf2   :  { %2247 = vadd.xlane.f32.xlu0 %v2246_v51  ;;  %v2243_v38 = vsel %vm101_vm0, %v8365_v62, 0.0 }
 0xcf6   :  { %2244 = vadd.xlane.f32.xlu0 %v2243_v38 }
 0xcff   :  { %8005 = vrot.lane.b32.xlu1 %v8805_v20, %s10410_s0 }
 0xd03   :  { %8010 = vrot.lane.b32.xlu1 %v8819_v31, %s10410_s0 }
 0xd07   :  { %2392 = vrot.lane.b32.xlu1 %v8784_v1, %s10408_s1 }
 0xd0b   :  { %2394 = vrot.lane.b32.xlu1 %v8789_v5, %s10408_s1 }
 0xd0c   :  { %8000 = vrot.lane.b32.xlu0 %v8793_v9, %s10410_s0 }
 0xd0f   :  { %2398 = vrot.lane.b32.xlu1 %v8801_v16, %s10408_s1 }
 0xd10   :  { %2396 = vrot.lane.b32.xlu0 %v8799_v15, %s10408_s1 }
 0xd13   :  { %2402 = vrot.lane.b32.xlu1 %v8813_v27, %s10408_s1 }
 0xd14   :  { %2400 = vrot.lane.b32.xlu0 %v8811_v26, %s10408_s1 }
 0xd72   :  { %v2236_v53 = vpop.xlane.xlu0 %2235 }
 0xd73   :  { %8366 = vrcp.f32 %v2236_v53  ;;  %v2233_v3 = vpop.xlane.xlu1 %2232 }
 0xd74   :  { %8368 = vrcp.f32 %v2233_v3 }
 0xd77   :  { %v2242_v21 = vpop.xlane.xlu0 %2241 }
 0xd78   :  { %8370 = vrcp.f32 %v2242_v21 }
 0xd7b   :  { %v2239_v45 = vpop.xlane.xlu1 %2238 }
 0xd7c   :  { %8372 = vrcp.f32 %v2239_v45 }
 0xd7d   :  { %v8367_v24 = vpop.eup %8366 }
 0xd7e   :  { %v8369_v18 = vpop.eup %8368  ;;  %v2256_v30 = vmul.f32 %v8367_v24, %v8355_v63 }
 0xd7f   :  { %v2248_v8 = vpop.xlane.xlu0 %2247  ;;  %v2255_v2 = vmul.f32 %v8369_v18, %v8357_v48  ;;  %v8006_v10 = vpop.permute.xlu1 %8005 }
 0xd80   :  { %8374 = vrcp.f32 %v2248_v8  ;;  %v8008_v57 = vunpack.i.h.bf16 %v8006_v10  ;;  %v8007_v60 = vunpack.i.l.bf16 %v8006_v10 }
 0xd81   :  { %6966 = vmatprep.mubr.msk.f32.mxu1 %vm101_vm0, %v2255_v2 }
 0xd82   :  { %6967 = vmatmul.mubr.msk.f32.vlgmr.msra.gmra.mrb[42].mxu1 %vm101_vm0, %v2256_v30  ;;  %v8371_v47 = vpop.eup %8370  ;;  %v7541_v63 = vpack.c.bf16 %v8008_v57, %v8007_v60 }
 0xd83   :  { %v2245_v14 = vpop.xlane.xlu0 %2244  ;;  %v2258_v3 = vmul.f32 %v8371_v47, %v8359_v41  ;;  %v8011_v48 = vpop.permute.xlu1 %8010 }
 0xd84   :  { %8376 = vrcp.f32 %v2245_v14  ;;  %v8013_v41 = vunpack.i.h.bf16 %v8011_v48  ;;  %v8012_v18 = vunpack.i.l.bf16 %v8011_v48 }
 0xd86   :  { %v8373_v34 = vpop.eup %8372  ;;  %v7547_v30 = vpack.c.bf16 %v8013_v41, %v8012_v18 }
 0xd87   :  { %v8001_v25 = vpop.permute.xlu0 %8000  ;;  %v2257_v53 = vmul.f32 %v8373_v34, %v8361_v50  ;;  %v2393_v2 = vpop.permute.xlu1 %2392 }
 0xd88   :  { %v8003_v51 = vunpack.i.h.bf16 %v8001_v25  ;;  %v8002_v38 = vunpack.i.l.bf16 %v8001_v25 }
 0xd89   :  { %6969 = vmatprep.mubr.msk.f32.mxu1 %vm101_vm0, %v2257_v53 }
 0xd8a   :  { %v7535_v21 = vpack.c.bf16 %v8003_v51, %v8002_v38  ;;  %6970 = vmatmul.mubr.msk.f32.gmra.mrb[44].mxu1 %vm101_vm0, %v2258_v3  ;;  %v8375_v45 = vpop.eup %8374 }
 0xd8b   :  { %v2260_v8 = vmul.f32 %v8375_v45, %v8363_v39  ;;  %v2397_v14 = vpop.permute.xlu0 %2396 }
 0xd8c   :  { %7537 = vmatprep.subr.msk.bf16.mxu1 %vm8843_vm3, %v7535_v21 }
 0xd8d   :  { %7540 = vmatpush3.bf16.xpose.msk.msra.mxu1 %vm8843_vm3, %v7535_v21 }
 0xd8e   :  { %v8377_v24 = vpop.eup %8376  ;;  %7543 = vmatprep.subr.msk.bf16.mxu1 %vm8843_vm3, %v7541_v63 }
 0xd8f   :  { %v2259_v50 = vmul.f32 %v8377_v24, %v8365_v62  ;;  %v2395_v62 = vpop.permute.xlu1 %2394  ;;  %v2401_v10 = vpop.permute.xlu0 %2400 }
 0xd91   :  { %6972 = vmatprep.mubr.msk.f32.mxu1 %vm101_vm0, %v2259_v50 }
 0xd92   :  { %6973 = vmatmul.mubr.msk.f32.gmra.mrb[46].mxu1 %vm101_vm0, %v2260_v8 }
 0xd93   :  { %6987 = vmatprep.mubr.msk.f32.mxu1 %vm387_vm2, %v2393_v2  ;;  %v2399_v39 = vpop.permute.xlu1 %2398 }
 0xd95   :  { %7546 = vmatpush3.bf16.xpose.msk.msra.mxu1 %vm8843_vm3, %v7541_v63 }
 0xd96   :  { %7549 = vmatprep.subr.msk.bf16.mxu1 %vm8843_vm3, %v7547_v30 }
 0xd97   :  { %v2403_v47 = vpop.permute.xlu1 %2402 }
 0xd9d   :  { %7552 = vmatpush3.bf16.xpose.msk.msra.mxu1 %vm8843_vm3, %v7547_v30 }
 0xda4   :  { %6988 = vmatmul.mubr.msk.f32.vlgmr.msra.gmra.mrb[48].mxu1 %vm387_vm2, %v2395_v62 }
 0xda5   :  { %6990 = vmatprep.mubr.msk.f32.mxu1 %vm387_vm2, %v2397_v14 }
 0xda8   :  { %6991 = vmatmul.mubr.msk.f32.gmra.mrb[50].mxu1 %vm387_vm2, %v2399_v39 }
 0xda9   :  { %6993 = vmatprep.mubr.msk.f32.mxu1 %vm387_vm2, %v2401_v10 }
 0xdac   :  { %6994 = vmatmul.mubr.msk.f32.gmra.mrb[52].mxu1 %vm387_vm2, %v2403_v47 }
 0xe55   :  { %v9461_v34 = vpop.f32.mrb[42].mxu1 }
 0xe56   :  { %v9463_v57 = vpop.f32.mrb[43].mxu1 }
 0xe5d   :  { %v9467_v60 = vpop.f32.mrb[44].mxu1 }
 0xe5e   :  { %v9469_v51 = vpop.f32.mrb[45].mxu1 }
 0xe65   :  { %v9473_v53 = vpop.f32.mrb[46].mxu1 }
 0xe66   :  { %10451 = vst [vmem:[#allocation16_spill] sm:$0xff] %v9473_v53  ;;  %v9475_v3 = vpop.f32.mrb[47].mxu1 }
 0xe67   :  { %10452 = vst [vmem:[#allocation17_spill] sm:$0xff] %v9475_v3 }
 0xe77   :  { %v6989_v63 = vpop.f32.mrb[48].mxu1 }
 0xe78   :  { %v2512_v48 = vadd.f32 %v9284_v0, %v6989_v63  ;;  %v2506_v45 = vpop.f32.mrb[49].mxu1 }
 0xe79   :  { %v2507_v24 = vadd.f32 %v9290_v43, %v2506_v45 }
 0xe7a   :  { %v2538_v50 = vsel %vm101_vm0, %v2512_v48, -inf }
 0xe7b   :  { %2539 = vmax.xlane.f32.xlu1 %v2538_v50  ;;  %v6992_v41 = vpop.f32.mrb[50].mxu1  ;;  %v2535_v18 = vsel %vm101_vm0, %v2507_v24, -inf }
 0xe7c   :  { %v2522_v8 = vadd.f32 %v9298_v6, %v6992_v41  ;;  %v2516_v2 = vpop.f32.mrb[51].mxu1  ;;  %2536 = vmax.xlane.f32.xlu0 %v2535_v18 }
 0xe7d   :  { %v2517_v62 = vadd.f32 %v9305_v11, %v2516_v2 }
 0xe7e   :  { %v2544_v30 = vsel %vm101_vm0, %v2522_v8, -inf }
 0xe7f   :  { %v6995_v14 = vpop.f32.mrb[52].mxu1  ;;  %v2541_v45 = vsel %vm101_vm0, %v2517_v62, -inf }
 0xe80   :  { %v2526_v39 = vpop.f32.mrb[53].mxu1  ;;  %2545 = vmax.xlane.f32.xlu0 %v2544_v30  ;;  %v2532_v47 = vadd.f32 %v9317_v56, %v6995_v14 }
 0xe81   :  { %v2527_v10 = vadd.f32 %v9311_v55, %v2526_v39 }
 0xe82   :  { %v2550_v6 = vsel %vm101_vm0, %v2532_v47, -inf }
 0xe83   :  { %v2547_v63 = vsel %vm101_vm0, %v2527_v10, -inf }
 0xe84   :  { %2548 = vmax.xlane.f32.xlu1 %v2547_v63  ;;  %2542 = vmax.xlane.f32.xlu0 %v2541_v45 }
 0xe88   :  { %2551 = vmax.xlane.f32.xlu0 %v2550_v6 }
 0xe95   :  { %8015 = vrot.lane.b32.xlu1 %v8795_v12, %s10408_s1 }
 0xe99   :  { %8025 = vrot.lane.b32.xlu1 %v8821_v33, %s10408_s1 }
 0xe9e   :  { %8020 = vrot.lane.b32.xlu0 %v8807_v23, %s10408_s1  ;;  %s10487_s1 = sld [smem:[#allocation28_spill]] }
 0xf08   :  { %v2540_v50 = vpop.xlane.xlu1 %2539 }
 0xf09   :  { %v2554_v41 = vsub.f32 %v2512_v48, %v2540_v50  ;;  %v2537_v18 = vpop.xlane.xlu0 %2536 }
 0xf0a   :  { %v2553_v2 = vsub.f32 %v2507_v24, %v2537_v18 }
 0xf0b   :  { %v2561_v30 = vmul.f32 1.442695, %v2554_v41 }
 0xf0c   :  { %v2559_v14 = vmul.f32 1.442695, %v2553_v2 }
 0xf0d   :  { %8378 = vpow2.f32 %v2561_v30  ;;  %v2546_v39 = vpop.xlane.xlu0 %2545 }
 0xf0e   :  { %8380 = vpow2.f32 %v2559_v14  ;;  %v2556_v63 = vsub.f32 %v2522_v8, %v2546_v39 }
 0xf10   :  { %v2565_v45 = vmul.f32 1.442695, %v2556_v63 }
 0xf11   :  { %v2549_v6 = vpop.xlane.xlu1 %2548  ;;  %v2543_v21 = vpop.xlane.xlu0 %2542 }
 0xf12   :  { %8382 = vpow2.f32 %v2565_v45  ;;  %v2555_v38 = vsub.f32 %v2517_v62, %v2543_v21  ;;  %v2557_v25 = vsub.f32 %v2527_v10, %v2549_v6 }
 0xf14   :  { %v2563_v52 = vmul.f32 1.442695, %v2555_v38  ;;  %v2567_v41 = vmul.f32 1.442695, %v2557_v25 }
 0xf15   :  { %v8016_v3 = vpop.permute.xlu1 %8015  ;;  %v2552_v53 = vpop.xlane.xlu0 %2551 }
 0xf16   :  { %v8018_v19 = vunpack.i.h.bf16 %v8016_v3  ;;  %v8017_v28 = vunpack.i.l.bf16 %v8016_v3  ;;  %v2558_v48 = vsub.f32 %v2532_v47, %v2552_v53  ;;  %8384 = vpow2.f32 %v2563_v52 }
 0xf17   :  { %v8379_v50 = vpop.eup %8378 }
 0xf18   :  { %v8381_v24 = vpop.eup %8380  ;;  %v2569_v18 = vmul.f32 1.442695, %v2558_v48  ;;  %v2574_v2 = vsel %vm101_vm0, %v8379_v50, 0.0  ;;  %v7553_v8 = vpack.c.bf16 %v8018_v19, %v8017_v28 }
 0xf19   :  { %v8026_v30 = vpop.permute.xlu1 %8025  ;;  %2575 = vadd.xlane.f32.xlu0 %v2574_v2  ;;  %v8021_v14 = vpop.permute.xlu0 %8020  ;;  %v2571_v21 = vsel %vm101_vm0, %v8381_v24, 0.0 }
 0xf1a   :  { %8386 = vpow2.f32 %v2569_v18  ;;  %v8023_v38 = vunpack.i.h.bf16 %v8021_v14  ;;  %7554 = vmatprep.subr.bf16.mxu0 %v7553_v8  ;;  %2572 = vadd.xlane.f32.xlu1 %v2571_v21  ;;  %v8028_v62 = vunpack.i.h.bf16 %v8026_v30  ;;  %v8027_v3 = vunpack.i.l.bf16 %v8026_v30 }
 0xf1b   :  { %v8022_v53 = vunpack.i.l.bf16 %v8021_v14  ;;  %7556 = vmatpush3.bf16.msra.mxu0 %v7553_v8  ;;  %8388 = vpow2.f32 %v2567_v41 }
 0xf1c   :  { %v8383_v52 = vpop.eup %8382  ;;  %v7561_v28 = vpack.c.bf16 %v8028_v62, %v8027_v3 }
 0xf1d   :  { %v2580_v25 = vsel %vm101_vm0, %v8383_v52, 0.0  ;;  %v7557_v10 = vpack.c.bf16 %v8023_v38, %v8022_v53 }
 0xf1e   :  { %2581 = vadd.xlane.f32.xlu0 %v2580_v25 }
 0xf1f   :  { %7558 = vmatprep.subr.bf16.mxu0 %v7557_v10 }
 0xf20   :  { %7560 = vmatpush3.bf16.msra.mxu0 %v7557_v10  ;;  %v8385_v19 = vpop.eup %8384 }
 0xf21   :  { %7562 = vmatprep.subr.bf16.mxu0 %v7561_v28  ;;  %v2577_v47 = vsel %vm101_vm0, %v8385_v19, 0.0 }
 0xf22   :  { %2578 = vadd.xlane.f32.xlu1 %v2577_v47 }
 0xf24   :  { %v8387_v39 = vpop.eup %8386  ;;  %7564 = vmatpush3.bf16.msra.mxu0 %v7561_v28 }
 0xf25   :  { %v2586_v63 = vsel %vm101_vm0, %v8387_v39, 0.0  ;;  %v8389_v45 = vpop.eup %8388 }
 0xf26   :  { %2587 = vadd.xlane.f32.xlu0 %v2586_v63  ;;  %v2583_v6 = vsel %vm101_vm0, %v8389_v45, 0.0 }
 0xf2a   :  { %2584 = vadd.xlane.f32.xlu0 %v2583_v6 }
 0xf33   :  { %8035 = vrot.lane.b32.xlu1 %v8805_v20, %s8517_s28 }
 0xf37   :  { %8040 = vrot.lane.b32.xlu1 %v8819_v31, %s8517_s28 }
 0xf3b   :  { %2732 = vrot.lane.b32.xlu1 %v8784_v1, %s8518_s4 }
 0xf3f   :  { %2734 = vrot.lane.b32.xlu1 %v8789_v5, %s8518_s4 }
 0xf40   :  { %8030 = vrot.lane.b32.xlu0 %v8793_v9, %s8517_s28 }
 0xf43   :  { %2738 = vrot.lane.b32.xlu1 %v8801_v16, %s8518_s4 }
 0xf44   :  { %2736 = vrot.lane.b32.xlu0 %v8799_v15, %s8518_s4 }
 0xf47   :  { %2742 = vrot.lane.b32.xlu1 %v8813_v27, %s8518_s4 }
 0xf48   :  { %2740 = vrot.lane.b32.xlu0 %v8811_v26, %s8518_s4 }
 0xfa6   :  { %v2576_v20 = vpop.xlane.xlu0 %2575 }
 0xfa7   :  { %8390 = vrcp.f32 %v2576_v20  ;;  %v2573_v1 = vpop.xlane.xlu1 %2572 }
 0xfa8   :  { %8392 = vrcp.f32 %v2573_v1 }
 0xfab   :  { %v2582_v5 = vpop.xlane.xlu0 %2581 }
 0xfac   :  { %8394 = vrcp.f32 %v2582_v5 }
 0xfaf   :  { %v2579_v31 = vpop.xlane.xlu1 %2578 }
 0xfb0   :  { %8396 = vrcp.f32 %v2579_v31 }
 0xfb1   :  { %v8391_v9 = vpop.eup %8390 }
 0xfb2   :  { %v8393_v48 = vpop.eup %8392  ;;  %v2596_v18 = vmul.f32 %v8391_v9, %v8379_v50 }
 0xfb3   :  { %v2588_v16 = vpop.xlane.xlu0 %2587  ;;  %v2595_v41 = vmul.f32 %v8393_v48, %v8381_v24  ;;  %v8036_v26 = vpop.permute.xlu1 %8035 }
 0xfb4   :  { %8398 = vrcp.f32 %v2588_v16  ;;  %v8038_v8 = vunpack.i.h.bf16 %v8036_v26  ;;  %v8037_v14 = vunpack.i.l.bf16 %v8036_v26 }
 0xfb5   :  { %7008 = vmatprep.mubr.msk.f32.mxu0 %vm101_vm0, %v2595_v41 }
 0xfb6   :  { %7009 = vmatmul.mubr.msk.f32.vlgmr.msra.gmra.mrb[42].mxu0 %vm101_vm0, %v2596_v18  ;;  %v8395_v27 = vpop.eup %8394  ;;  %v7571_v50 = vpack.c.bf16 %v8038_v8, %v8037_v14 }
 0xfb7   :  { %v2585_v15 = vpop.xlane.xlu0 %2584  ;;  %v2598_v3 = vmul.f32 %v8395_v27, %v8383_v52  ;;  %v8041_v24 = vpop.permute.xlu1 %8040 }
 0xfb8   :  { %8400 = vrcp.f32 %v2585_v15  ;;  %v8043_v52 = vunpack.i.h.bf16 %v8041_v24 }
 0xfba   :  { %v8397_v2 = vpop.eup %8396 }
 0xfbb   :  { %v8031_v30 = vpop.permute.xlu0 %8030  ;;  %v2597_v62 = vmul.f32 %v8397_v2, %v8385_v19  ;;  %v8042_v19 = vunpack.i.l.bf16 %v8041_v24  ;;  %v2733_v63 = vpop.permute.xlu1 %2732 }
 0xfbc   :  { %v8033_v21 = vunpack.i.h.bf16 %v8031_v30  ;;  %v8032_v38 = vunpack.i.l.bf16 %v8031_v30 }
 0xfbd   :  { %7011 = vmatprep.mubr.msk.f32.mxu0 %vm101_vm0, %v2597_v62  ;;  %v7577_v6 = vpack.c.bf16 %v8043_v52, %v8042_v19 }
 0xfbe   :  { %v7565_v53 = vpack.c.bf16 %v8033_v21, %v8032_v38  ;;  %7012 = vmatmul.mubr.msk.f32.gmra.mrb[44].mxu0 %vm101_vm0, %v2598_v3  ;;  %v8399_v25 = vpop.eup %8398 }
 0xfbf   :  { %v2600_v47 = vmul.f32 %v8399_v25, %v8387_v39  ;;  %v2737_v20 = vpop.permute.xlu0 %2736 }
 0xfc0   :  { %7567 = vmatprep.subr.msk.bf16.mxu0 %vm8843_vm3, %v7565_v53 }
 0xfc1   :  { %7570 = vmatpush3.bf16.xpose.msk.msra.mxu0 %vm8843_vm3, %v7565_v53  ;;  %v8502_v53 = vld [vmem:[%s10438_s30 + $0x18] sm:$0xff]  ;;  %s10484_s30 = sld [smem:[#allocation25_spill]] }
 0xfc2   :  { %v8401_v10 = vpop.eup %8400  ;;  %7573 = vmatprep.subr.msk.bf16.mxu0 %vm8843_vm3, %v7571_v50 }
 0xfc3   :  { %v2599_v28 = vmul.f32 %v8401_v10, %v8389_v45  ;;  %v2735_v45 = vpop.permute.xlu1 %2734  ;;  %v2741_v1 = vpop.permute.xlu0 %2740 }
 0xfc5   :  { %7014 = vmatprep.mubr.msk.f32.mxu0 %vm101_vm0, %v2599_v28 }
 0xfc6   :  { %7015 = vmatmul.mubr.msk.f32.gmra.mrb[46].mxu0 %vm101_vm0, %v2600_v47 }
 0xfc7   :  { %7029 = vmatprep.mubr.msk.f32.mxu0 %vm387_vm2, %v2733_v63  ;;  %v2739_v39 = vpop.permute.xlu1 %2738 }
 0xfc9   :  { %7576 = vmatpush3.bf16.xpose.msk.msra.mxu0 %vm8843_vm3, %v7571_v50 }
 0xfca   :  { %7579 = vmatprep.subr.msk.bf16.mxu0 %vm8843_vm3, %v7577_v6 }
 0xfcb   :  { %v2743_v5 = vpop.permute.xlu1 %2742 }
 0xfd1   :  { %7582 = vmatpush3.bf16.xpose.msk.msra.mxu0 %vm8843_vm3, %v7577_v6 }
 0xfd8   :  { %7030 = vmatmul.mubr.msk.f32.vlgmr.msra.gmra.mrb[48].mxu0 %vm387_vm2, %v2735_v45 }
 0xfd9   :  { %7032 = vmatprep.mubr.msk.f32.mxu0 %vm387_vm2, %v2737_v20 }
 0xfdc   :  { %7033 = vmatmul.mubr.msk.f32.gmra.mrb[50].mxu0 %vm387_vm2, %v2739_v39 }
 0xfdd   :  { %7035 = vmatprep.mubr.msk.f32.mxu0 %vm387_vm2, %v2741_v1 }
 0xfe0   :  { %7036 = vmatmul.mubr.msk.f32.gmra.mrb[52].mxu0 %vm387_vm2, %v2743_v5 }
0x1089   :  { %v9545_v31 = vpop.f32.mrb[42].mxu0 }
0x108a   :  { %v9547_v9 = vpop.f32.mrb[43].mxu0 }
0x108b   :  { %v8094_v37 = vpack.i.bf16 %v9545_v31, %v9547_v9 }
0x1091   :  { %v9551_v48 = vpop.f32.mrb[44].mxu0 }
0x1092   :  { %v9553_v16 = vpop.f32.mrb[45].mxu0 }
0x1093   :  { %v8124_v41 = vpack.i.bf16 %v9551_v48, %v9553_v16 }
0x1099   :  { %v9557_v18 = vpop.f32.mrb[46].mxu0 }
0x109a   :  { %v9559_v15 = vpop.f32.mrb[47].mxu0 }
0x109b   :  { %v8149_v26 = vpack.i.bf16 %v9557_v18, %v9559_v15 }
0x10ab   :  { %v7031_v27 = vpop.f32.mrb[48].mxu0 }
0x10ac   :  { %v2852_v2 = vadd.f32 %v9284_v0, %v7031_v27  ;;  %v2846_v8 = vpop.f32.mrb[49].mxu0 }
0x10ad   :  { %v2847_v30 = vadd.f32 %v9290_v43, %v2846_v8 }
0x10ae   :  { %v2878_v14 = vsel %vm101_vm0, %v2852_v2, -inf }
0x10af   :  { %2879 = vmax.xlane.f32.xlu1 %v2878_v14  ;;  %v7034_v21 = vpop.f32.mrb[50].mxu0  ;;  %v2875_v38 = vsel %vm101_vm0, %v2847_v30, -inf }
0x10b0   :  { %v2856_v62 = vpop.f32.mrb[51].mxu0  ;;  %2876 = vmax.xlane.f32.xlu0 %v2875_v38  ;;  %v2862_v50 = vadd.f32 %v8502_v53, %v7034_v21 }
0x10b1   :  { %v2857_v3 = vadd.f32 %v9305_v11, %v2856_v62 }
0x10b2   :  { %v2884_v52 = vsel %vm101_vm0, %v2862_v50, -inf }
0x10b3   :  { %v7037_v24 = vpop.f32.mrb[52].mxu0  ;;  %v2881_v0 = vsel %vm101_vm0, %v2857_v3, -inf }
0x10b4   :  { %v2866_v25 = vpop.f32.mrb[53].mxu0  ;;  %2882 = vmax.xlane.f32.xlu0 %v2881_v0  ;;  %v2872_v10 = vadd.f32 %v9317_v56, %v7037_v24 }
0x10b5   :  { %v2867_v43 = vadd.f32 %v9311_v55, %v2866_v25 }
0x10b6   :  { %v2890_v11 = vsel %vm101_vm0, %v2872_v10, -inf }
0x10b7   :  { %v2887_v28 = vsel %vm101_vm0, %v2867_v43, -inf }
0x10b8   :  { %2888 = vmax.xlane.f32.xlu1 %v2887_v28  ;;  %2885 = vmax.xlane.f32.xlu0 %v2884_v52 }
0x10bc   :  { %2891 = vmax.xlane.f32.xlu0 %v2890_v11 }
0x10c9   :  { %8045 = vrot.lane.b32.xlu1 %v8795_v12, %s8518_s4 }
0x113c   :  { %v2880_v19 = vpop.xlane.xlu1 %2879 }
0x113d   :  { %v2894_v47 = vsub.f32 %v2852_v2, %v2880_v19  ;;  %v2877_v63 = vpop.xlane.xlu0 %2876 }
0x113e   :  { %v2893_v6 = vsub.f32 %v2847_v30, %v2877_v63 }
0x113f   :  { %v2901_v45 = vmul.f32 1.442695, %v2894_v47 }
0x1140   :  { %v2899_v55 = vmul.f32 1.442695, %v2893_v6  ;;  %v10453_v6 = vpack.i.bf16 %v9095_v4, %v9097_v13  ;;  %v10457_v4 = vpack.i.bf16 %v9185_v49, %v9187_v46  ;;  %v10458_v13 = vpack.i.bf16 %v9377_v40, %v9379_v29  ;;  %v10464_v49 = vld [vmem:[#allocation10_spill] sm:$0xff]  ;;  %v10465_v46 = vld [vmem:[#allocation11_spill] sm:$0xff]  ;;  %v10470_v40 = vld [vmem:[#allocation12_spill] sm:$0xff] }
0x1141   :  { %8402 = vpow2.f32 %v2901_v45  ;;  %v2883_v56 = vpop.xlane.xlu0 %2882  ;;  %v10454_v45 = vpack.i.bf16 %v9263_v58, %v9265_v61  ;;  %v10466_v58 = vpack.i.bf16 %v10464_v49, %v10465_v46  ;;  %v10467_v61 = vld [vmem:[#allocation16_spill] sm:$0xff]  ;;  %v10471_v29 = vld [vmem:[#allocation13_spill] sm:$0xff] }
0x1142   :  { %8404 = vpow2.f32 %v2899_v55  ;;  %v2895_v20 = vsub.f32 %v2857_v3, %v2883_v56  ;;  %v10455_v55 = vpack.i.bf16 %v9101_v44, %v9103_v42  ;;  %v10460_v44 = vpack.i.bf16 %v9461_v34, %v9463_v57 }
0x1143   :  { %v10461_v42 = vpack.i.bf16 %v9383_v7, %v9385_v32 }
0x1144   :  { %v2903_v39 = vmul.f32 1.442695, %v2895_v20 }
0x1145   :  { %v2889_v1 = vpop.xlane.xlu1 %2888  ;;  %v2886_v5 = vpop.xlane.xlu0 %2885 }
0x1146   :  { %8406 = vpow2.f32 %v2903_v39  ;;  %v2897_v27 = vsub.f32 %v2867_v43, %v2889_v1  ;;  %v2896_v8 = vsub.f32 %v2862_v50, %v2886_v5 }
0x1148   :  { %v2907_v14 = vmul.f32 1.442695, %v2897_v27  ;;  %v2905_v21 = vmul.f32 1.442695, %v2896_v8 }
0x1149   :  { %v8046_v38 = vpop.permute.xlu1 %8045  ;;  %v2892_v12 = vpop.xlane.xlu0 %2891 }
0x114a   :  { %8408 = vpow2.f32 %v2907_v14  ;;  %v8048_v2 = vunpack.i.h.bf16 %v8046_v38  ;;  %v8047_v62 = vunpack.i.l.bf16 %v8046_v38  ;;  %v2898_v30 = vsub.f32 %v2872_v10, %v2892_v12 }
0x114b   :  { %v9579_v53 = vpop.eup %8402  ;;  %8410 = vpow2.f32 %v2905_v21 }
0x114c   :  { %v8405_v24 = vpop.eup %8404  ;;  %v2909_v0 = vmul.f32 1.442695, %v2898_v30  ;;  %v2914_v3 = vsel %vm101_vm0, %v9579_v53, 0.0  ;;  %v7583_v25 = vpack.c.bf16 %v8048_v2, %v8047_v62  ;;  %v8519_v30 = vmov 0.0|0.0  }
0x114d   :  { %2915 = vadd.xlane.f32.xlu0 %v2914_v3  ;;  %v2911_v50 = vsel %vm101_vm0, %v8405_v24, 0.0  ;;  %7604 = vmatprep.subr.bf16.mxu0 %v8519_v30 }
0x114e   :  { %8412 = vpow2.f32 %v2909_v0  ;;  %7584 = vmatprep.subr.bf16.mxu1 %v7583_v25  ;;  %2912 = vadd.xlane.f32.xlu1 %v2911_v50 }
0x114f   :  { %7586 = vmatpush3.bf16.msra.mxu1 %v7583_v25 }
0x1150   :  { %v8407_v43 = vpop.eup %8406 }
0x1151   :  { %v2917_v28 = vsel %vm101_vm0, %v8407_v43, 0.0 }
0x1152   :  { %2918 = vadd.xlane.f32.xlu1 %v2917_v28  ;;  %v10474_v28 = vld [vmem:[#allocation14_spill] sm:$0xff] }
0x1154   :  { %v9585_v10 = vpop.eup %8408 }
0x1155   :  { %v8411_v52 = vpop.eup %8410  ;;  %v2923_v11 = vsel %vm101_vm0, %v9585_v10, 0.0 }
0x1156   :  { %2924 = vadd.xlane.f32.xlu1 %v2923_v11  ;;  %v2920_v19 = vsel %vm101_vm0, %v8411_v52, 0.0 }
0x1157   :  { %2921 = vadd.xlane.f32.xlu0 %v2920_v19 }
0x1158   :  { %v8413_v47 = vpop.eup %8412 }
0x1159   :  { %v2926_v63 = vsel %vm101_vm0, %v8413_v47, 0.0 }
0x115b   :  { %2927 = vadd.xlane.f32.xlu0 %v2926_v63 }
0x1167   :  { %8055 = vrot.lane.b32.xlu1 %v8821_v33, %s8518_s4  ;;  %v10456_v33 = vpack.i.bf16 %v9179_v22, %v9181_v59  ;;  %v10462_v22 = vpack.i.bf16 %v9467_v60, %v9469_v51  ;;  %v10463_v59 = vpack.i.bf16 %v9107_v36, %v9109_v54  ;;  %v10472_v36 = vpack.i.bf16 %v10470_v40, %v10471_v29 }
0x116b   :  { %8060 = vrot.lane.b32.xlu1 %v10453_v6, %s8517_s28 }
0x116f   :  { %8070 = vrot.lane.b32.xlu1 %v10454_v45, %s8513_s8 }
0x1171   :  { %8050 = vrot.lane.b32.xlu0 %v8807_v23, %s8518_s4  ;;  %v10459_v23 = vpack.i.bf16 %v9269_v35, %v9271_v17  ;;  %v10468_v35 = vld [vmem:[#allocation17_spill] sm:$0xff]  ;;  %s10485_s4 = sld [smem:[#allocation26_spill]] }
0x1172   :  { %v10469_v17 = vpack.i.bf16 %v10467_v61, %v10468_v35 }
0x1173   :  { %8080 = vrot.lane.b32.xlu1 %v10455_v55, %s8517_s28 }
0x1175   :  { %8065 = vrot.lane.b32.xlu0 %v10456_v33, %s10410_s0 }
0x1177   :  { %8090 = vrot.lane.b32.xlu1 %v10457_v4, %s10410_s0 }
0x1179   :  { %8075 = vrot.lane.b32.xlu0 %v10458_v13, %s10416_s11 }
0x117b   :  { %8100 = vrot.lane.b32.xlu1 %v10459_v23, %s8513_s8 }
0x117d   :  { %8085 = vrot.lane.b32.xlu0 %v10460_v44, %s8509_s3 }
0x117f   :  { %8105 = vrot.lane.b32.xlu1 %v10461_v42, %s10416_s11 }
0x1181   :  { %8095 = vrot.lane.b32.xlu0 %v8094_v37, %s10412_s14 }
0x1183   :  { %8115 = vrot.lane.b32.xlu1 %v10462_v22, %s8509_s3 }
0x1185   :  { %8110 = vrot.lane.b32.xlu0 %v10463_v59, %s8517_s28  ;;  %s10495_s28 = smov 16  }
0x1187   :  { %8125 = vrot.lane.b32.xlu1 %v8124_v41, %s10412_s14 }
0x1189   :  { %8120 = vrot.lane.b32.xlu0 %v10466_v58, %s10410_s0 }
0x118b   :  { %8145 = vrot.lane.b32.xlu1 %v10469_v17, %s8509_s3  ;;  %s10486_s3 = sld [smem:[#allocation27_spill]] }
0x118d   :  { %8130 = vrot.lane.b32.xlu0 %v10472_v36, %s8513_s8  ;;  %s10477_s8 = sld [smem:[#allocation24_spill]] }
0x1193   :  { %v3362_v63 = vld [vmem:[%s10477_s8 + $0x8] sm:$0xff]  ;;  %v3363_v55 = vld [vmem:[%s10477_s8 + $0x10] sm:$0xff]  ;;  %v3364_v33 = vld [vmem:[%s10477_s8 + $0x18] sm:$0xff] }
0x1194   :  { %v7608_v4 = vpack.c.bf16 %v3364_v33, %v3363_v55  ;;  %v3365_v13 = vld [vmem:[%s10477_s8 + $0x20] sm:$0xff]  ;;  %v3366_v23 = vld [vmem:[%s10477_s8 + $0x28] sm:$0xff]  ;;  %v3367_v18 = vld [vmem:[%s10477_s8 + $0x30] sm:$0xff] }
0x1195   :  { %v7611_v44 = vpack.c.bf16 %v3366_v23, %v3365_v13  ;;  %v3368_v15 = vld [vmem:[%s10477_s8 + $0x38] sm:$0xff] }
0x11da   :  { %v2916_v32 = vpop.xlane.xlu0 %2915 }
0x11db   :  { %v2913_v54 = vpop.xlane.xlu1 %2912 }
0x11dc   :  { %8414 = vrcp.f32 %v2913_v54 }
0x11dd   :  { %8416 = vrcp.f32 %v2916_v32 }
0x11df   :  { %v2919_v7 = vpop.xlane.xlu1 %2918 }
0x11e0   :  { %8418 = vrcp.f32 %v2919_v7 }
0x11e3   :  { %v2925_v34 = vpop.xlane.xlu1 %2924 }
0x11e4   :  { %v2922_v57 = vpop.xlane.xlu0 %2921 }
0x11e5   :  { %8420 = vrcp.f32 %v2922_v57  ;;  %v10478_v57 = vld [vmem:[#allocation5_spill] sm:$0xff] }
0x11e6   :  { %v8415_v60 = vpop.eup %8414  ;;  %8422 = vrcp.f32 %v2925_v34 }
0x11e7   :  { %v2935_v51 = vmul.f32 %v8415_v60, %v8405_v24  ;;  %v8056_v9 = vpop.permute.xlu1 %8055  ;;  %v8417_v1 = vpop.eup %8416 }
0x11e8   :  { %v2928_v31 = vpop.xlane.xlu0 %2927  ;;  %v8058_v48 = vunpack.i.h.bf16 %v8056_v9  ;;  %v8057_v16 = vunpack.i.l.bf16 %v8056_v9  ;;  %v2936_v27 = vmul.f32 %v8417_v1, %v9579_v53 }
0x11e9   :  { %7050 = vmatprep.mubr.msk.f32.mxu1 %vm101_vm0, %v2935_v51  ;;  %8424 = vrcp.f32 %v2928_v31  ;;  %v10479_v31 = vld [vmem:[#allocation4_spill] sm:$0xff] }
0x11ea   :  { %v7591_v39 = vpack.c.bf16 %v8058_v48, %v8057_v16  ;;  %v8419_v5 = vpop.eup %8418 }
0x11eb   :  { %v2937_v14 = vmul.f32 %v8419_v5, %v8407_v43  ;;  %v10473_v43 = vmov 0.0   ;;  %v8061_v42 = vpop.permute.xlu1 %8060 }
0x11ec   :  { %v8051_v37 = vpop.permute.xlu0 %8050  ;;  %7090 = vmatprep.mubr.msk.f32.mxu0 %vm8520_vm4, %v10473_v43  ;;  %v8062_v36 = vunpack.i.l.bf16 %v8061_v42  ;;  %v8063_v54 = vunpack.i.h.bf16 %v8061_v42 }
0x11ed   :  { %v8053_v41 = vunpack.i.h.bf16 %v8051_v37  ;;  %v8052_v56 = vunpack.i.l.bf16 %v8051_v37 }
0x11ee   :  { %v3240_v60 = vsel %vm387_vm2, %v10478_v57, %v8062_v36  ;;  %v3241_v9 = vsel %vm387_vm2, %v10479_v31, %v8063_v54 }
0x11ef   :  { %v7587_v20 = vpack.c.bf16 %v8053_v41, %v8052_v56  ;;  %v8421_v8 = vpop.eup %8420  ;;  %v8071_v22 = vpop.permute.xlu1 %8070 }
0x11f0   :  { %v8423_v21 = vpop.eup %8422  ;;  %v2938_v38 = vmul.f32 %v8421_v8, %v8411_v52  ;;  %v8066_v59 = vpop.permute.xlu0 %8065  ;;  %v8072_v51 = vunpack.i.l.bf16 %v8071_v22  ;;  %v8073_v16 = vunpack.i.h.bf16 %v8071_v22 }
0x11f1   :  { %7588 = vmatprep.subr.bf16.mxu1 %v7587_v20  ;;  %v2939_v2 = vmul.f32 %v8423_v21, %v9585_v10  ;;  %v10475_v10 = vld [vmem:[#allocation15_spill] sm:$0xff]  ;;  %v8067_v7 = vunpack.i.l.bf16 %v8066_v59  ;;  %v8068_v32 = vunpack.i.h.bf16 %v8066_v59 }
0x11f2   :  { %7590 = vmatpush3.bf16.msra.mxu1 %v7587_v20  ;;  %v10476_v52 = vpack.i.bf16 %v10474_v28, %v10475_v10 }
0x11f3   :  { %7592 = vmatprep.subr.bf16.mxu1 %v7591_v39  ;;  %v8425_v12 = vpop.eup %8424  ;;  %v8081_v49 = vpop.permute.xlu1 %8080  ;;  %v3247_v37 = vsel %vm3246_vm5, %v3240_v60, %v8067_v7  ;;  %v3248_v41 = vsel %vm3246_vm5, %v3241_v9, %v8068_v32  ;;  %v10483_v7 = vld [vmem:[#allocation9_spill] sm:$0xff] }
0x11f4   :  { %v2940_v62 = vmul.f32 %v8425_v12, %v8413_v47  ;;  %v3361_v47 = vld [vmem:[%s10477_s8] sm:$0xff]  ;;  %v8076_v46 = vpop.permute.xlu0 %8075  ;;  %v8082_v56 = vunpack.i.l.bf16 %v8081_v49  ;;  %v8083_v20 = vunpack.i.h.bf16 %v8081_v49 }
0x11f5   :  { %v7605_v45 = vpack.c.bf16 %v3362_v63, %v3361_v47  ;;  %v8077_v1 = vunpack.i.l.bf16 %v8076_v46 }
0x11f6   :  { %7594 = vmatpush3.bf16.msra.mxu1 %v7591_v39  ;;  %v8078_v39 = vunpack.i.h.bf16 %v8076_v46 }
0x11f7   :  { %7595 = vmatprep.subr.bf16.mxu1 %v8519_v30  ;;  %7606 = vmatpush3.bf16.msra.mxu0 %v7605_v45  ;;  %v8091_v58 = vpop.permute.xlu1 %8090 }
0x11f8   :  { %7607 = vmatprep.subr.bf16.mxu0 %v8519_v30  ;;  %v8086_v61 = vpop.permute.xlu0 %8085  ;;  %v8092_v5 = vunpack.i.l.bf16 %v8091_v58  ;;  %v8093_v8 = vunpack.i.h.bf16 %v8091_v58  ;;  %v10482_v58 = vld [vmem:[#allocation8_spill] sm:$0xff] }
0x11f9   :  { %7051 = vmatmul.mubr.msk.f32.vlgmr.msra.gmra.mrb[54].mxu1 %vm101_vm0, %v2936_v27  ;;  %v3254_v27 = vsel %vm3253_vm6, %v3247_v37, %v8072_v51  ;;  %v8088_v21 = vunpack.i.h.bf16 %v8086_v61 }
0x11fa   :  { %7053 = vmatprep.mubr.msk.f32.mxu1 %vm101_vm0, %v2937_v14  ;;  %v8087_v14 = vunpack.i.l.bf16 %v8086_v61  ;;  %v3261_v10 = vsel %vm3260_vm7, %v3254_v27, %v8077_v1 }
0x11fb   :  { %7609 = vmatpush3.bf16.msra.mxu0 %v7608_v4  ;;  %v8101_v35 = vpop.permute.xlu1 %8100 }
0x11fc   :  { %7610 = vmatprep.subr.bf16.mxu0 %v8519_v30  ;;  %v8096_v17 = vpop.permute.xlu0 %8095  ;;  %v8102_v12 = vunpack.i.l.bf16 %v8101_v35  ;;  %v3268_v63 = vsel %vm3267_vm8, %v3261_v10, %v8087_v14 }
0x11fd   :  { %7054 = vmatmul.mubr.msk.f32.gmra.mrb[56].mxu1 %vm101_vm0, %v2938_v38  ;;  %v8103_v38 = vunpack.i.h.bf16 %v8101_v35 }
0x11fe   :  { %7056 = vmatprep.mubr.msk.f32.mxu1 %vm101_vm0, %v2939_v2  ;;  %v8097_v2 = vunpack.i.l.bf16 %v8096_v17 }
0x11ff   :  { %7612 = vmatpush3.bf16.msra.mxu0 %v7611_v44  ;;  %v8106_v40 = vpop.permute.xlu1 %8105 }
0x1200   :  { %7613 = vmatprep.subr.bf16.mxu0 %v8519_v30  ;;  %v9712_v29 = vpop.permute.xlu0 %8110  ;;  %v3274_v13 = vsel %vm101_vm0, %v3268_v63, %v8097_v2 }
0x1201   :  { %7057 = vmatmul.mubr.msk.f32.gmra.mrb[58].mxu1 %vm101_vm0, %v2940_v62  ;;  %v8113_v45 = vunpack.i.h.bf16 %v9712_v29 }
0x1202   :  { %7071 = vmatprep.mubr.msk.f32.mxu1 %vm8520_vm4, %v10473_v43 }
0x1203   :  { %v9714_v34 = vpop.permute.xlu1 %8115  ;;  %v3245_v61 = vsel %vm387_vm2, %v10482_v58, %v8113_v45  ;;  %v3287_v45 = vld [vmem:[%s10484_s30] sm:$0x3] }
0x1204   :  { %v8121_v48 = vpop.permute.xlu0 %8120  ;;  %v3636_v58 = vld [vmem:[%s10486_s3] sm:$0xff] }
0x1205   :  { %v8123_v42 = vunpack.i.h.bf16 %v8121_v48  ;;  %v8122_v22 = vunpack.i.l.bf16 %v8121_v48 }
0x1207   :  { %v8126_v62 = vpop.permute.xlu1 %8125  ;;  %v3252_v9 = vsel %vm3246_vm5, %v3245_v61, %v8123_v42  ;;  %v3637_v61 = vld [vmem:[%s10486_s3 + $0x8] sm:$0xff] }
0x1208   :  { %v8127_v36 = vunpack.i.l.bf16 %v8126_v62 }
0x120b   :  { %v8146_v59 = vpop.permute.xlu1 %8145 }
0x120c   :  { %v8148_v2 = vunpack.i.h.bf16 %v8146_v59 }
0x12cc   :  { %v7052_v53 = vpop.f32.mrb[54].mxu1 }
0x12cd   :  { %v3043_v24 = vpop.f32.mrb[55].mxu1 }
0x12ce   :  { %v8134_v0 = vpack.i.bf16 %v7052_v53, %v3043_v24  ;;  %v10480_v53 = vld [vmem:[#allocation7_spill] sm:$0xff] }
0x12cf   :  { %v3242_v24 = vsel %vm387_vm2, %v10480_v53, %v8082_v56 }
0x12d0   :  { %8135 = vrot.lane.b32.xlu0 %v8134_v0, %s8505_s2  ;;  %v7055_v3 = vpop.f32.mrb[56].mxu1  ;;  %v3255_v0 = vsel %vm3253_vm6, %v3248_v41, %v8073_v16 }
0x12d1   :  { %v3053_v25 = vpop.f32.mrb[57].mxu1 }
0x12d2   :  { %v8154_v50 = vpack.i.bf16 %v7055_v3, %v3053_v25  ;;  %v8098_v3 = vunpack.i.h.bf16 %v8096_v17  ;;  %v8107_v25 = vunpack.i.l.bf16 %v8106_v40 }
0x12d4   :  { %8140 = vrot.lane.b32.xlu0 %v10476_v52, %s10416_s11  ;;  %8155 = vrot.lane.b32.xlu1 %v8154_v50, %s8505_s2  ;;  %v7058_v11 = vpop.f32.mrb[58].mxu1  ;;  %v10481_v50 = vld [vmem:[#allocation6_spill] sm:$0xff]  ;;  %v3262_v52 = vsel %vm3260_vm7, %v3255_v0, %v8078_v39 }
0x12d5   :  { %v3063_v19 = vpop.f32.mrb[59].mxu1  ;;  %v3243_v28 = vsel %vm387_vm2, %v10481_v50, %v8083_v20  ;;  %v3269_v55 = vsel %vm3267_vm8, %v3262_v52, %v8088_v21 }
0x12d6   :  { %v8159_v6 = vpack.i.bf16 %v7058_v11, %v3063_v19  ;;  %v3249_v11 = vsel %vm3246_vm5, %v3242_v24, %v8092_v5  ;;  %v8131_v19 = vpop.permute.xlu0 %8130  ;;  %v3250_v47 = vsel %vm3246_vm5, %v3243_v28, %v8093_v8  ;;  %v3275_v23 = vsel %vm101_vm0, %v3269_v55, %v8098_v3  ;;  %v3449_v55 = vld [vmem:[%s10485_s4] sm:$0xff] }
0x12d7   :  { %v3256_v33 = vsel %vm3253_vm6, %v3249_v11, %v8102_v12  ;;  %v3257_v4 = vsel %vm3253_vm6, %v3250_v47, %v8103_v38  ;;  %v8133_v54 = vunpack.i.h.bf16 %v8131_v19 }
0x12d8   :  { %8150 = vrot.lane.b32.xlu0 %v8149_v26, %s10412_s14  ;;  %8160 = vrot.lane.b32.xlu1 %v8159_v6, %s8505_s2  ;;  %v7614_v26 = vpack.c.bf16 %v3368_v15, %v3367_v18  ;;  %v8108_v6 = vunpack.i.h.bf16 %v8106_v40  ;;  %v3263_v44 = vsel %vm3260_vm7, %v3256_v33, %v8107_v25  ;;  %v8112_v18 = vunpack.i.l.bf16 %v9712_v29  ;;  %v3450_v33 = vld [vmem:[%s10485_s4 + $0x8] sm:$0xff] }
0x12d9   :  { %v8117_v15 = vunpack.i.l.bf16 %v9714_v34  ;;  %v8128_v40 = vunpack.i.h.bf16 %v8126_v62  ;;  %v8132_v29 = vunpack.i.l.bf16 %v8131_v19  ;;  %v3259_v8 = vsel %vm3253_vm6, %v3252_v9, %v8133_v54 }
0x12da   :  { %7615 = vmatpush3.bf16.msra.mxu0 %v7614_v26  ;;  %v8118_v26 = vunpack.i.h.bf16 %v9714_v34  ;;  %v3264_v46 = vsel %vm3260_vm7, %v3257_v4, %v8108_v6  ;;  %v3244_v32 = vsel %vm387_vm2, %v10483_v7, %v8112_v18  ;;  %v8147_v62 = vunpack.i.l.bf16 %v8146_v59  ;;  %v3451_v4 = vld [vmem:[%s10485_s4 + $0x10] sm:$0xff]  ;;  %v3453_v18 = vld [vmem:[%s10485_s4 + $0x20] sm:$0xff] }
0x12db   :  { %7628 = vmatprep.subr.bf16.mxu0 %v8519_v30  ;;  %v3270_v34 = vsel %vm3267_vm8, %v3263_v44, %v8117_v15  ;;  %v3251_v31 = vsel %vm3246_vm5, %v3244_v32, %v8122_v22  ;;  %v3454_v15 = vld [vmem:[%s10485_s4 + $0x28] sm:$0xff]  ;;  %v3455_v59 = vld [vmem:[%s10485_s4 + $0x30] sm:$0xff]  ;;  %v3542_v32 = vld [vmem:[%s10487_s1 + $0x20] sm:$0xff] }
0x12dc   :  { %v3271_v51 = vsel %vm3267_vm8, %v3264_v46, %v8118_v26  ;;  %v3276_v1 = vsel %vm101_vm0, %v3270_v34, %v8127_v36  ;;  %v3258_v27 = vsel %vm3253_vm6, %v3251_v31, %v8132_v29  ;;  %v7623_v26 = vpack.c.bf16 %v3454_v15, %v3453_v18  ;;  %v3540_v36 = vld [vmem:[%s10487_s1 + $0x10] sm:$0xff]  ;;  %v3541_v29 = vld [vmem:[%s10487_s1 + $0x18] sm:$0xff]  ;;  %v3543_v34 = vld [vmem:[%s10487_s1 + $0x28] sm:$0xff] }
0x12dd   :  { %v3277_v5 = vsel %vm101_vm0, %v3271_v51, %v8128_v40  ;;  %v3539_v40 = vld [vmem:[%s10487_s1 + $0x8] sm:$0xff]  ;;  %v7632_v7 = vpack.c.bf16 %v3541_v29, %v3540_v36  ;;  %v3638_v51 = vld [vmem:[%s10486_s3 + $0x10] sm:$0xff]  ;;  %v3639_v31 = vld [vmem:[%s10486_s3 + $0x18] sm:$0xff] }
0x1342   :  { %v8136_v49 = vpop.permute.xlu0 %8135 }
0x1343   :  { %v8138_v35 = vunpack.i.h.bf16 %v8136_v49  ;;  %v8137_v17 = vunpack.i.l.bf16 %v8136_v49  ;;  %v3456_v49 = vld [vmem:[%s10485_s4 + $0x38] sm:$0xff] }
0x1344   :  { %v7626_v46 = vpack.c.bf16 %v3456_v49, %v3455_v59  ;;  %v3929_v59 = vld [vmem:[%s10377_s20 + $0x8] sm:$0xff]  ;;  %v3931_v49 = vld [vmem:[%s10377_s20 + $0x18] sm:$0xff] }
0x1345   :  { %v3282_v57 = vsel %vm3280_vm9, %v3275_v23, %v8138_v35  ;;  %v3281_v60 = vsel %vm3280_vm9, %v3274_v13, %v8137_v17  ;;  %v7617_v13 = vpack.c.bf16 %v3450_v33, %v3449_v55  ;;  %v3452_v23 = vld [vmem:[%s10485_s4 + $0x18] sm:$0xff]  ;;  %v7640_v35 = vpack.c.bf16 %v3637_v61, %v3636_v58  ;;  %v3538_v17 = vld [vmem:[%s10487_s1] sm:$0xff]  ;;  %v3930_v58 = vld [vmem:[%s10377_s20 + $0x10] sm:$0xff] }
0x1346   :  { %v7596_v37 = vpack.c.bf16 %v3282_v57, %v3281_v60  ;;  %v8141_v48 = vpop.permute.xlu0 %8140  ;;  %v8156_v16 = vpop.permute.xlu1 %8155  ;;  %v7620_v44 = vpack.c.bf16 %v3452_v23, %v3451_v4  ;;  %v7629_v54 = vpack.c.bf16 %v3539_v40, %v3538_v17  ;;  %v7635_v57 = vpack.c.bf16 %v3543_v34, %v3542_v32  ;;  %v6253_v60 = vld [vmem:[%s10369_s6] ss:$0 sm:$0xff]  ;;  %v3935_v17 = vld [vmem:[%s10377_s20 + $0x38] sm:$0xff]  ;;  %v3934_v34 = vld [vmem:[%s10377_s20 + $0x30] sm:$0xff] }
0x1347   :  { %v8143_v41 = vunpack.i.h.bf16 %v8141_v48  ;;  %v8142_v56 = vunpack.i.l.bf16 %v8141_v48  ;;  %v8158_v20 = vunpack.i.h.bf16 %v8156_v16  ;;  %v8157_v39 = vunpack.i.l.bf16 %v8156_v16  ;;  %v3932_v32 = vld [vmem:[%s10377_s20 + $0x20] sm:$0xff] }
0x1348   :  { %7597 = vmatpush3.bf16.msra.mxu1 %v7596_v37  ;;  %v7644_v16 = vpack.c.bf16 %v3639_v31, %v3638_v51  ;;  %v7656_v36 = vpack.c.bf16 %v3931_v49, %v3929_v59  ;;  %v7662_v51 = vpack.c.bf16 %v3934_v34, %v3932_v32 }
0x1349   :  { %v3266_v14 = vsel %vm3260_vm7, %v3259_v8, %v8143_v41  ;;  %v3265_v21 = vsel %vm3260_vm7, %v3258_v27, %v8142_v56  ;;  %v3284_v38 = vsel %vm3280_vm9, %v3277_v5, %v8158_v20  ;;  %v3283_v12 = vsel %vm3280_vm9, %v3276_v1, %v8157_v39  ;;  %7598 = vmatprep.subr.bf16.mxu1 %v8519_v30  ;;  %v3635_v41 = vld [vmem:[%s10370_s13 + $0x8] sm:$0xff]  ;;  %v3544_v56 = vld [vmem:[%s10487_s1 + $0x30] sm:$0xff]  ;;  %v3545_v20 = vld [vmem:[%s10487_s1 + $0x38] sm:$0xff] }
0x134a   :  { %v7599_v53 = vpack.c.bf16 %v3284_v38, %v3283_v12  ;;  %v8151_v24 = vpop.permute.xlu0 %8150  ;;  %v8161_v0 = vpop.permute.xlu1 %8160  ;;  %v3272_v10 = vsel %vm3267_vm8, %v3265_v21, %v8147_v62  ;;  %v3273_v52 = vsel %vm3267_vm8, %v3266_v14, %v8148_v2  ;;  %v7638_v39 = vpack.c.bf16 %v3545_v20, %v3544_v56  ;;  %v3730_v1 = vld [vmem:[%s10371_s16] sm:$0xff]  ;;  %v3731_v5 = vld [vmem:[%s10371_s16 + $0x8] sm:$0xff]  ;;  %v3732_v8 = vld [vmem:[%s10371_s16 + $0x10] sm:$0xff] }
0x134b   :  { %v8153_v3 = vunpack.i.h.bf16 %v8151_v24  ;;  %v8152_v25 = vunpack.i.l.bf16 %v8151_v24  ;;  %v8163_v50 = vunpack.i.h.bf16 %v8161_v0  ;;  %v8162_v28 = vunpack.i.l.bf16 %v8161_v0  ;;  %v3733_v14 = vld [vmem:[%s10371_s16 + $0x18] sm:$0xff]  ;;  %v6255_v38 = vld [vmem:[%s10372_s10] ss:$0 sm:$0xff]  ;;  %v3942_v20 = vld [vmem:[%s10377_s20 + $0x70] sm:$0xff]  ;;  %s10490_s16 = smov 32  }
0x134c   :  { %7600 = vmatpush3.bf16.msra.mxu1 %v7599_v53  ;;  %v7648_v27 = vpack.c.bf16 %v3731_v5, %v3730_v1  ;;  %v7652_v21 = vpack.c.bf16 %v3733_v14, %v3732_v8  ;;  %v6259_v24 = vld [vmem:[%s10373_s15] ss:$0 sm:$0xff]  ;;  %s10491_s15 = smov 96  }
0x134d   :  { %v3278_v11 = vsel %vm101_vm0, %v3272_v10, %v8152_v25  ;;  %v3279_v19 = vsel %vm101_vm0, %v3273_v52, %v8153_v3  ;;  %7601 = vmatprep.subr.bf16.mxu1 %v8519_v30  ;;  %v6257_v52 = vld [vmem:[%s10374_s12] ss:$0 sm:$0xff] }
0x134e   :  { %v3286_v47 = vsel %vm3280_vm9, %v3279_v19, %v8163_v50  ;;  %v3285_v63 = vsel %vm3280_vm9, %v3278_v11, %v8162_v28  ;;  %v3940_v56 = vld [vmem:[%s10377_s20 + $0x60] sm:$0xff] }
0x134f   :  { %v7602_v6 = vpack.c.bf16 %v3286_v47, %v3285_v63 }
0x1351   :  { %7603 = vmatpush3.bf16.msra.mxu1 %v7602_v6 }
0x1352   :  { %7616 = vmatprep.subr.bf16.mxu1 %v8519_v30 }
0x1354   :  { %7072 = vmatmul.mubr.msk.f32.vlgmr.msra.gmra.mrb[60].mxu1 %vm101_vm0, %v3287_v45  ;;  %v6262_v45 = vld [vmem:[%s10375_s17] ss:$0 sm:$0xff] }
0x1355   :  { %7109 = vmatprep.mubr.msk.f32.mxu1 %vm8520_vm4, %v10473_v43  ;;  %7618 = vmatpush3.bf16.msra.mxu1 %v7617_v13 }
0x1356   :  { %7619 = vmatprep.subr.bf16.mxu1 %v8519_v30 }
0x1359   :  { %7621 = vmatpush3.bf16.msra.mxu1 %v7620_v44 }
0x135a   :  { %7622 = vmatprep.subr.bf16.mxu1 %v8519_v30 }
0x135d   :  { %7624 = vmatpush3.bf16.msra.mxu1 %v7623_v26  ;;  %v3836_v26 = vld [vmem:[%s10376_s18] sm:$0xff] }
0x135e   :  { %7625 = vmatprep.subr.bf16.mxu1 %v8519_v30 }
0x1361   :  { %7627 = vmatpush3.bf16.msra.mxu1 %v7626_v46  ;;  %v3928_v46 = vld [vmem:[%s10377_s20] sm:$0xff] }
0x1362   :  { %7641 = vmatprep.subr.bf16.mxu1 %v7640_v35  ;;  %v7658_v29 = vpack.c.bf16 %v3930_v58, %v3928_v46 }
0x1427   :  { %v3357_v42 = vpop.f32.mrb[60].mxu1 }
0x1428   :  { %v7073_v22 = vpop.f32.mrb[61].mxu1  ;;  %7091 = vmatmul.mubr.msk.f32.vlgmr.msra.gmra.mrb[54].mxu0 %vm249_vm1, %v3357_v42 }
0x1429   :  { %7128 = vmatprep.mubr.msk.f32.mxu0 %vm8520_vm4, %v10473_v43  ;;  %7630 = vmatpush3.bf16.msra.mxu0 %v7629_v54  ;;  %v3837_v54 = vld [vmem:[%s10376_s18 + $0x8] sm:$0xff]  ;;  %s10496_s18 = smov 80  }
0x142a   :  { %7631 = vmatprep.subr.bf16.mxu0 %v8519_v30 }
0x142d   :  { %7633 = vmatpush3.bf16.msra.mxu0 %v7632_v7 }
0x142e   :  { %7634 = vmatprep.subr.bf16.mxu0 %v8519_v30 }
0x1431   :  { %7636 = vmatpush3.bf16.msra.mxu0 %v7635_v57  ;;  %v3937_v57 = vld [vmem:[%s10377_s20 + $0x48] sm:$0xff] }
0x1432   :  { %7637 = vmatprep.subr.bf16.mxu0 %v8519_v30  ;;  %v3634_v30 = vld [vmem:[%s10370_s13] sm:$0xff] }
0x1435   :  { %7639 = vmatpush3.bf16.msra.mxu0 %v7638_v39  ;;  %v7670_v39 = vpack.c.bf16 %v3942_v20, %v3940_v56 }
0x14fb   :  { %v3445_v9 = vpop.f32.mrb[54].mxu0 }
0x14fc   :  { %v3446_v37 = vadd.f32 %v6253_v60, %v3445_v9  ;;  %v7092_v48 = vpop.f32.mrb[55].mxu0  ;;  %v3939_v60 = vld [vmem:[%s10377_s20 + $0x58] sm:$0xff]  ;;  %v3936_v9 = vld [vmem:[%s10377_s20 + $0x40] sm:$0xff] }
0x14fd   :  { %v7664_v31 = vpack.c.bf16 %v3939_v60, %v3937_v57 }
0x14fe   :  { %7110 = vmatmul.mubr.msk.f32.vlgmr.msra.gmra.mrb[62].mxu1 %vm249_vm1, %v3446_v37  ;;  %v3938_v37 = vld [vmem:[%s10377_s20 + $0x50] sm:$0xff] }
0x14ff   :  { %7643 = vmatpush3.bf16.msra.mxu1 %v7640_v35  ;;  %7139 = vmatprep.mubr.msk.f32.mxu1 %vm3260_vm7, %v3634_v30  ;;  %v3933_v35 = vld [vmem:[%s10377_s20 + $0x28] sm:$0xff]  ;;  %v7666_v48 = vpack.c.bf16 %v3938_v37, %v3936_v9  ;;  %v3943_v30 = vld [vmem:[%s10377_s20 + $0x78] sm:$0xff] }
0x1500   :  { %7645 = vmatprep.subr.bf16.mxu1 %v7644_v16  ;;  %v7660_v7 = vpack.c.bf16 %v3935_v17, %v3933_v35 }
0x1503   :  { %7647 = vmatpush3.bf16.msra.mxu1 %v7644_v16  ;;  %v3941_v16 = vld [vmem:[%s10377_s20 + $0x68] sm:$0xff] }
0x1504   :  { %7649 = vmatprep.subr.bf16.mxu1 %v7648_v27 }
0x1506   :  { %7140 = vmatmul.mubr.msk.f32.vlgmr.msra.gmra.mrb[64].mxu1 %vm3260_vm7, %v3635_v41  ;;  %v7668_v41 = vpack.c.bf16 %v3943_v30, %v3941_v16 }
0x1507   :  { %7651 = vmatpush3.bf16.msra.mxu1 %v7648_v27 }
0x1508   :  { %7653 = vmatprep.subr.bf16.mxu1 %v7652_v21 }
0x150b   :  { %7655 = vmatpush3.bf16.msra.mxu1 %v7652_v21 }
0x15d1   :  { %v3533_v12 = vpop.f32.mrb[62].mxu1 }
0x15d2   :  { %v3534_v2 = vadd.f32 %v6255_v38, %v3533_v12  ;;  %v7111_v62 = vpop.f32.mrb[63].mxu1 }
0x15d4   :  { %v3537_v53 = vmax.f32 %v3534_v2, 0.0 }
0x15d6   :  { %7129 = vmatmul.mubr.msk.f32.vlgmr.msra.gmra.mrb[56].mxu0 %vm249_vm1, %v3537_v53 }
0x15d7   :  { %7155 = vmatprep.mubr.msk.f32.mxu0 %vm3838_vm11, %v3836_v26  ;;  %v9999_v26 = vld [vmem:[%s10379_s19] sm:$0xff] }
0x15d9   :  { %v7141_v0 = vpop.f32.mrb[64].mxu1 }
0x15da   :  { %v3725_v3 = vadd.f32 %v7141_v0, %v6259_v24  ;;  %v3719_v25 = vpop.f32.mrb[65].mxu1  ;;  %v3944_v0 = vld [vmem:[%s10378_s21] sm:$0x3] }
0x15db   :  { %v3720_v50 = vadd.f32 %v6259_v24, %v3719_v25 }
0x15dc   :  { %v3729_v28 = vmax.f32 %v3725_v3, 0.0  ;;  %v10488_v3 = vld [vmem:[#allocation2_spill] sm:$0xff] }
0x15dd   :  { %v3728_v10 = vmax.f32 %v3720_v50, 0.0  ;;  %v3949_v25 = vrot.slane %v3944_v0, %v10488_v3 }
0x15df   :  { %7150 = vmatprep.mubr.msk.f32.mxu1 %vm3260_vm7, %v3728_v10 }
0x15e0   :  { %7151 = vmatmul.mubr.msk.f32.vlgmr.msra.gmra.mrb[66].mxu1 %vm3260_vm7, %v3729_v28 }
0x16a9   :  { %v3622_v11 = vpop.f32.mrb[56].mxu0 }
0x16aa   :  { %v3623_v19 = vadd.f32 %v6257_v52, %v3622_v11  ;;  %v7130_v47 = vpop.f32.mrb[57].mxu0  ;;  %v10489_v52 = vld [vmem:[#allocation3_spill] sm:$0xff] }
0x16ab   :  { %v3953_v11 = vrot.slane %v3944_v0, %v10489_v52 }
0x16ac   :  { %v3626_v63 = vmul.f32 %v3623_v19, %v3623_v19 }
0x16ae   :  { %v3628_v6 = vsel %vm3627_vm10, %v3626_v63, 0.0 }
0x16af   :  { %3629 = vadd.xlane.f32.xlu0 %v3628_v6 }
0x16b3   :  { %v7152_v55 = vpop.f32.mrb[66].mxu1 }
0x16b4   :  { %v9885_v33 = vadd.f32 %v7152_v55, %v6262_v45  ;;  %v3813_v4 = vpop.f32.mrb[67].mxu1 }
0x16b5   :  { %v9887_v13 = vadd.f32 %v6262_v45, %v3813_v4 }
0x16b6   :  { %v3823_v23 = vmul.f32 %v9885_v33, %v9885_v33 }
0x16b7   :  { %v3822_v44 = vmul.f32 %v9887_v13, %v9887_v13 }
0x16b8   :  { %v3827_v18 = vsel %vm249_vm1, %v3823_v23, 0.0 }
0x16b9   :  { %3828 = vadd.xlane.f32.xlu0 %v3827_v18  ;;  %v3824_v15 = vsel %vm249_vm1, %v3822_v44, 0.0 }
0x16ba   :  { %3825 = vadd.xlane.f32.xlu1 %v3824_v15 }
0x173c   :  { %v3630_v42 = vpop.xlane.xlu0 %3629 }
0x173d   :  { %v3631_v22 = vmax.f32 %v3630_v42, 1e-24 }
0x173f   :  { %8426 = vrsqrt.f32 %v3631_v22  ;;  %v10004_v22 = vld [vmem:[%s10379_s19 + $0x8] sm:$0xff]  ;;  %s10494_s19 = smov 48  }
0x1746   :  { %v3829_v27 = vpop.xlane.xlu0 %3828 }
0x1747   :  { %v3826_v1 = vpop.xlane.xlu1 %3825  ;;  %v3831_v8 = vmax.f32 %v3829_v27, 1e-24 }
0x1748   :  { %v3830_v5 = vmax.f32 %v3826_v1, 1e-24 }
0x1749   :  { %v8427_v61 = vpop.eup %8426 }
0x174a   :  { %v3633_v40 = vmul.f32 %v8427_v61, %v3623_v19  ;;  %8428 = vrsqrt.f32 %v3830_v5 }
0x174b   :  { %8430 = vrsqrt.f32 %v3831_v8 }
0x174c   :  { %7153 = vmatprep.subr.msk.mxu0 %vm3845_vm12, %v3633_v40 }
0x174d   :  { %7154 = vmatpush3.msk.msra.mxu0 %vm3845_vm12, %v3633_v40 }
0x174e   :  { %7156 = vmatmul.mubr.msk.f32.vlgmr.msra.gmra.mrb[58].mxu0 %vm3838_vm11, %v3837_v54  ;;  %7657 = vmatprep.subr.bf16.mxu0 %v7656_v36 }
0x174f   :  { %7659 = vmatpush1.bf16.msra.mxu0 %v7658_v29  ;;  %4026 = vmatprep.mubr.f32.mxu0 %v10473_v43 }
0x1750   :  { %7661 = vmatprep.subr.bf16.mxu0 %v7660_v7 }
0x1753   :  { %7663 = vmatpush1.bf16.msra.mxu0 %v7662_v51 }
0x1754   :  { %7665 = vmatprep.subr.bf16.mxu0 %v7664_v31  ;;  %v8429_v14 = vpop.eup %8428 }
0x1755   :  { %v3834_v38 = vmul.f32 %v8429_v14, %v9887_v13  ;;  %v8431_v12 = vpop.eup %8430 }
0x1756   :  { %v3835_v53 = vmul.f32 %v8431_v12, %v9885_v33 }
0x1757   :  { %7667 = vmatpush1.bf16.msra.mxu0 %v7666_v48 }
0x1758   :  { %7669 = vmatprep.subr.bf16.mxu0 %v7668_v41 }
0x175b   :  { %7671 = vmatpush1.bf16.msra.mxu0 %v7670_v39 }
0x1821   :  { %v7157_v21 = vpop.f32.mrb[58].mxu0 }
0x1822   :  { %v3915_v2 = vpop.f32.mrb[59].mxu0  ;;  %v3925_v24 = vadd.f32 %v7157_v21, %v3835_v53 }
0x1823   :  { %v3924_v62 = vadd.f32 %v3915_v2, %v3834_v38 }
0x1825   :  { %6268 = vmatmul.mubr.msk.f32.vlgmr.msra.gmra.mrb[60].mxu0 %vm249_vm1, %v3924_v62 }
0x1826   :  { %4032 = vmatprep.mubr.f32.mxu0 %v10473_v43 }
0x1829   :  { %6269 = vmatmul.mubr.msk.f32.gmra.mrb[62].mxu0 %vm249_vm1, %v3925_v24 }
0x18f8   :  { %v4028_v50 = vpop.f32.mrb[60].mxu0 }
0x18f9   :  { %v9961_v28 = vadd.f32 %v4028_v50, %v3949_v25  ;;  %v4030_v10 = vpop.f32.mrb[61].mxu0 }
0x18fa   :  { %v4031_v6 = vadd.f32 %v4030_v10, %v3953_v11 }
0x18fb   :  { %7162 = vmatprep.mubr.msk.f32.mxu1 %vm3246_vm5, %v9961_v28 }
0x18fc   :  { %v4034_v19 = vpop.f32.mrb[62].mxu0 }
0x18fd   :  { %v9966_v47 = vadd.f32 %v4034_v19, %v3949_v25  ;;  %v4036_v63 = vpop.f32.mrb[63].mxu0 }
0x18fe   :  { %v4037_v45 = vadd.f32 %v4036_v63, %v3953_v11 }
0x18ff   :  { %v9970_v55 = vpack.i.bf16 %v9966_v47, %v9961_v28 }
0x1900   :  { %v7678_v33 = vpack.c.bf16 %v4037_v45, %v4031_v6  ;;  %v9972_v4 = vpack.i.bf16 %v4037_v45, %v4031_v6 }
0x1901   :  { %8165 = vrot.lane.b32.xlu0 %v9970_v55, %s8504_s29 }
0x1905   :  { %4231 = vrot.lane.b32.xlu0 %v9961_v28, %s8508_s9 }
0x1909   :  { %8175 = vrot.lane.b32.xlu0 %v9970_v55, %s10490_s16 }
0x190d   :  { %4233 = vrot.lane.b32.xlu0 %v9966_v47, %s8508_s9 }
0x1911   :  { %4433 = vrot.lane.b32.xlu0 %v9961_v28, %s10491_s15 }
0x1973   :  { %v8166_v13 = vpop.permute.xlu0 %8165 }
0x1974   :  { %v8168_v23 = vunpack.i.h.bf16 %v8166_v13  ;;  %v8167_v44 = vunpack.i.l.bf16 %v8166_v13 }
0x1976   :  { %v7672_v15 = vpack.c.bf16 %v8168_v23, %v8167_v44 }
0x1977   :  { %v4232_v31 = vpop.permute.xlu0 %4231 }
0x1978   :  { %7674 = vmatprep.subr.msk.bf16.mxu1 %vm9986_vm13, %v7672_v15 }
0x1979   :  { %7677 = vmatpush3.bf16.xpose.msk.msra.mxu1 %vm9986_vm13, %v7672_v15 }
0x197a   :  { %7679 = vmatprep.subr.bf16.mxu1 %v7678_v33 }
0x197b   :  { %v8176_v30 = vpop.permute.xlu0 %8175 }
0x197c   :  { %v8178_v20 = vunpack.i.h.bf16 %v8176_v30  ;;  %v8177_v39 = vunpack.i.l.bf16 %v8176_v30 }
0x197e   :  { %v7692_v27 = vpack.c.bf16 %v8178_v20, %v8177_v39 }
0x197f   :  { %v4234_v8 = vpop.permute.xlu0 %4233 }
0x1980   :  { %7163 = vmatmul.mubr.msk.f32.vlgmr.msra.gmra.mrb[68].mxu1 %vm3246_vm5, %v9966_v47 }
0x1981   :  { %7681 = vmatpush3.bf16.msra.mxu1 %v7678_v33 }
0x1983   :  { %v4434_v14 = vpop.permute.xlu0 %4433 }
0x1a53   :  { %v7164_v42 = vpop.f32.mrb[68].mxu1 }
0x1a54   :  { %v4119_v59 = vpop.f32.mrb[69].mxu1  ;;  %v4125_v46 = vadd.f32 %v7164_v42, %v10004_v22 }
0x1a55   :  { %v4120_v49 = vadd.f32 %v4119_v59, %v9999_v26 }
0x1a56   :  { %v4131_v61 = vsel %vm3246_vm5, %v4125_v46, -inf }
0x1a57   :  { %v4128_v58 = vsel %vm3246_vm5, %v4120_v49, -inf }
0x1a58   :  { %4129 = vmax.xlane.f32.xlu1 %v4128_v58 }
0x1a5c   :  { %4132 = vmax.xlane.f32.xlu1 %v4131_v61 }
0x1ae5   :  { %v4130_v35 = vpop.xlane.xlu1 %4129 }
0x1ae6   :  { %v4134_v17 = vsub.f32 %v4120_v49, %v4130_v35 }
0x1ae8   :  { %v4136_v54 = vmul.f32 1.442695, %v4134_v17 }
0x1ae9   :  { %v4133_v40 = vpop.xlane.xlu1 %4132 }
0x1aea   :  { %v4135_v36 = vsub.f32 %v4125_v46, %v4133_v40 }
0x1aec   :  { %v4138_v29 = vmul.f32 1.442695, %v4135_v36 }
0x1aee   :  { %8432 = vpow2.f32 %v4138_v29 }
0x1aef   :  { %8434 = vpow2.f32 %v4136_v54 }
0x1af8   :  { %v8433_v7 = vpop.eup %8432 }
0x1af9   :  { %v4143_v32 = vsel %vm3246_vm5, %v8433_v7, 0.0  ;;  %v8435_v34 = vpop.eup %8434 }
0x1afa   :  { %4144 = vadd.xlane.f32.xlu1 %v4143_v32  ;;  %v4140_v57 = vsel %vm3246_vm5, %v8435_v34, 0.0 }
0x1afe   :  { %4141 = vadd.xlane.f32.xlu1 %v4140_v57 }
0x1b0f   :  { %8170 = vrot.lane.b32.xlu1 %v9970_v55, %s10494_s19 }
0x1b13   :  { %4435 = vrot.lane.b32.xlu1 %v9966_v47, %s10491_s15 }
0x1b87   :  { %v4145_v60 = vpop.xlane.xlu1 %4144 }
0x1b88   :  { %8436 = vrcp.f32 %v4145_v60 }
0x1b8b   :  { %v4142_v51 = vpop.xlane.xlu1 %4141 }
0x1b8c   :  { %8438 = vrcp.f32 %v4142_v51 }
0x1b8f   :  { %v8171_v9 = vpop.permute.xlu1 %8170 }
0x1b90   :  { %v8173_v37 = vunpack.i.h.bf16 %v8171_v9  ;;  %v8172_v48 = vunpack.i.l.bf16 %v8171_v9 }
0x1b92   :  { %v7682_v16 = vpack.c.bf16 %v8173_v37, %v8172_v48  ;;  %v8437_v41 = vpop.eup %8436 }
0x1b93   :  { %v4149_v5 = vmul.f32 %v8437_v41, %v8433_v7  ;;  %v4436_v21 = vpop.permute.xlu1 %4435 }
0x1b94   :  { %7684 = vmatprep.subr.msk.bf16.mxu1 %vm9986_vm13, %v7682_v16 }
0x1b96   :  { %v8439_v56 = vpop.eup %8438 }
0x1b97   :  { %v4148_v1 = vmul.f32 %v8439_v56, %v8435_v34 }
0x1b99   :  { %7169 = vmatprep.mubr.msk.f32.mxu1 %vm3246_vm5, %v4148_v1 }
0x1b9a   :  { %7170 = vmatmul.mubr.msk.f32.vlgmr.msra.gmra.mrb[70].mxu1 %vm3246_vm5, %v4149_v5 }
0x1b9b   :  { %7687 = vmatpush3.bf16.xpose.msk.msra.mxu1 %vm9986_vm13, %v7682_v16  ;;  %7176 = vmatprep.mubr.msk.f32.mxu1 %vm3246_vm5, %v4232_v31 }
0x1b9c   :  { %7694 = vmatprep.subr.msk.bf16.mxu1 %vm9986_vm13, %v7692_v27 }
0x1ba2   :  { %7177 = vmatmul.mubr.msk.f32.vlgmr.msra.gmra.mrb[72].mxu1 %vm3246_vm5, %v4234_v8 }
0x1ba3   :  { %7697 = vmatpush3.bf16.xpose.msk.msra.mxu1 %vm9986_vm13, %v7692_v27  ;;  %7190 = vmatprep.mubr.msk.f32.mxu1 %vm3246_vm5, %v4434_v14 }
0x1baa   :  { %7191 = vmatmul.mubr.msk.f32.vlgmr.msra.gmra.mrb[74].mxu1 %vm3246_vm5, %v4436_v21 }
0x1c6d   :  { %v10030_v38 = vpop.f32.mrb[70].mxu1 }
0x1c6e   :  { %v10032_v12 = vpop.f32.mrb[71].mxu1 }
0x1c75   :  { %v7178_v2 = vpop.f32.mrb[72].mxu1 }
0x1c76   :  { %v4319_v62 = vadd.f32 %v7178_v2, %v10004_v22  ;;  %v4313_v53 = vpop.f32.mrb[73].mxu1 }
0x1c77   :  { %v4314_v24 = vadd.f32 %v4313_v53, %v9999_v26 }
0x1c78   :  { %v4325_v0 = vsel %vm3246_vm5, %v4319_v62, -inf }
0x1c79   :  { %4326 = vmax.xlane.f32.xlu1 %v4325_v0  ;;  %v4322_v25 = vsel %vm3246_vm5, %v4314_v24, -inf }
0x1c7a   :  { %4323 = vmax.xlane.f32.xlu0 %v4322_v25 }
0x1c7d   :  { %v7192_v50 = vpop.f32.mrb[74].mxu1 }
0x1c7e   :  { %v4515_v10 = vpop.f32.mrb[75].mxu1  ;;  %v4521_v19 = vadd.f32 %v7192_v50, %v10004_v22 }
0x1c7f   :  { %v4516_v11 = vadd.f32 %v4515_v10, %v9999_v26 }
0x1c80   :  { %v4527_v6 = vsel %vm3246_vm5, %v4521_v19, -inf }
0x1c81   :  { %v4524_v63 = vsel %vm3246_vm5, %v4516_v11, -inf }
0x1c82   :  { %4525 = vmax.xlane.f32.xlu0 %v4524_v63 }
0x1c86   :  { %4528 = vmax.xlane.f32.xlu0 %v4527_v6 }
0x1c8a   :  { %8180 = vrot.lane.b32.xlu1 %v9972_v4, %s8508_s9 }
0x1d06   :  { %v4327_v45 = vpop.xlane.xlu1 %4326 }
0x1d07   :  { %v4329_v33 = vsub.f32 %v4319_v62, %v4327_v45  ;;  %v4324_v13 = vpop.xlane.xlu0 %4323 }
0x1d08   :  { %v4328_v23 = vsub.f32 %v4314_v24, %v4324_v13 }
0x1d09   :  { %v4332_v44 = vmul.f32 1.442695, %v4329_v33 }
0x1d0a   :  { %v4330_v15 = vmul.f32 1.442695, %v4328_v23  ;;  %v8181_v42 = vpop.permute.xlu1 %8180 }
0x1d0b   :  { %8440 = vpow2.f32 %v4332_v44  ;;  %v8183_v59 = vunpack.i.h.bf16 %v8181_v42  ;;  %v8182_v49 = vunpack.i.l.bf16 %v8181_v42 }
0x1d0c   :  { %8442 = vpow2.f32 %v4330_v15 }
0x1d0d   :  { %v7688_v46 = vpack.c.bf16 %v8183_v59, %v8182_v49 }
0x1d0f   :  { %7689 = vmatprep.subr.bf16.mxu0 %v7688_v46  ;;  %v4526_v58 = vpop.xlane.xlu0 %4525 }
0x1d10   :  { %7691 = vmatpush3.bf16.msra.mxu0 %v7688_v46  ;;  %v4530_v34 = vsub.f32 %v4516_v11, %v4526_v58 }
0x1d12   :  { %v4532_v57 = vmul.f32 1.442695, %v4530_v34 }
0x1d13   :  { %v4529_v61 = vpop.xlane.xlu0 %4528 }
0x1d14   :  { %v4531_v35 = vsub.f32 %v4521_v19, %v4529_v61 }
0x1d15   :  { %v8441_v17 = vpop.eup %8440 }
0x1d16   :  { %v8443_v40 = vpop.eup %8442  ;;  %v4534_v36 = vmul.f32 1.442695, %v4531_v35  ;;  %v4337_v54 = vsel %vm3246_vm5, %v8441_v17, 0.0 }
0x1d17   :  { %4338 = vadd.xlane.f32.xlu0 %v4337_v54  ;;  %v4334_v29 = vsel %vm3246_vm5, %v8443_v40, 0.0 }
0x1d18   :  { %8444 = vpow2.f32 %v4534_v36  ;;  %4335 = vadd.xlane.f32.xlu1 %v4334_v29 }
0x1d19   :  { %8446 = vpow2.f32 %v4532_v57  ;;  %v4864_v57 = vld [vmem:[%s10380_s22 + $0x8] sm:$0xff] }
0x1d22   :  { %v8445_v7 = vpop.eup %8444 }
0x1d23   :  { %v4539_v32 = vsel %vm3246_vm5, %v8445_v7, 0.0  ;;  %v8447_v60 = vpop.eup %8446 }
0x1d24   :  { %4540 = vadd.xlane.f32.xlu0 %v4539_v32  ;;  %v4536_v51 = vsel %vm3246_vm5, %v8447_v60, 0.0 }
0x1d29   :  { %8190 = vrot.lane.b32.xlu1 %v9970_v55, %s10495_s28 }
0x1d3a   :  { %8185 = vrot.lane.b32.xlu0 %v9972_v4, %s10491_s15 }
0x1d3e   :  { %4635 = vrot.lane.b32.xlu0 %v9966_v47, %s10496_s18 }
0x1d4d   :  { %4537 = vadd.xlane.f32.xlu1 %v4536_v51 }
0x1d5e   :  { %4633 = vrot.lane.b32.xlu1 %v9961_v28, %s10496_s18 }
0x1da4   :  { %v4339_v31 = vpop.xlane.xlu0 %4338 }
0x1da5   :  { %8448 = vrcp.f32 %v4339_v31  ;;  %v4336_v9 = vpop.xlane.xlu1 %4335  ;;  %v4866_v31 = vld [vmem:[%s10380_s22 + $0x18] sm:$0xff] }
0x1da6   :  { %8450 = vrcp.f32 %v4336_v9 }
0x1da9   :  { %v8191_v41 = vpop.permute.xlu1 %8190 }
0x1daa   :  { %v8193_v56 = vunpack.i.h.bf16 %v8191_v41  ;;  %v8192_v20 = vunpack.i.l.bf16 %v8191_v41 }
0x1dac   :  { %v7702_v5 = vpack.c.bf16 %v8193_v56, %v8192_v20  ;;  %v6300_v56 = vld [vmem:[%s10377_s20 + $0x98] sm:$0xff]  ;;  %v6297_v20 = vld [vmem:[%s10377_s20 + $0x80] sm:$0xff] }
0x1daf   :  { %v8449_v55 = vpop.eup %8448 }
0x1db0   :  { %v8451_v37 = vpop.eup %8450  ;;  %v4343_v30 = vmul.f32 %v8449_v55, %v8441_v17  ;;  %v4867_v55 = vld [vmem:[%s10380_s22 + $0x20] sm:$0xff] }
0x1db1   :  { %v4541_v48 = vpop.xlane.xlu0 %4540  ;;  %v4342_v16 = vmul.f32 %v8451_v37, %v8443_v40  ;;  %v4868_v37 = vld [vmem:[%s10380_s22 + $0x28] sm:$0xff] }
0x1db2   :  { %8452 = vrcp.f32 %v4541_v48  ;;  %v7720_v48 = vpack.c.bf16 %v4868_v37, %v4867_v55 }
0x1db3   :  { %7183 = vmatprep.mubr.msk.f32.mxu0 %vm3246_vm5, %v4342_v16  ;;  %v4869_v16 = vld [vmem:[%s10380_s22 + $0x30] sm:$0xff] }
0x1db4   :  { %7184 = vmatmul.mubr.msk.f32.vlgmr.msra.gmra.mrb[64].mxu0 %vm3246_vm5, %v4343_v30  ;;  %v4870_v30 = vld [vmem:[%s10380_s22 + $0x38] sm:$0xff] }
0x1db5   :  { %v8186_v47 = vpop.permute.xlu0 %8185  ;;  %v7724_v41 = vpack.c.bf16 %v4870_v30, %v4869_v16 }
0x1db6   :  { %v8188_v39 = vunpack.i.h.bf16 %v8186_v47  ;;  %v8187_v1 = vunpack.i.l.bf16 %v8186_v47  ;;  %v6298_v47 = vld [vmem:[%s10377_s20 + $0x88] sm:$0xff] }
0x1db8   :  { %v7698_v28 = vpack.c.bf16 %v8188_v39, %v8187_v1  ;;  %v7728_v39 = vpack.c.bf16 %v6300_v56, %v6298_v47  ;;  %v6299_v1 = vld [vmem:[%s10377_s20 + $0x90] sm:$0xff] }
0x1db9   :  { %v4636_v53 = vpop.permute.xlu0 %4635 }
0x1dba   :  { %7699 = vmatprep.subr.bf16.mxu0 %v7698_v28 }
0x1dbb   :  { %7701 = vmatpush3.bf16.msra.mxu0 %v7698_v28  ;;  %v6302_v28 = vld [vmem:[%s10377_s20 + $0xa8] sm:$0xff] }
0x1dbc   :  { %7704 = vmatprep.subr.msk.bf16.mxu0 %vm9986_vm13, %v7702_v5  ;;  %v8453_v8 = vpop.eup %8452 }
0x1dbd   :  { %v4545_v2 = vmul.f32 %v8453_v8, %v8445_v7 }
0x1dda   :  { %v4538_v27 = vpop.xlane.xlu1 %4537 }
0x1ddb   :  { %8454 = vrcp.f32 %v4538_v27  ;;  %v7730_v27 = vpack.c.bf16 %v6299_v1, %v6297_v20 }
0x1dde   :  { %v4634_v62 = vpop.permute.xlu1 %4633 }
0x1de5   :  { %v8455_v14 = vpop.eup %8454 }
0x1de6   :  { %v4544_v21 = vmul.f32 %v8455_v14, %v8447_v60  ;;  %v4865_v60 = vld [vmem:[%s10380_s22 + $0x10] sm:$0xff]  ;;  %v6301_v14 = vld [vmem:[%s10377_s20 + $0xa0] sm:$0xff] }
0x1de7   :  { %v7716_v9 = vpack.c.bf16 %v4866_v31, %v4865_v60 }
0x1de8   :  { %7197 = vmatprep.mubr.msk.f32.mxu0 %vm3246_vm5, %v4544_v21  ;;  %v6303_v21 = vld [vmem:[%s10377_s20 + $0xb0] sm:$0xff] }
0x1de9   :  { %7198 = vmatmul.mubr.msk.f32.vlgmr.msra.gmra.mrb[66].mxu0 %vm3246_vm5, %v4545_v2  ;;  %v6306_v2 = vld [vmem:[%s10377_s20 + $0xc8] sm:$0xff] }
0x1dea   :  { %7707 = vmatpush3.bf16.xpose.msk.msra.mxu0 %vm9986_vm13, %v7702_v5  ;;  %7204 = vmatprep.mubr.msk.f32.mxu0 %vm3246_vm5, %v4634_v62  ;;  %v6304_v5 = vld [vmem:[%s10377_s20 + $0xb8] sm:$0xff] }
0x1deb   :  { %v7732_v8 = vpack.c.bf16 %v6304_v5, %v6302_v28  ;;  %7729 = vmatprep.subr.bf16.mxu0 %v7728_v39  ;;  %v6308_v62 = vld [vmem:[%s10377_s20 + $0xd8] sm:$0xff] }
0x1df1   :  { %7205 = vmatmul.mubr.msk.f32.vlgmr.msra.gmra.mrb[68].mxu0 %vm3246_vm5, %v4636_v53  ;;  %v7734_v53 = vpack.c.bf16 %v6303_v21, %v6301_v14 }
0x1df2   :  { %5059 = vmatprep.mubr.f32.mxu0 %v10473_v43  ;;  %7731 = vmatpush1.bf16.msra.mxu0 %v7730_v27 }
0x1df3   :  { %7733 = vmatprep.subr.bf16.mxu0 %v7732_v8 }
0x1df6   :  { %7735 = vmatpush1.bf16.msra.mxu0 %v7734_v53 }
0x1e87   :  { %v7185_v24 = vpop.f32.mrb[64].mxu0 }
0x1e88   :  { %v4424_v0 = vpop.f32.mrb[65].mxu0 }
0x1ebc   :  { %v7199_v25 = vpop.f32.mrb[66].mxu0 }
0x1ebd   :  { %v4624_v50 = vpop.f32.mrb[67].mxu0 }
0x1ec4   :  { %v7206_v10 = vpop.f32.mrb[68].mxu0 }
0x1ec5   :  { %v4721_v11 = vadd.f32 %v7206_v10, %v10004_v22  ;;  %v4715_v19 = vpop.f32.mrb[69].mxu0 }
0x1ec6   :  { %v4716_v63 = vadd.f32 %v4715_v19, %v9999_v26 }
0x1ec7   :  { %v4727_v6 = vsel %vm3246_vm5, %v4721_v11, -inf }
0x1ec8   :  { %4728 = vmax.xlane.f32.xlu0 %v4727_v6  ;;  %v4724_v45 = vsel %vm3246_vm5, %v4716_v63, -inf }
0x1ec9   :  { %4725 = vmax.xlane.f32.xlu1 %v4724_v45 }
0x1f55   :  { %v4729_v33 = vpop.xlane.xlu0 %4728 }
0x1f56   :  { %v4731_v13 = vsub.f32 %v4721_v11, %v4729_v33  ;;  %v4726_v23 = vpop.xlane.xlu1 %4725 }
0x1f57   :  { %v4730_v44 = vsub.f32 %v4716_v63, %v4726_v23 }
0x1f58   :  { %v4734_v15 = vmul.f32 1.442695, %v4731_v13 }
0x1f59   :  { %v4732_v42 = vmul.f32 1.442695, %v4730_v44 }
0x1f5a   :  { %8456 = vpow2.f32 %v4734_v15 }
0x1f5b   :  { %8458 = vpow2.f32 %v4732_v42 }
0x1f64   :  { %v8457_v59 = vpop.eup %8456 }
0x1f65   :  { %v8459_v49 = vpop.eup %8458  ;;  %v4739_v46 = vsel %vm3246_vm5, %v8457_v59, 0.0 }
0x1f66   :  { %4740 = vadd.xlane.f32.xlu1 %v4739_v46  ;;  %v4736_v58 = vsel %vm3246_vm5, %v8459_v49, 0.0 }
0x1f67   :  { %4737 = vadd.xlane.f32.xlu0 %v4736_v58  ;;  %v6309_v58 = vld [vmem:[%s10377_s20 + $0xe0] sm:$0xff] }
0x1f77   :  { %4835 = vrot.lane.b32.xlu1 %v4424_v0, %s10495_s28  ;;  %v6305_v0 = vld [vmem:[%s10377_s20 + $0xc0] sm:$0xff] }
0x1f7b   :  { %4837 = vrot.lane.b32.xlu1 %v7185_v24, %s10495_s28  ;;  %v7736_v24 = vpack.c.bf16 %v6308_v62, %v6306_v2 }
0x1f7d   :  { %8195 = vrot.lane.b32.xlu0 %v9972_v4, %s10496_s18  ;;  %v4863_v4 = vld [vmem:[%s10380_s22] sm:$0xff]  ;;  %7737 = vmatprep.subr.bf16.mxu0 %v7736_v24 }
0x1f7e   :  { %v7712_v51 = vpack.c.bf16 %v4864_v57, %v4863_v4 }
0x1f7f   :  { %4845 = vrot.lane.b32.xlu1 %v7199_v25, %s10490_s16  ;;  %v6307_v25 = vld [vmem:[%s10377_s20 + $0xd0] sm:$0xff] }
0x1f81   :  { %4843 = vrot.lane.b32.xlu0 %v4624_v50, %s10490_s16  ;;  %v7738_v50 = vpack.c.bf16 %v6307_v25, %v6305_v0 }
0x1f83   :  { %7739 = vmatpush1.bf16.msra.mxu0 %v7738_v50 }
0x1ff3   :  { %v4741_v61 = vpop.xlane.xlu1 %4740 }
0x1ff4   :  { %8460 = vrcp.f32 %v4741_v61  ;;  %v4738_v35 = vpop.xlane.xlu0 %4737  ;;  %v6311_v61 = vld [vmem:[%s10377_s20 + $0xf0] sm:$0xff] }
0x1ff5   :  { %8462 = vrcp.f32 %v4738_v35  ;;  %v7742_v35 = vpack.c.bf16 %v6311_v61, %v6309_v58 }
0x1ff7   :  { %v4836_v19 = vpop.permute.xlu1 %4835 }
0x1ff8   :  { %v8196_v17 = vpop.permute.xlu0 %8195  ;;  %v4857_v33 = vsel %vm3246_vm5, %v10032_v12, %v4836_v19  ;;  %v6310_v12 = vld [vmem:[%s10377_s20 + $0xe8] sm:$0xff] }
0x1ff9   :  { %v8198_v40 = vunpack.i.h.bf16 %v8196_v17  ;;  %v8197_v36 = vunpack.i.l.bf16 %v8196_v17  ;;  %v6294_v17 = vld [vmem:[%s10381_s23] ss:$0 sm:$0xff] }
0x1ffb   :  { %v7708_v54 = vpack.c.bf16 %v8198_v40, %v8197_v36  ;;  %v4838_v63 = vpop.permute.xlu1 %4837 }
0x1ffc   :  { %v4844_v45 = vpop.permute.xlu0 %4843  ;;  %v4858_v23 = vsel %vm3246_vm5, %v10030_v38, %v4838_v63  ;;  %v6312_v38 = vld [vmem:[%s10377_s20 + $0xf8] sm:$0xff] }
0x1ffd   :  { %7709 = vmatprep.subr.bf16.mxu1 %v7708_v54  ;;  %v4859_v44 = vsel %vm3260_vm7, %v4857_v33, %v4844_v45  ;;  %v7740_v46 = vpack.c.bf16 %v6312_v38, %v6310_v12 }
0x1ffe   :  { %v8461_v29 = vpop.eup %8460  ;;  %7711 = vmatpush3.bf16.msra.mxu1 %v7708_v54 }
0x1fff   :  { %v8463_v7 = vpop.eup %8462  ;;  %v4745_v34 = vmul.f32 %v8461_v29, %v8457_v59  ;;  %7713 = vmatprep.subr.bf16.mxu1 %v7712_v51  ;;  %v4846_v6 = vpop.permute.xlu1 %4845  ;;  %7741 = vmatprep.subr.bf16.mxu0 %v7740_v46 }
0x2000   :  { %v4744_v32 = vmul.f32 %v8463_v7, %v8459_v49  ;;  %v4860_v42 = vsel %vm3260_vm7, %v4858_v23, %v4846_v6  ;;  %7743 = vmatpush1.bf16.msra.mxu0 %v7742_v35  ;;  %v6313_v7 = vld [vmem:[%s10378_s21 + $0x2] sm:$0x3] }
0x2001   :  { %v4986_v60 = vrot.slane %v6313_v7, %v10489_v52 }
0x2002   :  { %7211 = vmatprep.mubr.msk.f32.mxu1 %vm3246_vm5, %v4744_v32  ;;  %v4982_v32 = vrot.slane %v6313_v7, %v10488_v3 }
0x2003   :  { %7212 = vmatmul.mubr.msk.f32.vlgmr.msra.gmra.mrb[76].mxu1 %vm3246_vm5, %v4745_v34 }
0x2004   :  { %7715 = vmatpush3.bf16.msra.mxu1 %v7712_v51 }
0x2005   :  { %7717 = vmatprep.subr.bf16.mxu1 %v7716_v9 }
0x2008   :  { %7719 = vmatpush3.bf16.msra.mxu1 %v7716_v9 }
0x2009   :  { %7721 = vmatprep.subr.bf16.mxu1 %v7720_v48 }
0x200c   :  { %7723 = vmatpush3.bf16.msra.mxu1 %v7720_v48 }
0x200d   :  { %7725 = vmatprep.subr.bf16.mxu1 %v7724_v41 }
0x2010   :  { %7727 = vmatpush3.bf16.msra.mxu1 %v7724_v41 }
0x20d6   :  { %v7213_v10 = vpop.f32.mrb[76].mxu1 }
0x20d7   :  { %4853 = vrot.lane.b32.xlu1 %v7213_v10, %s10494_s19  ;;  %v4824_v11 = vpop.f32.mrb[77].mxu1 }
0x20d8   :  { %4851 = vrot.lane.b32.xlu0 %v4824_v11, %s10494_s19 }
0x2149   :  { %v4854_v13 = vpop.permute.xlu1 %4853 }
0x214a   :  { %v4852_v15 = vpop.permute.xlu0 %4851  ;;  %v4862_v49 = vsel %vm101_vm0, %v4860_v42, %v4854_v13 }
0x214b   :  { %v4861_v59 = vsel %vm101_vm0, %v4859_v44, %v4852_v15 }
0x214c   :  { %7230 = vmatprep.mubr.msk.f32.mxu1 %vm249_vm1, %v4861_v59 }
0x214d   :  { %7231 = vmatmul.mubr.msk.f32.vlgmr.msra.gmra.mrb[78].mxu1 %vm249_vm1, %v4862_v49 }
0x2220   :  { %v7232_v40 = vpop.f32.mrb[78].mxu1 }
0x2221   :  { %v4950_v36 = vpop.f32.mrb[79].mxu1  ;;  %v4956_v29 = vadd.f32 %v7232_v40, %v6294_v17 }
0x2222   :  { %v4951_v54 = vadd.f32 %v6294_v17, %v4950_v36 }
0x2224   :  { %6314 = vmatmul.mubr.msk.f32.vlgmr.msra.gmra.mrb[70].mxu0 %vm249_vm1, %v4951_v54 }
0x2225   :  { %5065 = vmatprep.mubr.f32.mxu0 %v10473_v43 }
0x2228   :  { %6315 = vmatmul.mubr.msk.f32.gmra.mrb[72].mxu0 %vm249_vm1, %v4956_v29 }
0x22f7   :  { %v5061_v34 = vpop.f32.mrb[70].mxu0 }
0x22f8   :  { %v10175_v4 = vadd.f32 %v5061_v34, %v4982_v32  ;;  %v5063_v57 = vpop.f32.mrb[71].mxu0 }
0x22f9   :  { %v5064_v9 = vadd.f32 %v5063_v57, %v4986_v60 }
0x22fa   :  { %7237 = vmatprep.mubr.msk.f32.mxu1 %vm3246_vm5, %v10175_v4 }
0x22fb   :  { %v5067_v51 = vpop.f32.mrb[72].mxu0 }
0x22fc   :  { %v10180_v43 = vadd.f32 %v5067_v51, %v4982_v32  ;;  %v5069_v31 = vpop.f32.mrb[73].mxu0 }
0x22fd   :  { %v5070_v55 = vadd.f32 %v5069_v31, %v4986_v60 }
0x22fe   :  { %v10184_v37 = vpack.i.bf16 %v10180_v43, %v10175_v4 }
0x22ff   :  { %v7750_v3 = vpack.c.bf16 %v5070_v55, %v5064_v9  ;;  %v10186_v48 = vpack.i.bf16 %v5070_v55, %v5064_v9 }
0x2300   :  { %8205 = vrot.lane.b32.xlu1 %v10184_v37, %s10494_s19  ;;  %8200 = vrot.lane.b32.xlu0 %v10184_v37, %s8504_s29 }
0x2301   :  { %7751 = vmatprep.subr.bf16.mxu0 %v7750_v3 }
0x2302   :  { %7753 = vmatpush3.bf16.msra.mxu0 %v7750_v3 }
0x2304   :  { %5266 = vrot.lane.b32.xlu1 %v10180_v43, %s8508_s9  ;;  %5264 = vrot.lane.b32.xlu0 %v10175_v4, %s8508_s9 }
0x2372   :  { %v8206_v52 = vpop.permute.xlu1 %8205  ;;  %v8201_v16 = vpop.permute.xlu0 %8200 }
0x2373   :  { %v8208_v30 = vunpack.i.h.bf16 %v8206_v52  ;;  %v8207_v41 = vunpack.i.l.bf16 %v8206_v52  ;;  %v8203_v47 = vunpack.i.h.bf16 %v8201_v16  ;;  %v8202_v56 = vunpack.i.l.bf16 %v8201_v16 }
0x2375   :  { %v7744_v20 = vpack.c.bf16 %v8203_v47, %v8202_v56  ;;  %v7754_v39 = vpack.c.bf16 %v8208_v30, %v8207_v41 }
0x2376   :  { %v5265_v1 = vpop.permute.xlu0 %5264  ;;  %v5267_v28 = vpop.permute.xlu1 %5266 }
0x2377   :  { %7746 = vmatprep.subr.msk.bf16.mxu1 %vm9986_vm13, %v7744_v20 }
0x2378   :  { %7749 = vmatpush3.bf16.xpose.msk.msra.mxu1 %vm9986_vm13, %v7744_v20 }
0x2379   :  { %7756 = vmatprep.subr.msk.bf16.mxu1 %vm9986_vm13, %v7754_v39 }
0x237f   :  { %7238 = vmatmul.mubr.msk.f32.vlgmr.msra.gmra.mrb[80].mxu1 %vm3246_vm5, %v10180_v43 }
0x2380   :  { %7759 = vmatpush3.bf16.xpose.msk.msra.mxu1 %vm9986_vm13, %v7754_v39  ;;  %7251 = vmatprep.mubr.msk.f32.mxu1 %vm3246_vm5, %v5265_v1 }
0x2387   :  { %7252 = vmatmul.mubr.msk.f32.vlgmr.msra.gmra.mrb[82].mxu1 %vm3246_vm5, %v5267_v28 }
0x2452   :  { %v7239_v5 = vpop.f32.mrb[80].mxu1 }
0x2453   :  { %v5158_v27 = vadd.f32 %v7239_v5, %v10004_v22  ;;  %v5152_v8 = vpop.f32.mrb[81].mxu1 }
0x2454   :  { %v5153_v14 = vadd.f32 %v5152_v8, %v9999_v26 }
0x2455   :  { %v5164_v21 = vsel %vm3246_vm5, %v5158_v27, -inf }
0x2456   :  { %5165 = vmax.xlane.f32.xlu1 %v5164_v21  ;;  %v5161_v2 = vsel %vm3246_vm5, %v5153_v14, -inf }
0x2457   :  { %5162 = vmax.xlane.f32.xlu0 %v5161_v2 }
0x245a   :  { %v7253_v62 = vpop.f32.mrb[82].mxu1 }
0x245b   :  { %v5346_v53 = vpop.f32.mrb[83].mxu1  ;;  %v5352_v0 = vadd.f32 %v7253_v62, %v10004_v22 }
0x245c   :  { %v5347_v24 = vadd.f32 %v5346_v53, %v9999_v26 }
0x245d   :  { %v5358_v50 = vsel %vm3246_vm5, %v5352_v0, -inf }
0x245e   :  { %v5355_v25 = vsel %vm3246_vm5, %v5347_v24, -inf }
0x245f   :  { %5356 = vmax.xlane.f32.xlu0 %v5355_v25 }
0x2463   :  { %5359 = vmax.xlane.f32.xlu0 %v5358_v50 }
0x2467   :  { %8210 = vrot.lane.b32.xlu1 %v10186_v48, %s8508_s9 }
0x24e3   :  { %v5166_v10 = vpop.xlane.xlu1 %5165 }
0x24e4   :  { %v5168_v11 = vsub.f32 %v5158_v27, %v5166_v10  ;;  %v5163_v19 = vpop.xlane.xlu0 %5162 }
0x24e5   :  { %v5167_v63 = vsub.f32 %v5153_v14, %v5163_v19 }
0x24e6   :  { %v5171_v6 = vmul.f32 1.442695, %v5168_v11 }
0x24e7   :  { %v5169_v45 = vmul.f32 1.442695, %v5167_v63  ;;  %v8211_v33 = vpop.permute.xlu1 %8210 }
0x24e8   :  { %8464 = vpow2.f32 %v5171_v6  ;;  %v8213_v13 = vunpack.i.h.bf16 %v8211_v33  ;;  %v8212_v23 = vunpack.i.l.bf16 %v8211_v33 }
0x24e9   :  { %8466 = vpow2.f32 %v5169_v45 }
0x24ea   :  { %v7760_v44 = vpack.c.bf16 %v8213_v13, %v8212_v23 }
0x24ec   :  { %7761 = vmatprep.subr.bf16.mxu0 %v7760_v44  ;;  %v5357_v15 = vpop.xlane.xlu0 %5356 }
0x24ed   :  { %v5361_v17 = vsub.f32 %v5347_v24, %v5357_v15 }
0x24ef   :  { %v5363_v40 = vmul.f32 1.442695, %v5361_v17 }
0x24f0   :  { %v5360_v42 = vpop.xlane.xlu0 %5359 }
0x24f1   :  { %v5362_v59 = vsub.f32 %v5352_v0, %v5360_v42 }
0x24f2   :  { %v8465_v49 = vpop.eup %8464 }
0x24f3   :  { %v8467_v12 = vpop.eup %8466  ;;  %v5365_v38 = vmul.f32 1.442695, %v5362_v59  ;;  %v5176_v46 = vsel %vm3246_vm5, %v8465_v49, 0.0 }
0x24f4   :  { %5177 = vadd.xlane.f32.xlu0 %v5176_v46  ;;  %v5173_v58 = vsel %vm3246_vm5, %v8467_v12, 0.0 }
0x24f5   :  { %8468 = vpow2.f32 %v5365_v38  ;;  %5174 = vadd.xlane.f32.xlu1 %v5173_v58 }
0x24f6   :  { %8470 = vpow2.f32 %v5363_v40 }
0x24ff   :  { %v8469_v61 = vpop.eup %8468 }
0x2500   :  { %v5370_v35 = vsel %vm3246_vm5, %v8469_v61, 0.0  ;;  %v8471_v36 = vpop.eup %8470 }
0x2501   :  { %5371 = vadd.xlane.f32.xlu0 %v5370_v35  ;;  %v5367_v54 = vsel %vm3246_vm5, %v8471_v36, 0.0 }
0x2506   :  { %5466 = vrot.lane.b32.xlu1 %v10175_v4, %s10491_s15 }
0x2517   :  { %8215 = vrot.lane.b32.xlu0 %v10184_v37, %s10490_s16 }
0x252a   :  { %5368 = vadd.xlane.f32.xlu1 %v5367_v54 }
0x253b   :  { %5468 = vrot.lane.b32.xlu1 %v10180_v43, %s10491_s15 }
0x2581   :  { %v5178_v29 = vpop.xlane.xlu0 %5177 }
0x2582   :  { %8472 = vrcp.f32 %v5178_v29  ;;  %v5175_v7 = vpop.xlane.xlu1 %5174 }
0x2583   :  { %8474 = vrcp.f32 %v5175_v7 }
0x2586   :  { %v5467_v52 = vpop.permute.xlu1 %5466 }
0x258c   :  { %v8473_v32 = vpop.eup %8472 }
0x258d   :  { %v8475_v34 = vpop.eup %8474  ;;  %v5182_v51 = vmul.f32 %v8473_v32, %v8465_v49 }
0x258e   :  { %v5372_v57 = vpop.xlane.xlu0 %5371  ;;  %v5181_v60 = vmul.f32 %v8475_v34, %v8467_v12 }
0x258f   :  { %8476 = vrcp.f32 %v5372_v57 }
0x2590   :  { %7244 = vmatprep.mubr.msk.f32.mxu0 %vm3246_vm5, %v5181_v60 }
0x2591   :  { %7245 = vmatmul.mubr.msk.f32.vlgmr.msra.gmra.mrb[74].mxu0 %vm3246_vm5, %v5182_v51 }
0x2592   :  { %7763 = vmatpush3.bf16.msra.mxu0 %v7760_v44  ;;  %v8216_v31 = vpop.permute.xlu0 %8215 }
0x2593   :  { %v8218_v9 = vunpack.i.h.bf16 %v8216_v31  ;;  %v8217_v55 = vunpack.i.l.bf16 %v8216_v31 }
0x2595   :  { %v7764_v3 = vpack.c.bf16 %v8218_v9, %v8217_v55 }
0x2597   :  { %7766 = vmatprep.subr.msk.bf16.mxu0 %vm9986_vm13, %v7764_v3 }
0x2599   :  { %v8477_v30 = vpop.eup %8476 }
0x259a   :  { %v5376_v56 = vmul.f32 %v8477_v30, %v8469_v61 }
0x25b7   :  { %v5369_v16 = vpop.xlane.xlu1 %5368 }
0x25b8   :  { %8478 = vrcp.f32 %v5369_v16 }
0x25bb   :  { %v5469_v20 = vpop.permute.xlu1 %5468 }
0x25c2   :  { %v8479_v41 = vpop.eup %8478 }
0x25c3   :  { %v5375_v47 = vmul.f32 %v8479_v41, %v8471_v36 }
0x25c5   :  { %7258 = vmatprep.mubr.msk.f32.mxu0 %vm3246_vm5, %v5375_v47 }
0x25c6   :  { %7259 = vmatmul.mubr.msk.f32.vlgmr.msra.gmra.mrb[76].mxu0 %vm3246_vm5, %v5376_v56 }
0x25c7   :  { %7769 = vmatpush3.bf16.xpose.msk.msra.mxu0 %vm9986_vm13, %v7764_v3  ;;  %7265 = vmatprep.mubr.msk.f32.mxu0 %vm3246_vm5, %v5467_v52 }
0x25ce   :  { %7266 = vmatmul.mubr.msk.f32.vlgmr.msra.gmra.mrb[78].mxu0 %vm3246_vm5, %v5469_v20 }
0x2664   :  { %v10238_v39 = vpop.f32.mrb[74].mxu0 }
0x2665   :  { %v10240_v1 = vpop.f32.mrb[75].mxu0 }
0x2699   :  { %v10242_v28 = vpop.f32.mrb[76].mxu0 }
0x269a   :  { %v10244_v5 = vpop.f32.mrb[77].mxu0 }
0x26a1   :  { %v7267_v27 = vpop.f32.mrb[78].mxu0 }
0x26a2   :  { %v5554_v8 = vadd.f32 %v7267_v27, %v10004_v22  ;;  %v5548_v14 = vpop.f32.mrb[79].mxu0  ;;  %v6342_v27 = vld [vmem:[%s10380_s22 + $0x50] sm:$0xff] }
0x26a3   :  { %v5549_v21 = vadd.f32 %v5548_v14, %v9999_v26  ;;  %v6343_v14 = vld [vmem:[%s10380_s22 + $0x58] sm:$0xff] }
0x26a4   :  { %v5560_v2 = vsel %vm3246_vm5, %v5554_v8, -inf }
0x26a5   :  { %5561 = vmax.xlane.f32.xlu1 %v5560_v2  ;;  %v5557_v62 = vsel %vm3246_vm5, %v5549_v21, -inf  ;;  %v6344_v2 = vld [vmem:[%s10380_s22 + $0x60] sm:$0xff] }
0x26a6   :  { %5558 = vmax.xlane.f32.xlu0 %v5557_v62  ;;  %v6345_v62 = vld [vmem:[%s10380_s22 + $0x68] sm:$0xff] }
0x26b6   :  { %8220 = vrot.lane.b32.xlu1 %v10186_v48, %s10491_s15 }
0x26ba   :  { %5666 = vrot.lane.b32.xlu1 %v10175_v4, %s10496_s18 }
0x26be   :  { %5668 = vrot.lane.b32.xlu1 %v10180_v43, %s10496_s18 }
0x2732   :  { %v5562_v53 = vpop.xlane.xlu1 %5561 }
0x2733   :  { %v5564_v24 = vsub.f32 %v5554_v8, %v5562_v53  ;;  %v5559_v0 = vpop.xlane.xlu0 %5558  ;;  %v7792_v53 = vpack.c.bf16 %v6345_v62, %v6344_v2 }
0x2734   :  { %v5563_v25 = vsub.f32 %v5549_v21, %v5559_v0  ;;  %v7788_v21 = vpack.c.bf16 %v6343_v14, %v6342_v27  ;;  %v6347_v0 = vld [vmem:[%s10380_s22 + $0x78] sm:$0xff] }
0x2735   :  { %v5567_v50 = vmul.f32 1.442695, %v5564_v24  ;;  %v6346_v24 = vld [vmem:[%s10380_s22 + $0x70] sm:$0xff] }
0x2736   :  { %v5565_v10 = vmul.f32 1.442695, %v5563_v25  ;;  %v8221_v11 = vpop.permute.xlu1 %8220  ;;  %v7796_v25 = vpack.c.bf16 %v6347_v0, %v6346_v24 }
0x2737   :  { %8480 = vpow2.f32 %v5567_v50  ;;  %v8223_v19 = vunpack.i.h.bf16 %v8221_v11  ;;  %v8222_v63 = vunpack.i.l.bf16 %v8221_v11  ;;  %v5994_v50 = vld [vmem:[%s10382_s24] sm:$0xff]  ;;  %v5996_v11 = vld [vmem:[%s10382_s24 + $0x10] sm:$0xff] }
0x2738   :  { %8482 = vpow2.f32 %v5565_v10  ;;  %v5995_v10 = vld [vmem:[%s10382_s24 + $0x8] sm:$0xff] }
0x2739   :  { %v7770_v6 = vpack.c.bf16 %v8223_v19, %v8222_v63  ;;  %v7800_v19 = vpack.c.bf16 %v5995_v10, %v5994_v50  ;;  %v5997_v63 = vld [vmem:[%s10382_s24 + $0x18] sm:$0xff] }
0x273a   :  { %v5667_v58 = vpop.permute.xlu1 %5666 }
0x273b   :  { %7771 = vmatprep.subr.bf16.mxu1 %v7770_v6 }
0x273c   :  { %7773 = vmatpush3.bf16.msra.mxu1 %v7770_v6  ;;  %v7804_v6 = vpack.c.bf16 %v5997_v63, %v5996_v11 }
0x2741   :  { %v8481_v45 = vpop.eup %8480 }
0x2742   :  { %v5572_v4 = vsel %vm3246_vm5, %v8481_v45, 0.0  ;;  %v8483_v33 = vpop.eup %8482 }
0x2743   :  { %5573 = vadd.xlane.f32.xlu0 %v5572_v4  ;;  %v5569_v43 = vsel %vm3246_vm5, %v8483_v33, 0.0  ;;  %v5999_v4 = vld [vmem:[%s10382_s24 + $0x28] sm:$0xff] }
0x2747   :  { %5570 = vadd.xlane.f32.xlu0 %v5569_v43 }
0x275d   :  { %8225 = vrot.lane.b32.xlu0 %v10184_v37, %s10495_s28  ;;  %v5669_v37 = vpop.permute.xlu1 %5668 }
0x27d0   :  { %v5574_v13 = vpop.xlane.xlu0 %5573 }
0x27d1   :  { %8484 = vrcp.f32 %v5574_v13 }
0x27d4   :  { %v5571_v23 = vpop.xlane.xlu0 %5570 }
0x27d5   :  { %8486 = vrcp.f32 %v5571_v23 }
0x27d8   :  { %v8226_v44 = vpop.permute.xlu0 %8225 }
0x27d9   :  { %v8228_v15 = vunpack.i.h.bf16 %v8226_v44  ;;  %v8227_v42 = vunpack.i.l.bf16 %v8226_v44 }
0x27db   :  { %v7774_v59 = vpack.c.bf16 %v8228_v15, %v8227_v42  ;;  %v8485_v49 = vpop.eup %8484 }
0x27dc   :  { %v5578_v46 = vmul.f32 %v8485_v49, %v8481_v45  ;;  %v5998_v45 = vld [vmem:[%s10382_s24 + $0x20] sm:$0xff] }
0x27dd   :  { %7776 = vmatprep.subr.msk.bf16.mxu1 %vm9986_vm13, %v7774_v59 }
0x27df   :  { %v8487_v12 = vpop.eup %8486 }
0x27e0   :  { %v5577_v38 = vmul.f32 %v8487_v12, %v8483_v33  ;;  %v7808_v33 = vpack.c.bf16 %v5999_v4, %v5998_v45 }
0x27e2   :  { %7272 = vmatprep.mubr.msk.f32.mxu1 %vm3246_vm5, %v5577_v38 }
0x27e3   :  { %7273 = vmatmul.mubr.msk.f32.vlgmr.msra.gmra.mrb[84].mxu1 %vm3246_vm5, %v5578_v46 }
0x27e4   :  { %7779 = vmatpush3.bf16.xpose.msk.msra.mxu1 %vm9986_vm13, %v7774_v59  ;;  %7279 = vmatprep.mubr.msk.f32.mxu1 %vm3246_vm5, %v5667_v58 }
0x27e5   :  { %7801 = vmatprep.subr.bf16.mxu1 %v7800_v19 }
0x27eb   :  { %7280 = vmatmul.mubr.msk.f32.vlgmr.msra.gmra.mrb[86].mxu1 %vm3246_vm5, %v5669_v37 }
0x27ec   :  { %7803 = vmatpush3.bf16.msra.mxu1 %v7800_v19 }
0x27ed   :  { %7805 = vmatprep.subr.bf16.mxu1 %v7804_v6 }
0x27f0   :  { %7807 = vmatpush3.bf16.msra.mxu1 %v7804_v6 }
0x27f1   :  { %7809 = vmatprep.subr.bf16.mxu1 %v7808_v33 }
0x27f4   :  { %7811 = vmatpush3.bf16.msra.mxu1 %v7808_v33 }
0x28b6   :  { %v7274_v61 = vpop.f32.mrb[84].mxu1 }
0x28b7   :  { %v5657_v35 = vpop.f32.mrb[85].mxu1 }
0x28be   :  { %v7281_v17 = vpop.f32.mrb[86].mxu1 }
0x28bf   :  { %v5754_v40 = vadd.f32 %v7281_v17, %v10004_v22  ;;  %v5748_v36 = vpop.f32.mrb[87].mxu1  ;;  %v6349_v17 = vld [vmem:[%s10381_s23 + $0x1] ss:$0 sm:$0xff] }
0x28c0   :  { %v5749_v54 = vadd.f32 %v5748_v36, %v9999_v26 }
0x28c1   :  { %v5760_v29 = vsel %vm3246_vm5, %v5754_v40, -inf }
0x28c2   :  { %5761 = vmax.xlane.f32.xlu1 %v5760_v29  ;;  %v5757_v7 = vsel %vm3246_vm5, %v5749_v54, -inf }
0x28c3   :  { %5758 = vmax.xlane.f32.xlu0 %v5757_v7  ;;  %v6352_v7 = vld [vmem:[%s10383_s25] ss:$0 sm:$0xff] }
0x28d3   :  { %8230 = vrot.lane.b32.xlu1 %v10186_v48, %s10496_s18 }
0x28d7   :  { %5870 = vrot.lane.b32.xlu1 %v10242_v28, %s10495_s28  ;;  %v6340_v28 = vld [vmem:[%s10380_s22 + $0x40] sm:$0xff] }
0x28db   :  { %5876 = vrot.lane.b32.xlu1 %v5657_v35, %s10490_s16 }
0x294f   :  { %v5762_v18 = vpop.xlane.xlu1 %5761 }
0x2950   :  { %v5764_v32 = vsub.f32 %v5754_v40, %v5762_v18  ;;  %v5759_v22 = vpop.xlane.xlu0 %5758 }
0x2951   :  { %v5763_v34 = vsub.f32 %v5749_v54, %v5759_v22 }
0x2952   :  { %v5767_v57 = vmul.f32 1.442695, %v5764_v32 }
0x2953   :  { %v5765_v26 = vmul.f32 1.442695, %v5763_v34  ;;  %v8231_v60 = vpop.permute.xlu1 %8230 }
0x2954   :  { %v8233_v51 = vunpack.i.h.bf16 %v8231_v60  ;;  %v8232_v31 = vunpack.i.l.bf16 %v8231_v60 }
0x2955   :  { %8488 = vpow2.f32 %v5765_v26 }
0x2956   :  { %v7780_v9 = vpack.c.bf16 %v8233_v51, %v8232_v31  ;;  %8490 = vpow2.f32 %v5767_v57 }
0x2957   :  { %v5871_v44 = vpop.permute.xlu1 %5870 }
0x2958   :  { %7781 = vmatprep.subr.bf16.mxu0 %v7780_v9  ;;  %v5891_v12 = vsel %vm3246_vm5, %v10238_v39, %v5871_v44  ;;  %v6001_v39 = vld [vmem:[%s10382_s24 + $0x38] sm:$0xff] }
0x2959   :  { %7783 = vmatpush3.bf16.msra.mxu0 %v7780_v9 }
0x295b   :  { %v5877_v42 = vpop.permute.xlu1 %5876 }
0x295f   :  { %v8489_v48 = vpop.eup %8488 }
0x2960   :  { %v5769_v55 = vsel %vm3246_vm5, %v8489_v48, 0.0  ;;  %v8491_v3 = vpop.eup %8490 }
0x2961   :  { %5770 = vadd.xlane.f32.xlu0 %v5769_v55  ;;  %v5772_v52 = vsel %vm3246_vm5, %v8491_v3, 0.0 }
0x2965   :  { %5773 = vadd.xlane.f32.xlu0 %v5772_v52 }
0x297b   :  { %5868 = vrot.lane.b32.xlu0 %v10244_v5, %s10495_s28  ;;  %v6341_v5 = vld [vmem:[%s10380_s22 + $0x48] sm:$0xff] }
0x297c   :  { %v7784_v8 = vpack.c.bf16 %v6341_v5, %v6340_v28 }
0x297e   :  { %7785 = vmatprep.subr.bf16.mxu0 %v7784_v8 }
0x297f   :  { %5878 = vrot.lane.b32.xlu0 %v7274_v61, %s10490_s16 }
0x29ee   :  { %v5771_v16 = vpop.xlane.xlu0 %5770 }
0x29ef   :  { %8492 = vrcp.f32 %v5771_v16 }
0x29f2   :  { %v5774_v30 = vpop.xlane.xlu0 %5773 }
0x29f3   :  { %8494 = vrcp.f32 %v5774_v30 }
0x29f6   :  { %v5869_v23 = vpop.permute.xlu0 %5868 }
0x29f7   :  { %v5890_v59 = vsel %vm3246_vm5, %v10240_v1, %v5869_v23  ;;  %v6000_v1 = vld [vmem:[%s10382_s24 + $0x30] sm:$0xff] }
0x29f8   :  { %v5892_v46 = vsel %vm3260_vm7, %v5890_v59, %v5877_v42  ;;  %v7812_v35 = vpack.c.bf16 %v6001_v39, %v6000_v1 }
0x29f9   :  { %v8493_v41 = vpop.eup %8492 }
0x29fa   :  { %v5777_v47 = vmul.f32 %v8493_v41, %v8489_v48  ;;  %v5879_v15 = vpop.permute.xlu0 %5878  ;;  %7813 = vmatprep.subr.bf16.mxu1 %v7812_v35 }
0x29fb   :  { %v5893_v58 = vsel %vm3260_vm7, %v5891_v12, %v5879_v15  ;;  %7815 = vmatpush3.bf16.msra.mxu1 %v7812_v35 }
0x29fc   :  { %7286 = vmatprep.mubr.msk.f32.mxu0 %vm3246_vm5, %v5777_v47 }
0x29fd   :  { %v8495_v56 = vpop.eup %8494 }
0x29fe   :  { %v5778_v20 = vmul.f32 %v8495_v56, %v8491_v3 }
0x2a00   :  { %7287 = vmatmul.mubr.msk.f32.vlgmr.msra.gmra.mrb[80].mxu0 %vm3246_vm5, %v5778_v20 }
0x2a01   :  { %7787 = vmatpush3.bf16.msra.mxu0 %v7784_v8 }
0x2a02   :  { %7789 = vmatprep.subr.bf16.mxu0 %v7788_v21 }
0x2a05   :  { %7791 = vmatpush3.bf16.msra.mxu0 %v7788_v21 }
0x2a06   :  { %7793 = vmatprep.subr.bf16.mxu0 %v7792_v53 }
0x2a09   :  { %7795 = vmatpush3.bf16.msra.mxu0 %v7792_v53 }
0x2a0a   :  { %7797 = vmatprep.subr.bf16.mxu0 %v7796_v25 }
0x2a0d   :  { %7799 = vmatpush3.bf16.msra.mxu0 %v7796_v25 }
0x2ad3   :  { %v7288_v43 = vpop.f32.mrb[80].mxu0 }
0x2ad4   :  { %5886 = vrot.lane.b32.xlu0 %v7288_v43, %s10494_s19  ;;  %v5857_v13 = vpop.f32.mrb[81].mxu0 }
0x2ad5   :  { %5884 = vrot.lane.b32.xlu1 %v5857_v13, %s10494_s19 }
0x2b46   :  { %v5887_v49 = vpop.permute.xlu0 %5886 }
0x2b47   :  { %v5885_v38 = vpop.permute.xlu1 %5884  ;;  %v5895_v61 = vsel %vm101_vm0, %v5893_v58, %v5887_v49 }
0x2b48   :  { %v5894_v37 = vsel %vm101_vm0, %v5892_v46, %v5885_v38 }
0x2b49   :  { %7305 = vmatprep.mubr.msk.f32.mxu0 %vm249_vm1, %v5894_v37 }
0x2b4a   :  { %7306 = vmatmul.mubr.msk.f32.vlgmr.msra.gmra.mrb[82].mxu0 %vm249_vm1, %v5895_v61 }
0x2c1d   :  { %v7307_v40 = vpop.f32.mrb[82].mxu0 }
0x2c1e   :  { %v5985_v36 = vpop.f32.mrb[83].mxu0  ;;  %v5991_v29 = vadd.f32 %v7307_v40, %v6349_v17 }
0x2c1f   :  { %v5986_v54 = vadd.f32 %v6349_v17, %v5985_v36 }
0x2c21   :  { %7324 = vmatprep.mubr.msk.f32.mxu1 %vm249_vm1, %v5986_v54 }
0x2c22   :  { %7325 = vmatmul.mubr.msk.f32.vlgmr.msra.gmra.mrb[88].mxu1 %vm249_vm1, %v5991_v29 }
0x2cf5   :  { %v7326_v18 = vpop.f32.mrb[88].mxu1 }
0x2cf6   :  { %v6087_v32 = vadd.f32 %v7326_v18, %v6352_v7  ;;  %v6081_v22 = vpop.f32.mrb[89].mxu1 }
0x2cf7   :  { %v6082_v34 = vadd.f32 %v6352_v7, %v6081_v22 }
0x2cf8   :  { %6091 = vst [vmem:[%s10384_s26 + $0x8] sm:$0xff] %v6087_v32 }
0x2cf9   :  { %6090 = vst [vmem:[%s10384_s26] sm:$0xff] %v6082_v34 }

</bundles_post_ra>
